<compile_context>
chip_gen: v7x
topology: tpu7x:2x2x1
jax: 0.10.0
libtpu: 0.0.40
codegen_flags: <defaults>
</compile_context>

<pallas_src>
import functools

import jax
import jax.numpy as jnp
from jax import lax
from jax.experimental import pallas as pl
from jax.experimental.pallas import tpu as pltpu

# ----------------------- small synthetic configuration ------------------------
B, L = 2, 8
ESM_FEATS = 64          # stands in for 2560 (esm_feats)
C_S = 32                # trunk.sequence_state_dim       (real: 1024)
C_Z = 32                # trunk.pairwise_state_dim       (real: 128)
SM_C_S = 32             # trunk.structure_module.c_s     (real: 384)
LDDT_HID = 32           # cfg.lddt_head_hid_dim          (real: 128)
N_SM = 2                # number of structure-module blocks (stack dim of states/frames/positions)
DISTO_BINS = 64
LDDT_BINS = 50
N_TOKENS = 23           # restype_num + 3
NUM_TAGS = 6
N_ATOM14 = 14
N_ATOM37 = 37


def _round_up(x, m):
    return (x + m - 1) // m * m


def _pick_vmem_limit():
    # generation-aware scoped-VMEM limit: v5e/v6e (128 MiB phys) -> 96 MiB, v7x (64 MiB) -> 48 MiB.
    try:
        cap = getattr(pltpu.get_tpu_info(), "vmem_capacity_bytes", None)
        if cap:
            return int(min(cap * 3 // 4, 96 << 20))
    except Exception:
        pass
    return None


_VMEM_LIMIT = _pick_vmem_limit()


def _cparams(*semantics):
    return pltpu.CompilerParams(dimension_semantics=tuple(semantics),
                                vmem_limit_bytes=_VMEM_LIMIT)


def _row_tile_pad(rows, in_width, cap=512, bytes_budget=2 << 20):
    """Pick a row tile: multiple of 8, width-aware (bf16 row-slab <= ~2 MiB, so the 2560-wide
    esm_s block caps at 256 rows on v7x), padding waste < 25%, and >=2 grid steps whenever the
    row count allows so both v7x TensorCores get work under "parallel" semantics."""
    w_cap = max(8, (bytes_budget // max(2 * in_width, 1)) // 8 * 8)
    cap = max(8, min(cap, w_cap))
    best = 8
    t = 16
    while t <= cap:
        waste = _round_up(rows, t) - rows
        if waste == 0 or waste * 4 <= rows:
            best = t
        t *= 2
    rows_p = _round_up(rows, best)
    if rows_p // best < 2 and rows_p >= 16:        # guarantee 2 grid steps for megacore
        best = max(8, (rows_p // 2) // 8 * 8)
        rows_p = _round_up(rows, best)
    return best, rows_p


# ------------------------------- Pallas kernels --------------------------------
def _esm_mlp_kernel(x_ref, emb_ref, g_ref, be_ref, w1_ref, b1_ref, w2_ref, b2_ref,
                    o_ref, acc_ref, mu_ref, rs_ref):
    # LayerNorm(esm_feats) -> Linear -> ReLU -> Linear, then += embedding(aa).
    # Grid axis 1 K-tiles W1 over esm_feats; the full-F x block stays resident in bf16 and the
    # (rt, C_S) partial products accumulate in an f32 VMEM scratch (P3 init/finalize pattern).
    k = pl.program_id(1)
    nk = pl.num_programs(1)
    tk = w1_ref.shape[0]
    F = x_ref.shape[1]

    @pl.when(k == 0)
    def _():
        xf = x_ref[...].astype(jnp.float32)
        mu = jnp.mean(xf, axis=-1, keepdims=True)
        var = jnp.mean(jnp.square(xf - mu), axis=-1, keepdims=True)
        mu_ref[...] = mu
        rs_ref[...] = lax.rsqrt(var + 1e-5)
        acc_ref[...] = jnp.zeros_like(acc_ref)

    if tk == F:
        # single K tile (demo sizes): static full-width read
        xk, gk, bk = x_ref[...], g_ref[...], be_ref[...]
    else:
        # real sizes (esm_feats=2560, tk=512): 128-aligned dynamic lane slice of the resident block
        off = pl.multiple_of(k * tk, tk)
        xk = x_ref[:, pl.ds(off, tk)]
        gk = g_ref[:, pl.ds(off, tk)]
        bk = be_ref[:, pl.ds(off, tk)]

    xn = (xk.astype(jnp.float32) - mu_ref[...]) * rs_ref[...] * gk + bk
    acc_ref[...] += jnp.dot(xn.astype(jnp.bfloat16), w1_ref[...],
                            preferred_element_type=jnp.float32)

    @pl.when(k == nk - 1)
    def _():
        h = jnp.maximum(acc_ref[...] + b1_ref[...], 0.0)
        o = jnp.dot(h.astype(jnp.bfloat16), w2_ref[...],
                    preferred_element_type=jnp.float32) + b2_ref[...]
        o_ref[...] = (o + emb_ref[...].astype(jnp.float32)).astype(o_ref.dtype)


def _pair_fused_kernel(left_ref, right_ref, si_ref, sj_ref, wz_ref, bz_ref, pc_ref, tmb_ref,
                       z_ref, disto_ref, ptm_ref, acp_ref, pae_ref, tm_ref):
    # Fused pair block (store-bound at real sizes -> bf16 outputs, lane-dense (ti,tj) reductions):
    #   z        = left_i (+) right_j                              (s_z_0 is all-zeros in the reference)
    #   [disto|ptm] via ONE stacked (2*(ti+tj), C_z)@(C_z, 128) MXU pass using the linear identity
    #   disto_sym = 0.5*((l_i+r_i)Wd (+) (l_j+r_j)Wd) + bd         (symmetrization fused, no XLA swapaxes)
    #   acp      = softmax(ptm)                                    (aligned_confidence_probs)
    #   pae      = sum(acp * bin_centers)                          (lane-dense (ti, tj) store)
    #   tm_term  = sum(acp * tm_per_bin[b])                        (pTM expectation fused; acp never re-read)
    ti = left_ref.shape[1]
    tj = right_ref.shape[1]
    l = left_ref[0].astype(jnp.float32)                      # (ti, C_Z)
    r = right_ref[0].astype(jnp.float32)                     # (tj, C_Z)
    z_ref[0] = (l[:, None, :] + r[None, :, :]).astype(z_ref.dtype)

    stacked = jnp.concatenate([left_ref[0], right_ref[0], si_ref[0], sj_ref[0]],
                              axis=0).astype(jnp.bfloat16)   # (2*(ti+tj), C_Z)
    hs = jnp.dot(stacked, wz_ref[...], preferred_element_type=jnp.float32)   # (.., 128)
    bz = bz_ref[...].astype(jnp.float32)                     # (1, 128)
    hl_i = hs[:ti]
    hr_j = hs[ti:ti + tj]
    u_i = hs[ti + tj:2 * ti + tj, :DISTO_BINS]               # (l_i + r_i) @ Wd
    u_j = hs[2 * ti + tj:, :DISTO_BINS]                      # (l_j + r_j) @ Wd

    disto_sym = 0.5 * (u_i[:, None, :] + u_j[None, :, :]) + bz[None, :, :DISTO_BINS]
    disto_ref[0] = disto_sym.astype(disto_ref.dtype)

    ptm = hl_i[:, None, DISTO_BINS:] + hr_j[None, :, DISTO_BINS:] + bz[None, :, DISTO_BINS:]
    ptm_ref[0] = ptm.astype(ptm_ref.dtype)

    m = jnp.max(ptm, axis=-1, keepdims=True)
    e = jnp.exp(ptm - m)
    probs = e / jnp.sum(e, axis=-1, keepdims=True)           # exact division (reference parity)
    acp_ref[0] = probs.astype(acp_ref.dtype)
    pae_ref[0] = jnp.sum(probs * pc_ref[...], axis=-1).astype(pae_ref.dtype)
    tm_ref[0] = jnp.sum(probs * tmb_ref[...], axis=-1).astype(tm_ref.dtype)


def _lddt_head_kernel(s_ref, ln_g_ref, ln_b_ref, w1_ref, b1_ref, w2_ref, b2_ref,
                      w3_ref, b3_ref, g2_ref, o_ref, plddt_ref):
    # nn.Sequential(LayerNorm, Linear, Linear, Linear) (no nonlinearities, per reference),
    # plus the fused pLDDT (categorical_lddt) softmax-expectation: the per-(row, atom) 50-bin
    # softmax is evaluated with a row-global max shift (exact for softmax; assumes per-row logit
    # spread << 80) and the grouped den/num sums become one small MXU matmul against g2.
    x = s_ref[...].astype(jnp.float32)
    mu = jnp.mean(x, axis=-1, keepdims=True)
    var = jnp.mean(jnp.square(x - mu), axis=-1, keepdims=True)
    xn = (x - mu) * lax.rsqrt(var + 1e-5) * ln_g_ref[...] + ln_b_ref[...]
    h = jnp.dot(xn.astype(jnp.bfloat16), w1_ref[...],
                preferred_element_type=jnp.float32) + b1_ref[...]
    h = jnp.dot(h.astype(jnp.bfloat16), w2_ref[...],
                preferred_element_type=jnp.float32) + b2_ref[...]
    o = jnp.dot(h.astype(jnp.bfloat16), w3_ref[...],
                preferred_element_type=jnp.float32) + b3_ref[...]        # (rt, out_dim_p) f32
    o_ref[...] = o.astype(o_ref.dtype)

    m = jnp.max(o, axis=-1, keepdims=True)
    e = jnp.exp(o - m)
    dn = jnp.dot(e.astype(jnp.bfloat16), g2_ref[...],
                 preferred_element_type=jnp.float32)                     # (rt, 256)
    den = dn[:, :128]
    num = dn[:, 128:]
    plddt_ref[...] = (num / (den + 1e-8)).astype(plddt_ref.dtype)


# ------------------------------ kernel wrappers ---------------------------------
def pallas_linear(x2d, w, b, relu=False, out_dtype=jnp.bfloat16):
    """Tiled y = x @ w + b with bf16 operands (f32 accum), 128-lane padded lane-dense output.
    Activations stream between kernels in bf16 (out_dtype); user-facing heads request f32."""
    rows, fin = x2d.shape
    fout = w.shape[1]
    fout_p = _round_up(fout, 128)                 # unmasked lane-dense stores
    rt, rows_p = _row_tile_pad(rows, fin)
    if fout_p != fout:
        w = jnp.pad(w, ((0, 0), (0, fout_p - fout)))
        b = jnp.pad(b, (0, fout_p - fout))
    if rows_p != rows:
        x2d = jnp.pad(x2d, ((0, rows_p - rows), (0, 0)))

    def kernel(x_ref, w_ref, b_ref, o_ref):
        y = jnp.dot(x_ref[...].astype(jnp.bfloat16), w_ref[...],
                    preferred_element_type=jnp.float32) + b_ref[...]
        if relu:
            y = jnp.maximum(y, 0.0)
        o_ref[...] = y.astype(o_ref.dtype)

    out = pl.pallas_call(
        kernel,
        out_shape=jax.ShapeDtypeStruct((rows_p, fout_p), out_dtype),
        grid=(rows_p // rt,),
        in_specs=[pl.BlockSpec((rt, fin), lambda i: (i, 0)),
                  pl.BlockSpec((fin, fout_p), lambda i: (0, 0)),
                  pl.BlockSpec((1, fout_p), lambda i: (0, 0))],
        out_specs=pl.BlockSpec((rt, fout_p), lambda i: (i, 0)),
        compiler_params=_cparams("parallel"),
    )(x2d.astype(jnp.bfloat16), w.astype(jnp.bfloat16),
      b.reshape(1, -1).astype(jnp.float32))
    return out[:rows, :fout]


def esm_s_mlp_plus_emb(esm_s2d, emb2d, p):
    rows, F = esm_s2d.shape
    rt, rows_p = _row_tile_pad(rows, F)
    # K-tiling over esm_feats: W1 streams in tk-chunks while the bf16 x block stays resident and
    # the (rt, C_S) result accumulates in f32 VMEM scratch (real esm_feats=2560 -> tk=512).
    tk = F
    if F > 512:
        tk = 512
        while F % tk:
            tk //= 2
    nk = F // tk
    if rows_p != rows:
        esm_s2d = jnp.pad(esm_s2d, ((0, rows_p - rows), (0, 0)))
        emb2d = jnp.pad(emb2d, ((0, rows_p - rows), (0, 0)))
    out = pl.pallas_call(
        _esm_mlp_kernel,
        out_shape=jax.ShapeDtypeStruct((rows_p, C_S), jnp.bfloat16),
        grid=(rows_p // rt, nk),
        in_specs=[pl.BlockSpec((rt, F), lambda i, k: (i, 0)),
                  pl.BlockSpec((rt, C_S), lambda i, k: (i, 0)),
                  pl.BlockSpec((1, F), lambda i, k: (0, 0)),
                  pl.BlockSpec((1, F), lambda i, k: (0, 0)),
                  pl.BlockSpec((tk, C_S), lambda i, k: (k, 0)),
                  pl.BlockSpec((1, C_S), lambda i, k: (0, 0)),
                  pl.BlockSpec((C_S, C_S), lambda i, k: (0, 0)),
                  pl.BlockSpec((1, C_S), lambda i, k: (0, 0))],
        out_specs=pl.BlockSpec((rt, C_S), lambda i, k: (i, 0)),
        scratch_shapes=[pltpu.VMEM((rt, C_S), jnp.float32),
                        pltpu.VMEM((rt, 1), jnp.float32),
                        pltpu.VMEM((rt, 1), jnp.float32)],
        compiler_params=_cparams("parallel", "arbitrary"),
    )(esm_s2d.astype(jnp.bfloat16), emb2d,
      p['esm_ln_g'].reshape(1, -1), p['esm_ln_b'].reshape(1, -1),
      p['esm_w1'].astype(jnp.bfloat16), p['esm_b1'].reshape(1, -1),
      p['esm_w2'].astype(jnp.bfloat16), p['esm_b2'].reshape(1, -1))
    return out[:rows]


def pair_block_heads(left, right, mask, p):
    """Fused s_z + symmetrized distogram + ptm logits + aligned_confidence_probs + PAE + pTM term."""
    B_, L_, _ = left.shape
    ti = tj = L_   # TODO(synk): at real L tile to 128x128 (bf16 outs) / 64x128 on v7x per perf review.
    left = left.astype(jnp.bfloat16)
    right = right.astype(jnp.bfloat16)
    lrsum = (left.astype(jnp.float32) + right.astype(jnp.float32)).astype(jnp.bfloat16)
    w_pair = jnp.concatenate([p['disto_w'], p['ptm_w']], axis=1).astype(jnp.bfloat16)
    b_pair = jnp.concatenate([p['disto_b'], p['ptm_b']]).reshape(1, -1)
    pae_centers = _calc_bin_centers(jnp.linspace(0.0, 31.0, DISTO_BINS - 1))

    # per-sample pTM bin table (depends only on mask -> tiny wrapper compute)
    maskf = mask.astype(jnp.float32)
    n = jnp.maximum(maskf.sum(-1), 19.0)
    d0 = 1.24 * (n - 15.0) ** (1.0 / 3.0) - 1.8
    tm_per_bin = 1.0 / (1.0 + (pae_centers[None, :] ** 2) / (d0[:, None] ** 2))   # (B, 64)

    z, disto, ptm, acp, pae, tm_term = pl.pallas_call(
        _pair_fused_kernel,
        out_shape=(jax.ShapeDtypeStruct((B_, L_, L_, C_Z), jnp.bfloat16),
                   jax.ShapeDtypeStruct((B_, L_, L_, DISTO_BINS), jnp.bfloat16),
                   jax.ShapeDtypeStruct((B_, L_, L_, DISTO_BINS), jnp.bfloat16),
                   jax.ShapeDtypeStruct((B_, L_, L_, DISTO_BINS), jnp.bfloat16),
                   jax.ShapeDtypeStruct((B_, L_, L_), jnp.float32),
                   jax.ShapeDtypeStruct((B_, L_, L_), jnp.float32)),
        grid=(B_, L_ // ti, L_ // tj),
        in_specs=[pl.BlockSpec((1, ti, C_Z), lambda b, i, j: (b, i, 0)),
                  pl.BlockSpec((1, tj, C_Z), lambda b, i, j: (b, j, 0)),
                  pl.BlockSpec((1, ti, C_Z), lambda b, i, j: (b, i, 0)),
                  pl.BlockSpec((1, tj, C_Z), lambda b, i, j: (b, j, 0)),
                  pl.BlockSpec((C_Z, 2 * DISTO_BINS), lambda b, i, j: (0, 0)),
                  pl.BlockSpec((1, 2 * DISTO_BINS), lambda b, i, j: (0, 0)),
                  pl.BlockSpec((1, 1, DISTO_BINS), lambda b, i, j: (0, 0, 0)),
                  pl.BlockSpec((1, 1, DISTO_BINS), lambda b, i, j: (b, 0, 0))],
        out_specs=(pl.BlockSpec((1, ti, tj, C_Z), lambda b, i, j: (b, i, j, 0)),
                   pl.BlockSpec((1, ti, tj, DISTO_BINS), lambda b, i, j: (b, i, j, 0)),
                   pl.BlockSpec((1, ti, tj, DISTO_BINS), lambda b, i, j: (b, i, j, 0)),
                   pl.BlockSpec((1, ti, tj, DISTO_BINS), lambda b, i, j: (b, i, j, 0)),
                   pl.BlockSpec((1, ti, tj), lambda b, i, j: (b, i, j)),
                   pl.BlockSpec((1, ti, tj), lambda b, i, j: (b, i, j))),
        compiler_params=_cparams("parallel", "parallel", "parallel"),
    )(left, right, lrsum, lrsum, w_pair, b_pair,
      pae_centers.reshape(1, 1, -1), tm_per_bin.reshape(B_, 1, DISTO_BINS))
    return z, disto, ptm, acp, pae, tm_term, pae_centers


def _lddt_group_matrix(out_dim, out_dim_p):
    # Columns of [den | num] reducer: den[:, a] sums the 50 bins of atom a, num[:, a] additionally
    # weights by the categorical_lddt bin centers; pad columns/atoms are zero.
    cols = jnp.arange(out_dim_p)
    atom = cols // LDDT_BINS
    binc = (cols % LDDT_BINS).astype(jnp.float32)
    valid = (cols < out_dim).astype(jnp.float32)
    onehot = (atom[:, None] == jnp.arange(128)[None, :]).astype(jnp.float32) * valid[:, None]
    centers = (binc + 0.5) / LDDT_BINS
    return jnp.concatenate([onehot, onehot * centers[:, None]], axis=1).astype(jnp.bfloat16)


def lddt_head_apply(states2d, p):
    rows = states2d.shape[0]
    rt, rows_p = _row_tile_pad(rows, SM_C_S)
    out_dim = N_ATOM37 * LDDT_BINS
    out_dim_p = _round_up(out_dim, 128)           # 1850 -> 1920: unmasked lane-dense stores
    if rows_p != rows:
        states2d = jnp.pad(states2d, ((0, rows_p - rows), (0, 0)))
    w3 = jnp.pad(p['lddt_w3'], ((0, 0), (0, out_dim_p - out_dim)))
    b3 = jnp.pad(p['lddt_b3'], (0, out_dim_p - out_dim))
    g2 = _lddt_group_matrix(out_dim, out_dim_p)                        # (out_dim_p, 256)

    logits, plddt = pl.pallas_call(
        _lddt_head_kernel,
        out_shape=(jax.ShapeDtypeStruct((rows_p, out_dim_p), jnp.bfloat16),
                   jax.ShapeDtypeStruct((rows_p, 128), jnp.float32)),
        grid=(rows_p // rt,),
        in_specs=[pl.BlockSpec((rt, SM_C_S), lambda i: (i, 0)),
                  pl.BlockSpec((1, SM_C_S), lambda i: (0, 0)),
                  pl.BlockSpec((1, SM_C_S), lambda i: (0, 0)),
                  pl.BlockSpec((SM_C_S, LDDT_HID), lambda i: (0, 0)),
                  pl.BlockSpec((1, LDDT_HID), lambda i: (0, 0)),
                  pl.BlockSpec((LDDT_HID, LDDT_HID), lambda i: (0, 0)),
                  pl.BlockSpec((1, LDDT_HID), lambda i: (0, 0)),
                  pl.BlockSpec((LDDT_HID, out_dim_p), lambda i: (0, 0)),
                  pl.BlockSpec((1, out_dim_p), lambda i: (0, 0)),
                  pl.BlockSpec((out_dim_p, 256), lambda i: (0, 0))],
        out_specs=(pl.BlockSpec((rt, out_dim_p), lambda i: (i, 0)),
                   pl.BlockSpec((rt, 128), lambda i: (i, 0))),
        compiler_params=_cparams("parallel"),
    )(states2d.astype(jnp.bfloat16),
      p['lddt_ln_g'].reshape(1, -1), p['lddt_ln_b'].reshape(1, -1),
      p['lddt_w1'].astype(jnp.bfloat16), p['lddt_b1'].reshape(1, -1),
      p['lddt_w2'].astype(jnp.bfloat16), p['lddt_b2'].reshape(1, -1),
      w3.astype(jnp.bfloat16), b3.reshape(1, -1), g2)
    return logits[:rows, :out_dim], plddt[:rows, :N_ATOM37]


# ------------------------------- helper math (glue) -----------------------------
def _calc_bin_centers(boundaries):
    step = boundaries[1] - boundaries[0]
    centers = boundaries + step / 2.0
    return jnp.concatenate([centers, centers[-1:] + step], axis=0)


# --------------------------------- parameters -----------------------------------
def init_params(key):
    def nrm(k, shape, scale=0.05):
        return (scale * jax.random.normal(k, shape)).astype(jnp.float32)

    keys = iter(jax.random.split(key, 40))
    p = {}
    # esm_s_mlp
    p['esm_ln_g'] = jnp.ones((ESM_FEATS,), jnp.float32)
    p['esm_ln_b'] = jnp.zeros((ESM_FEATS,), jnp.float32)
    p['esm_w1'] = nrm(next(keys), (ESM_FEATS, C_S)); p['esm_b1'] = jnp.zeros((C_S,), jnp.float32)
    p['esm_w2'] = nrm(next(keys), (C_S, C_S));       p['esm_b2'] = jnp.zeros((C_S,), jnp.float32)
    # token embedding (padding_idx = 0)
    p['embedding'] = nrm(next(keys), (N_TOKENS, C_S)).at[0].set(0.0)
    # heads
    p['disto_w'] = nrm(next(keys), (C_Z, DISTO_BINS)); p['disto_b'] = jnp.zeros((DISTO_BINS,), jnp.float32)
    p['ptm_w'] = nrm(next(keys), (C_Z, DISTO_BINS));   p['ptm_b'] = jnp.zeros((DISTO_BINS,), jnp.float32)
    p['lm_w'] = nrm(next(keys), (C_S, N_TOKENS));      p['lm_b'] = jnp.zeros((N_TOKENS,), jnp.float32)
    # lddt head
    p['lddt_ln_g'] = jnp.ones((SM_C_S,), jnp.float32)
    p['lddt_ln_b'] = jnp.zeros((SM_C_S,), jnp.float32)
    p['lddt_w1'] = nrm(next(keys), (SM_C_S, LDDT_HID));   p['lddt_b1'] = jnp.zeros((LDDT_HID,), jnp.float32)
    p['lddt_w2'] = nrm(next(keys), (LDDT_HID, LDDT_HID)); p['lddt_b2'] = jnp.zeros((LDDT_HID,), jnp.float32)
    p['lddt_w3'] = nrm(next(keys), (LDDT_HID, N_ATOM37 * LDDT_BINS))
    p['lddt_b3'] = jnp.zeros((N_ATOM37 * LDDT_BINS,), jnp.float32)
    # trunk placeholder projections
    p['trunk_s_w'] = nrm(next(keys), (C_S, C_S));    p['trunk_s_b'] = jnp.zeros((C_S,), jnp.float32)
    p['trunk_left_w'] = nrm(next(keys), (C_S, C_Z)); p['trunk_left_b'] = jnp.zeros((C_Z,), jnp.float32)
    p['trunk_right_w'] = nrm(next(keys), (C_S, C_Z)); p['trunk_right_b'] = jnp.zeros((C_Z,), jnp.float32)
    p['trunk_state_w'] = nrm(next(keys), (N_SM, C_S, SM_C_S))
    p['trunk_state_b'] = jnp.zeros((N_SM, SM_C_S), jnp.float32)
    p['trunk_frame_w'] = nrm(next(keys), (SM_C_S, 7)); p['trunk_frame_b'] = jnp.zeros((7,), jnp.float32)
    p['trunk_pos_w'] = nrm(next(keys), (SM_C_S, N_ATOM14 * 3))
    p['trunk_pos_b'] = jnp.zeros((N_ATOM14 * 3,), jnp.float32)
    p['cctop_w'] = nrm(next(keys), (C_S, NUM_TAGS)); p['cctop_b'] = jnp.zeros((NUM_TAGS,), jnp.float32)
    # TODO(synk): openfold residue_constants atom tables unavailable; deterministic synthetic tables instead.
    p['restype_atom14_mask'] = (jnp.arange(N_ATOM14)[None, :]
                                < (4 + jnp.arange(21)[:, None] % 11)).astype(jnp.float32)
    p['restype_atom37_mask'] = (jnp.arange(N_ATOM37)[None, :]
                                < (5 + 3 * (jnp.arange(21)[:, None] % 11))).astype(jnp.float32)
    return p


# --------------------------------- trunk stub -----------------------------------
def trunk_stub(p, s_s_0, aa, residx, mask):
    # TODO(synk): FoldingTrunk (evoformer + IPA structure module + recycling) source not provided;
    # replaced with a clearly-marked deterministic placeholder whose matmuls run in fused Pallas
    # linears. s_z_0 is all-zeros in the reference forward, so the pair state is formed as
    # left[:, :, None] + right[:, None, :] inside the fused pair kernel downstream.
    B_, L_, _ = s_s_0.shape
    rows = B_ * L_
    s_s = pallas_linear(s_s_0.reshape(rows, C_S), p['trunk_s_w'], p['trunk_s_b']).reshape(B_, L_, C_S)

    # One fused matmul: left | right | per-block states | cctop logits (single read of s_s, bf16 out).
    w_cat = jnp.concatenate(
        [p['trunk_left_w'], p['trunk_right_w'],
         p['trunk_state_w'].transpose(1, 0, 2).reshape(C_S, N_SM * SM_C_S),
         p['cctop_w']], axis=1)
    b_cat = jnp.concatenate(
        [p['trunk_left_b'], p['trunk_right_b'],
         p['trunk_state_b'].reshape(N_SM * SM_C_S), p['cctop_b']])
    fused = pallas_linear(s_s.reshape(rows, C_S), w_cat, b_cat)
    off = 0
    left = fused[:, off:off + C_Z].reshape(B_, L_, C_Z); off += C_Z
    right = fused[:, off:off + C_Z].reshape(B_, L_, C_Z); off += C_Z
    states = fused[:, off:off + N_SM * SM_C_S].reshape(B_, L_, N_SM, SM_C_S)
    states = jnp.transpose(states, (2, 0, 1, 3))                       # (N_SM, B, L, SM_C_S)
    off += N_SM * SM_C_S
    logits_cctop = fused[:, off:off + NUM_TAGS].astype(jnp.float32).reshape(B_, L_, NUM_TAGS)

    # frames | positions share the states input: one fused matmul (f32 user-facing geometry).
    st2d = states.reshape(N_SM * rows, SM_C_S)
    wfp = jnp.concatenate([p['trunk_frame_w'], p['trunk_pos_w']], axis=1)
    bfp = jnp.concatenate([p['trunk_frame_b'], p['trunk_pos_b']])
    fp = pallas_linear(st2d, wfp, bfp, out_dtype=jnp.float32)
    frames = fp[:, :7].reshape(N_SM, B_, L_, 7)
    positions = fp[:, 7:7 + N_ATOM14 * 3].reshape(N_SM, B_, L_, N_ATOM14, 3)

    return {'s_s': s_s, 'frames': frames, 'positions': positions, 'states': states,
            'logits_cctop': logits_cctop, 'pair_left': left, 'pair_right': right}


# --------------------------------- forward --------------------------------------
def esmfold_forward(params, esm_s, aa, mask, residx):
    B_, L_ = aa.shape
    rows = B_ * L_

    # s_s_0 = esm_s_mlp(esm_s) + embedding(aa)   (fused, K-tiled Pallas kernel, bf16 out)
    emb = params['embedding'][aa]                                   # gather = glue
    s_s_0 = esm_s_mlp_plus_emb(esm_s.reshape(rows, ESM_FEATS),
                               emb.reshape(rows, C_S), params).reshape(B_, L_, C_S)
    # s_z_0 = zeros(B, L, L, C_Z) in the reference; formed implicitly inside the fused pair kernel.

    structure = trunk_stub(params, s_s_0, aa, residx, mask)
    left = structure.pop('pair_left')
    right = structure.pop('pair_right')

    # fused pair kernel: s_z, symmetrized distogram, ptm logits, acp, PAE, pTM per-bin expectation
    s_z, disto_sym, ptm_logits, acp, pae, tm_term, pae_centers = pair_block_heads(
        left, right, mask, params)
    structure['s_z'] = s_z
    structure['distogram_logits'] = disto_sym       # symmetrization fused in-kernel (no XLA swapaxes)

    # backbone_positions = flatten(positions[-1, :, :, :3, :].permute(0, 2, 1, 3), -3, -2)
    pos_last = structure['positions'][-1]                            # (B, L, 14, 3)
    structure['backbone_positions'] = jnp.transpose(
        pos_last[:, :, :3, :], (0, 2, 1, 3)).reshape(B_, 3 * L_, 3)

    # lm head (user-facing logits kept f32; output padded to 128 lanes inside pallas_linear)
    structure['lm_logits'] = pallas_linear(
        structure['s_s'].reshape(rows, C_S), params['lm_w'], params['lm_b'],
        out_dtype=jnp.float32).reshape(B_, L_, N_TOKENS)
    structure['aatype'] = aa

    # make_atom14_masks (synthetic tables) + mask multiply
    atom14 = params['restype_atom14_mask'][aa] * mask[..., None]
    atom37 = params['restype_atom37_mask'][aa] * mask[..., None]
    structure['atom14_atom_exists'] = atom14
    structure['atom37_atom_exists'] = atom37
    structure['residue_index'] = residx

    # lddt head + fused pLDDT (categorical_lddt) expectation
    states = structure['states']
    lddt_logits, plddt_all = lddt_head_apply(states.reshape(-1, SM_C_S), params)
    structure['lddt_head'] = lddt_logits.reshape(states.shape[0], B_, L_, N_ATOM37, LDDT_BINS)
    plddt = plddt_all.reshape(states.shape[0], B_, L_, N_ATOM37)[-1]
    structure['plddt'] = 100.0 * plddt

    # pTM: the per-bin expectation was fused into the pair kernel; only the masked
    # normalization / max over (L, L) stays in plain JAX (mask-equivalent of the :sl slicing).
    structure['ptm_logits'] = ptm_logits
    maskf = mask.astype(jnp.float32)
    normed = maskf / (1e-8 + maskf.sum(-1, keepdims=True))
    per_alignment = jnp.sum(tm_term * normed[:, None, :], axis=-1)
    structure['ptm'] = jnp.max(jnp.where(maskf > 0, per_alignment, -jnp.inf), axis=-1)

    # predicted aligned error (computed in the fused pair kernel, lane-dense (B, L, L) store)
    structure['aligned_confidence_probs'] = acp
    structure['predicted_aligned_error'] = pae
    structure['max_predicted_aligned_error'] = pae_centers[-1] * jnp.ones((B_,), jnp.float32)

    structure['mean_plddt'] = ((structure['plddt'] * atom37).sum(axis=(1, 2))
                               / (atom37.sum(axis=(1, 2)) + 1e-8))
    structure['frame_mask'] = mask
    structure['backbone_atoms_mask'] = jnp.repeat(mask, 3, axis=-1)
    # TODO(synk): openfold Rigid.from_tensor_7 object not available; return quaternion/translation split.
    structure['pred_frames'] = {'quats': structure['frames'][-1][..., :4],
                                'trans': structure['frames'][-1][..., 4:]}
    return structure


# ----------------------------------- main ----------------------------------------
if __name__ == "__main__":
    key = jax.random.PRNGKey(0)
    kp, k1, k2 = jax.random.split(key, 3)
    params = init_params(kp)

    esm_s = jax.random.normal(k1, (B, L, ESM_FEATS), dtype=jnp.float32)
    aa = jax.random.randint(k2, (B, L), 0, 21)
    mask = jnp.ones((B, L), jnp.float32).at[1, L - 2:].set(0.0)
    residx = jnp.broadcast_to(jnp.arange(L, dtype=jnp.int32), (B, L))

    fwd = jax.jit(functools.partial(esmfold_forward, params))
    out = fwd(esm_s, aa, mask, residx)
    jax.block_until_ready(out)
    print("KERNEL_OK")
</pallas_src>

<mosaic_0001>
module attributes {stable_mosaic.version = 11 : i64} {
  func.func @kernel(%arg0: i32, %arg1: memref<8x32xbf16, #tpu.memory_space<vmem>>, %arg2: memref<32x128xbf16, #tpu.memory_space<vmem>>, %arg3: memref<1x128xf32, #tpu.memory_space<vmem>>, %arg4: memref<8x128xbf16, #tpu.memory_space<vmem>>) attributes {dimension_semantics = [#tpu.dimension_semantics<parallel>], iteration_bounds = array<i64: 2>, scalar_prefetch = 0 : i64, scratch_operands = 0 : i64, tpu.core_type = #tpu.core_type<tc>, window_params = [{transform_indices = @transform_0, window_bounds = array<i64: 8, 32>}, {pipeline_mode = #tpu.pipeline_mode<synchronous>, transform_indices = @transform_1, window_bounds = array<i64: 32, 128>}, {pipeline_mode = #tpu.pipeline_mode<synchronous>, transform_indices = @transform_2, window_bounds = array<i64: 1, 128>}, {transform_indices = @transform_3, window_bounds = array<i64: 8, 128>}]} {
    %c0 = arith.constant 0 : index
    %c0_0 = arith.constant 0 : index
    %0 = vector.load %arg1[%c0, %c0_0] : memref<8x32xbf16, #tpu.memory_space<vmem>>, vector<8x32xbf16>
    %c0_1 = arith.constant 0 : index
    %c0_2 = arith.constant 0 : index
    %1 = vector.load %arg2[%c0_1, %c0_2] : memref<32x128xbf16, #tpu.memory_space<vmem>>, vector<32x128xbf16>
    %cst = arith.constant dense<0.000000e+00> : vector<8x128xf32>
    %2 = tpu.matmul %0, %1, %cst {dimension_numbers = #tpu.dot_dimension_numbers<[1], [0], [0], [1], [0, 0, 1, 1], [], []>} : vector<8x32xbf16>, vector<32x128xbf16>, vector<8x128xf32> -> vector<8x128xf32>
    %c0_3 = arith.constant 0 : index
    %c0_4 = arith.constant 0 : index
    %3 = vector.load %arg3[%c0_3, %c0_4] : memref<1x128xf32, #tpu.memory_space<vmem>>, vector<1x128xf32>
    %4 = vector.broadcast %3 : vector<1x128xf32> to vector<8x128xf32>
    %5 = arith.addf %2, %4 : vector<8x128xf32>
    %6 = arith.truncf %5 : vector<8x128xf32> to vector<8x128xbf16>
    %c0_5 = arith.constant 0 : index
    %c0_6 = arith.constant 0 : index
    %7 = vector.load %arg4[%c0_5, %c0_6] : memref<8x128xbf16, #tpu.memory_space<vmem>>, vector<8x128xbf16>
    tpu.vector_store %arg4[%c0_5, %c0_6], %6 {strides = array<i32>} : memref<8x128xbf16, #tpu.memory_space<vmem>>, vector<8x128xbf16>,
    return
  }
  func.func @transform_0(%arg0: i32) -> (i32, i32) {
    %c0_i32 = arith.constant 0 : i32
    %c0_i32_0 = arith.constant 0 : i32
    return %arg0, %c0_i32 : i32, i32
  }
  func.func @transform_1(%arg0: i32) -> (i32, i32) {
    %c0_i32 = arith.constant 0 : i32
    %c0_i32_0 = arith.constant 0 : i32
    %c0_i32_1 = arith.constant 0 : i32
    return %c0_i32, %c0_i32_0 : i32, i32
  }
  func.func @transform_2(%arg0: i32) -> (i32, i32) {
    %c0_i32 = arith.constant 0 : i32
    %c0_i32_0 = arith.constant 0 : i32
    %c0_i32_1 = arith.constant 0 : i32
    return %c0_i32, %c0_i32_0 : i32, i32
  }
  func.func @transform_3(%arg0: i32) -> (i32, i32) {
    %c0_i32 = arith.constant 0 : i32
    %c0_i32_0 = arith.constant 0 : i32
    return %arg0, %c0_i32 : i32, i32
  }
}

module attributes {stable_mosaic.version = 11 : i64} {
  func.func @_esm_mlp_kernel(%arg0: i32, %arg1: i32, %arg2: memref<8x64xbf16, #tpu.memory_space<vmem>>, %arg3: memref<8x32xf32, #tpu.memory_space<vmem>>, %arg4: memref<1x64xf32, #tpu.memory_space<vmem>>, %arg5: memref<1x64xf32, #tpu.memory_space<vmem>>, %arg6: memref<64x32xbf16, #tpu.memory_space<vmem>>, %arg7: memref<1x32xf32, #tpu.memory_space<vmem>>, %arg8: memref<32x32xbf16, #tpu.memory_space<vmem>>, %arg9: memref<1x32xf32, #tpu.memory_space<vmem>>, %arg10: memref<8x32xbf16, #tpu.memory_space<vmem>>, %arg11: memref<8x32xf32, #tpu.memory_space<vmem>>, %arg12: memref<8x1xf32, #tpu.memory_space<vmem>>, %arg13: memref<8x1xf32, #tpu.memory_space<vmem>>) attributes {dimension_semantics = [#tpu.dimension_semantics<parallel>, #tpu.dimension_semantics<arbitrary>], iteration_bounds = array<i64: 2, 1>, scalar_prefetch = 0 : i64, scratch_operands = 3 : i64, tpu.core_type = #tpu.core_type<tc>, window_params = [{transform_indices = @transform_0, window_bounds = array<i64: 8, 64>}, {transform_indices = @transform_1, window_bounds = array<i64: 8, 32>}, {pipeline_mode = #tpu.pipeline_mode<synchronous>, transform_indices = @transform_2, window_bounds = array<i64: 1, 64>}, {pipeline_mode = #tpu.pipeline_mode<synchronous>, transform_indices = @transform_3, window_bounds = array<i64: 1, 64>}, {transform_indices = @transform_4, window_bounds = array<i64: 64, 32>}, {pipeline_mode = #tpu.pipeline_mode<synchronous>, transform_indices = @transform_5, window_bounds = array<i64: 1, 32>}, {pipeline_mode = #tpu.pipeline_mode<synchronous>, transform_indices = @transform_6, window_bounds = array<i64: 32, 32>}, {pipeline_mode = #tpu.pipeline_mode<synchronous>, transform_indices = @transform_7, window_bounds = array<i64: 1, 32>}, {transform_indices = @transform_8, window_bounds = array<i64: 8, 32>}]} {
    %c0_i32 = arith.constant 0 : i32
    %0 = arith.cmpi eq, %arg1, %c0_i32 : i32
    %1 = arith.extui %0 : i1 to i32
    %c0_i32_0 = arith.constant 0 : i32
    %2 = arith.cmpi ne, %1, %c0_i32_0 : i32
    scf.if %2 {
      %c0_18 = arith.constant 0 : index
      %c0_19 = arith.constant 0 : index
      %26 = vector.load %arg2[%c0_18, %c0_19] : memref<8x64xbf16, #tpu.memory_space<vmem>>, vector<8x64xbf16>
      %27 = arith.extf %26 : vector<8x64xbf16> to vector<8x64xf32>
      %cst_20 = arith.constant dense<0.000000e+00> : vector<8xf32>
      %28 = vector.multi_reduction <add>, %27, %cst_20 [1] : vector<8x64xf32> to vector<8xf32>
      %29 = vector.shape_cast %28 : vector<8xf32> to vector<8x1xf32>
      %cst_21 = arith.constant 6.400000e+01 : f32
      %30 = vector.broadcast %cst_21 : f32 to vector<8x1xf32>
      %31 = arith.divf %29, %30 : vector<8x1xf32>
      %32 = vector.broadcast %31 : vector<8x1xf32> to vector<8x64xf32>
      %33 = arith.subf %27, %32 : vector<8x64xf32>
      %34 = arith.mulf %33, %33 : vector<8x64xf32>
      %cst_22 = arith.constant dense<0.000000e+00> : vector<8xf32>
      %35 = vector.multi_reduction <add>, %34, %cst_22 [1] : vector<8x64xf32> to vector<8xf32>
      %36 = vector.shape_cast %35 : vector<8xf32> to vector<8x1xf32>
      %cst_23 = arith.constant 6.400000e+01 : f32
      %37 = vector.broadcast %cst_23 : f32 to vector<8x1xf32>
      %38 = arith.divf %36, %37 : vector<8x1xf32>
      %c0_24 = arith.constant 0 : index
      %c0_25 = arith.constant 0 : index
      %39 = vector.load %arg12[%c0_24, %c0_25] : memref<8x1xf32, #tpu.memory_space<vmem>>, vector<8x1xf32>
      tpu.vector_store %arg12[%c0_24, %c0_25], %31 {strides = array<i32>} : memref<8x1xf32, #tpu.memory_space<vmem>>, vector<8x1xf32>,
      %cst_26 = arith.constant 9.99999974E-6 : f32
      %40 = vector.broadcast %cst_26 : f32 to vector<8x1xf32>
      %41 = arith.addf %38, %40 : vector<8x1xf32>
      %42 = math.rsqrt %41 : vector<8x1xf32>
      %c0_27 = arith.constant 0 : index
      %c0_28 = arith.constant 0 : index
      %43 = vector.load %arg13[%c0_27, %c0_28] : memref<8x1xf32, #tpu.memory_space<vmem>>, vector<8x1xf32>
      tpu.vector_store %arg13[%c0_27, %c0_28], %42 {strides = array<i32>} : memref<8x1xf32, #tpu.memory_space<vmem>>, vector<8x1xf32>,
      %cst_29 = arith.constant 0.000000e+00 : f32
      %44 = vector.broadcast %cst_29 : f32 to vector<8x32xf32>
      %c0_30 = arith.constant 0 : index
      %c0_31 = arith.constant 0 : index
      %45 = vector.load %arg11[%c0_30, %c0_31] : memref<8x32xf32, #tpu.memory_space<vmem>>, vector<8x32xf32>
      tpu.vector_store %arg11[%c0_30, %c0_31], %44 {strides = array<i32>} : memref<8x32xf32, #tpu.memory_space<vmem>>, vector<8x32xf32>,
    } else {
    }
    %c0 = arith.constant 0 : index
    %c0_1 = arith.constant 0 : index
    %3 = vector.load %arg2[%c0, %c0_1] : memref<8x64xbf16, #tpu.memory_space<vmem>>, vector<8x64xbf16>
    %c0_2 = arith.constant 0 : index
    %c0_3 = arith.constant 0 : index
    %4 = vector.load %arg4[%c0_2, %c0_3] : memref<1x64xf32, #tpu.memory_space<vmem>>, vector<1x64xf32>
    %c0_4 = arith.constant 0 : index
    %c0_5 = arith.constant 0 : index
    %5 = vector.load %arg5[%c0_4, %c0_5] : memref<1x64xf32, #tpu.memory_space<vmem>>, vector<1x64xf32>
    %6 = arith.extf %3 : vector<8x64xbf16> to vector<8x64xf32>
    %c0_6 = arith.constant 0 : index
    %c0_7 = arith.constant 0 : index
    %7 = vector.load %arg12[%c0_6, %c0_7] : memref<8x1xf32, #tpu.memory_space<vmem>>, vector<8x1xf32>
    %8 = vector.broadcast %7 : vector<8x1xf32> to vector<8x64xf32>
    %9 = arith.subf %6, %8 : vector<8x64xf32>
    %c0_8 = arith.constant 0 : index
    %c0_9 = arith.constant 0 : index
    %10 = vector.load %arg13[%c0_8, %c0_9] : memref<8x1xf32, #tpu.memory_space<vmem>>, vector<8x1xf32>
    %11 = vector.broadcast %10 : vector<8x1xf32> to vector<8x64xf32>
    %12 = arith.mulf %9, %11 : vector<8x64xf32>
    %13 = vector.broadcast %4 : vector<1x64xf32> to vector<8x64xf32>
    %14 = arith.mulf %12, %13 : vector<8x64xf32>
    %15 = vector.broadcast %5 : vector<1x64xf32> to vector<8x64xf32>
    %16 = arith.addf %14, %15 : vector<8x64xf32>
    %c0_10 = arith.constant 0 : index
    %c0_11 = arith.constant 0 : index
    %17 = vector.load %arg11[%c0_10, %c0_11] : memref<8x32xf32, #tpu.memory_space<vmem>>, vector<8x32xf32>
    %18 = arith.truncf %16 : vector<8x64xf32> to vector<8x64xbf16>
    %c0_12 = arith.constant 0 : index
    %c0_13 = arith.constant 0 : index
    %19 = vector.load %arg6[%c0_12, %c0_13] : memref<64x32xbf16, #tpu.memory_space<vmem>>, vector<64x32xbf16>
    %cst = arith.constant dense<0.000000e+00> : vector<8x32xf32>
    %20 = tpu.matmul %18, %19, %cst {dimension_numbers = #tpu.dot_dimension_numbers<[1], [0], [0], [1], [0, 0, 1, 1], [], []>} : vector<8x64xbf16>, vector<64x32xbf16>, vector<8x32xf32> -> vector<8x32xf32>
    %21 = arith.addf %17, %20 : vector<8x32xf32>
    %c0_14 = arith.constant 0 : index
    %c0_15 = arith.constant 0 : index
    %22 = vector.load %arg11[%c0_14, %c0_15] : memref<8x32xf32, #tpu.memory_space<vmem>>, vector<8x32xf32>
    tpu.vector_store %arg11[%c0_14, %c0_15], %21 {strides = array<i32>} : memref<8x32xf32, #tpu.memory_space<vmem>>, vector<8x32xf32>,
    %c0_i32_16 = arith.constant 0 : i32
    %23 = arith.cmpi eq, %arg1, %c0_i32_16 : i32
    %24 = arith.extui %23 : i1 to i32
    %c0_i32_17 = arith.constant 0 : i32
    %25 = arith.cmpi ne, %24, %c0_i32_17 : i32
    scf.if %25 {
      %c0_18 = arith.constant 0 : index
      %c0_19 = arith.constant 0 : index
      %26 = vector.load %arg11[%c0_18, %c0_19] : memref<8x32xf32, #tpu.memory_space<vmem>>, vector<8x32xf32>
      %c0_20 = arith.constant 0 : index
      %c0_21 = arith.constant 0 : index
      %27 = vector.load %arg7[%c0_20, %c0_21] : memref<1x32xf32, #tpu.memory_space<vmem>>, vector<1x32xf32>
      %28 = vector.broadcast %27 : vector<1x32xf32> to vector<8x32xf32>
      %29 = arith.addf %26, %28 : vector<8x32xf32>
      %cst_22 = arith.constant 0.000000e+00 : f32
      %30 = vector.broadcast %cst_22 : f32 to vector<8x32xf32>
      %31 = arith.maximumf %29, %30 : vector<8x32xf32>
      %32 = arith.truncf %31 : vector<8x32xf32> to vector<8x32xbf16>
      %c0_23 = arith.constant 0 : index
      %c0_24 = arith.constant 0 : index
      %33 = vector.load %arg8[%c0_23, %c0_24] : memref<32x32xbf16, #tpu.memory_space<vmem>>, vector<32x32xbf16>
      %cst_25 = arith.constant dense<0.000000e+00> : vector<8x32xf32>
      %34 = tpu.matmul %32, %33, %cst_25 {dimension_numbers = #tpu.dot_dimension_numbers<[1], [0], [0], [1], [0, 0, 1, 1], [], []>} : vector<8x32xbf16>, vector<32x32xbf16>, vector<8x32xf32> -> vector<8x32xf32>
      %c0_26 = arith.constant 0 : index
      %c0_27 = arith.constant 0 : index
      %35 = vector.load %arg9[%c0_26, %c0_27] : memref<1x32xf32, #tpu.memory_space<vmem>>, vector<1x32xf32>
      %36 = vector.broadcast %35 : vector<1x32xf32> to vector<8x32xf32>
      %37 = arith.addf %34, %36 : vector<8x32xf32>
      %c0_28 = arith.constant 0 : index
      %c0_29 = arith.constant 0 : index
      %38 = vector.load %arg3[%c0_28, %c0_29] : memref<8x32xf32, #tpu.memory_space<vmem>>, vector<8x32xf32>
      %39 = arith.addf %37, %38 : vector<8x32xf32>
      %40 = arith.truncf %39 : vector<8x32xf32> to vector<8x32xbf16>
      %c0_30 = arith.constant 0 : index
      %c0_31 = arith.constant 0 : index
      %41 = vector.load %arg10[%c0_30, %c0_31] : memref<8x32xbf16, #tpu.memory_space<vmem>>, vector<8x32xbf16>
      tpu.vector_store %arg10[%c0_30, %c0_31], %40 {strides = array<i32>} : memref<8x32xbf16, #tpu.memory_space<vmem>>, vector<8x32xbf16>,
    } else {
    }
    return
  }
  func.func @transform_0(%arg0: i32, %arg1: i32) -> (i32, i32) {
    %c0_i32 = arith.constant 0 : i32
    %c0_i32_0 = arith.constant 0 : i32
    return %arg0, %c0_i32 : i32, i32
  }
  func.func @transform_1(%arg0: i32, %arg1: i32) -> (i32, i32) {
    %c0_i32 = arith.constant 0 : i32
    %c0_i32_0 = arith.constant 0 : i32
    return %arg0, %c0_i32 : i32, i32
  }
  func.func @transform_2(%arg0: i32, %arg1: i32) -> (i32, i32) {
    %c0_i32 = arith.constant 0 : i32
    %c0_i32_0 = arith.constant 0 : i32
    %c0_i32_1 = arith.constant 0 : i32
    return %c0_i32, %c0_i32_0 : i32, i32
  }
  func.func @transform_3(%arg0: i32, %arg1: i32) -> (i32, i32) {
    %c0_i32 = arith.constant 0 : i32
    %c0_i32_0 = arith.constant 0 : i32
    %c0_i32_1 = arith.constant 0 : i32
    return %c0_i32, %c0_i32_0 : i32, i32
  }
  func.func @transform_4(%arg0: i32, %arg1: i32) -> (i32, i32) {
    %c0_i32 = arith.constant 0 : i32
    %c0_i32_0 = arith.constant 0 : i32
    return %arg1, %c0_i32 : i32, i32
  }
  func.func @transform_5(%arg0: i32, %arg1: i32) -> (i32, i32) {
    %c0_i32 = arith.constant 0 : i32
    %c0_i32_0 = arith.constant 0 : i32
    %c0_i32_1 = arith.constant 0 : i32
    return %c0_i32, %c0_i32_0 : i32, i32
  }
  func.func @transform_6(%arg0: i32, %arg1: i32) -> (i32, i32) {
    %c0_i32 = arith.constant 0 : i32
    %c0_i32_0 = arith.constant 0 : i32
    %c0_i32_1 = arith.constant 0 : i32
    return %c0_i32, %c0_i32_0 : i32, i32
  }
  func.func @transform_7(%arg0: i32, %arg1: i32) -> (i32, i32) {
    %c0_i32 = arith.constant 0 : i32
    %c0_i32_0 = arith.constant 0 : i32
    %c0_i32_1 = arith.constant 0 : i32
    return %c0_i32, %c0_i32_0 : i32, i32
  }
  func.func @transform_8(%arg0: i32, %arg1: i32) -> (i32, i32) {
    %c0_i32 = arith.constant 0 : i32
    %c0_i32_0 = arith.constant 0 : i32
    return %arg0, %c0_i32 : i32, i32
  }
}

module attributes {stable_mosaic.version = 11 : i64} {
  func.func @kernel(%arg0: i32, %arg1: memref<8x32xbf16, #tpu.memory_space<vmem>>, %arg2: memref<32x256xbf16, #tpu.memory_space<vmem>>, %arg3: memref<1x256xf32, #tpu.memory_space<vmem>>, %arg4: memref<8x256xbf16, #tpu.memory_space<vmem>>) attributes {dimension_semantics = [#tpu.dimension_semantics<parallel>], iteration_bounds = array<i64: 2>, scalar_prefetch = 0 : i64, scratch_operands = 0 : i64, tpu.core_type = #tpu.core_type<tc>, window_params = [{transform_indices = @transform_0, window_bounds = array<i64: 8, 32>}, {pipeline_mode = #tpu.pipeline_mode<synchronous>, transform_indices = @transform_1, window_bounds = array<i64: 32, 256>}, {pipeline_mode = #tpu.pipeline_mode<synchronous>, transform_indices = @transform_2, window_bounds = array<i64: 1, 256>}, {transform_indices = @transform_3, window_bounds = array<i64: 8, 256>}]} {
    %c0 = arith.constant 0 : index
    %c0_0 = arith.constant 0 : index
    %0 = vector.load %arg1[%c0, %c0_0] : memref<8x32xbf16, #tpu.memory_space<vmem>>, vector<8x32xbf16>
    %c0_1 = arith.constant 0 : index
    %c0_2 = arith.constant 0 : index
    %1 = vector.load %arg2[%c0_1, %c0_2] : memref<32x256xbf16, #tpu.memory_space<vmem>>, vector<32x256xbf16>
    %cst = arith.constant dense<0.000000e+00> : vector<8x256xf32>
    %2 = tpu.matmul %0, %1, %cst {dimension_numbers = #tpu.dot_dimension_numbers<[1], [0], [0], [1], [0, 0, 1, 1], [], []>} : vector<8x32xbf16>, vector<32x256xbf16>, vector<8x256xf32> -> vector<8x256xf32>
    %c0_3 = arith.constant 0 : index
    %c0_4 = arith.constant 0 : index
    %3 = vector.load %arg3[%c0_3, %c0_4] : memref<1x256xf32, #tpu.memory_space<vmem>>, vector<1x256xf32>
    %4 = vector.broadcast %3 : vector<1x256xf32> to vector<8x256xf32>
    %5 = arith.addf %2, %4 : vector<8x256xf32>
    %6 = arith.truncf %5 : vector<8x256xf32> to vector<8x256xbf16>
    %c0_5 = arith.constant 0 : index
    %c0_6 = arith.constant 0 : index
    %7 = vector.load %arg4[%c0_5, %c0_6] : memref<8x256xbf16, #tpu.memory_space<vmem>>, vector<8x256xbf16>
    tpu.vector_store %arg4[%c0_5, %c0_6], %6 {strides = array<i32>} : memref<8x256xbf16, #tpu.memory_space<vmem>>, vector<8x256xbf16>,
    return
  }
  func.func @transform_0(%arg0: i32) -> (i32, i32) {
    %c0_i32 = arith.constant 0 : i32
    %c0_i32_0 = arith.constant 0 : i32
    return %arg0, %c0_i32 : i32, i32
  }
  func.func @transform_1(%arg0: i32) -> (i32, i32) {
    %c0_i32 = arith.constant 0 : i32
    %c0_i32_0 = arith.constant 0 : i32
    %c0_i32_1 = arith.constant 0 : i32
    return %c0_i32, %c0_i32_0 : i32, i32
  }
  func.func @transform_2(%arg0: i32) -> (i32, i32) {
    %c0_i32 = arith.constant 0 : i32
    %c0_i32_0 = arith.constant 0 : i32
    %c0_i32_1 = arith.constant 0 : i32
    return %c0_i32, %c0_i32_0 : i32, i32
  }
  func.func @transform_3(%arg0: i32) -> (i32, i32) {
    %c0_i32 = arith.constant 0 : i32
    %c0_i32_0 = arith.constant 0 : i32
    return %arg0, %c0_i32 : i32, i32
  }
}

module attributes {stable_mosaic.version = 11 : i64} {
  func.func @_pair_fused_kernel(%arg0: i32, %arg1: i32, %arg2: i32, %arg3: memref<1x8x32xbf16, #tpu.memory_space<vmem>>, %arg4: memref<1x8x32xbf16, #tpu.memory_space<vmem>>, %arg5: memref<1x8x32xbf16, #tpu.memory_space<vmem>>, %arg6: memref<1x8x32xbf16, #tpu.memory_space<vmem>>, %arg7: memref<32x128xbf16, #tpu.memory_space<vmem>>, %arg8: memref<1x128xf32, #tpu.memory_space<vmem>>, %arg9: memref<1x1x64xf32, #tpu.memory_space<vmem>>, %arg10: memref<1x1x64xf32, #tpu.memory_space<vmem>>, %arg11: memref<1x8x8x32xbf16, #tpu.memory_space<vmem>>, %arg12: memref<1x8x8x64xbf16, #tpu.memory_space<vmem>>, %arg13: memref<1x8x8x64xbf16, #tpu.memory_space<vmem>>, %arg14: memref<1x8x8x64xbf16, #tpu.memory_space<vmem>>, %arg15: memref<1x8x8xf32, #tpu.memory_space<vmem>>, %arg16: memref<1x8x8xf32, #tpu.memory_space<vmem>>) attributes {dimension_semantics = [#tpu.dimension_semantics<parallel>, #tpu.dimension_semantics<parallel>, #tpu.dimension_semantics<parallel>], iteration_bounds = array<i64: 2, 1, 1>, scalar_prefetch = 0 : i64, scratch_operands = 0 : i64, tpu.core_type = #tpu.core_type<tc>, window_params = [{transform_indices = @transform_0, window_bounds = array<i64: 1, 8, 32>}, {transform_indices = @transform_1, window_bounds = array<i64: 1, 8, 32>}, {transform_indices = @transform_2, window_bounds = array<i64: 1, 8, 32>}, {transform_indices = @transform_3, window_bounds = array<i64: 1, 8, 32>}, {pipeline_mode = #tpu.pipeline_mode<synchronous>, transform_indices = @transform_4, window_bounds = array<i64: 32, 128>}, {pipeline_mode = #tpu.pipeline_mode<synchronous>, transform_indices = @transform_5, window_bounds = array<i64: 1, 128>}, {pipeline_mode = #tpu.pipeline_mode<synchronous>, transform_indices = @transform_6, window_bounds = array<i64: 1, 1, 64>}, {transform_indices = @transform_7, window_bounds = array<i64: 1, 1, 64>}, {transform_indices = @transform_8, window_bounds = array<i64: 1, 8, 8, 32>}, {transform_indices = @transform_9, window_bounds = array<i64: 1, 8, 8, 64>}, {transform_indices = @transform_10, window_bounds = array<i64: 1, 8, 8, 64>}, {transform_indices = @transform_11, window_bounds = array<i64: 1, 8, 8, 64>}, {transform_indices = @transform_12, window_bounds = array<i64: 1, 8, 8>}, {transform_indices = @transform_13, window_bounds = array<i64: 1, 8, 8>}]} {
    %c0 = arith.constant 0 : index
    %c0_0 = arith.constant 0 : index
    %c0_1 = arith.constant 0 : index
    %0 = vector.load %arg3[%c0, %c0_0, %c0_1] : memref<1x8x32xbf16, #tpu.memory_space<vmem>>, vector<1x8x32xbf16>
    %1 = vector.shape_cast %0 : vector<1x8x32xbf16> to vector<8x32xbf16>
    %2 = arith.extf %1 : vector<8x32xbf16> to vector<8x32xf32>
    %c0_2 = arith.constant 0 : index
    %c0_3 = arith.constant 0 : index
    %c0_4 = arith.constant 0 : index
    %3 = vector.load %arg4[%c0_2, %c0_3, %c0_4] : memref<1x8x32xbf16, #tpu.memory_space<vmem>>, vector<1x8x32xbf16>
    %4 = vector.shape_cast %3 : vector<1x8x32xbf16> to vector<8x32xbf16>
    %5 = arith.extf %4 : vector<8x32xbf16> to vector<8x32xf32>
    %6 = vector.shape_cast %2 : vector<8x32xf32> to vector<8x1x32xf32>
    %7 = vector.shape_cast %5 : vector<8x32xf32> to vector<1x8x32xf32>
    %8 = vector.broadcast %6 : vector<8x1x32xf32> to vector<8x8x32xf32>
    %9 = vector.broadcast %7 : vector<1x8x32xf32> to vector<8x8x32xf32>
    %10 = arith.addf %8, %9 : vector<8x8x32xf32>
    %11 = arith.truncf %10 : vector<8x8x32xf32> to vector<8x8x32xbf16>
    %c0_5 = arith.constant 0 : index
    %c0_6 = arith.constant 0 : index
    %c0_7 = arith.constant 0 : index
    %c0_8 = arith.constant 0 : index
    %12 = vector.load %arg11[%c0_5, %c0_6, %c0_7, %c0_8] : memref<1x8x8x32xbf16, #tpu.memory_space<vmem>>, vector<1x8x8x32xbf16>
    %13 = vector.shape_cast %12 : vector<1x8x8x32xbf16> to vector<8x8x32xbf16>
    %14 = vector.shape_cast %11 : vector<8x8x32xbf16> to vector<1x8x8x32xbf16>
    tpu.vector_store %arg11[%c0_5, %c0_6, %c0_7, %c0_8], %14 {strides = array<i32>} : memref<1x8x8x32xbf16, #tpu.memory_space<vmem>>, vector<1x8x8x32xbf16>,
    %c0_9 = arith.constant 0 : index
    %c0_10 = arith.constant 0 : index
    %c0_11 = arith.constant 0 : index
    %15 = vector.load %arg3[%c0_9, %c0_10, %c0_11] : memref<1x8x32xbf16, #tpu.memory_space<vmem>>, vector<1x8x32xbf16>
    %16 = vector.shape_cast %15 : vector<1x8x32xbf16> to vector<8x32xbf16>
    %c0_12 = arith.constant 0 : index
    %c0_13 = arith.constant 0 : index
    %c0_14 = arith.constant 0 : index
    %17 = vector.load %arg4[%c0_12, %c0_13, %c0_14] : memref<1x8x32xbf16, #tpu.memory_space<vmem>>, vector<1x8x32xbf16>
    %18 = vector.shape_cast %17 : vector<1x8x32xbf16> to vector<8x32xbf16>
    %c0_15 = arith.constant 0 : index
    %c0_16 = arith.constant 0 : index
    %c0_17 = arith.constant 0 : index
    %19 = vector.load %arg5[%c0_15, %c0_16, %c0_17] : memref<1x8x32xbf16, #tpu.memory_space<vmem>>, vector<1x8x32xbf16>
    %20 = vector.shape_cast %19 : vector<1x8x32xbf16> to vector<8x32xbf16>
    %c0_18 = arith.constant 0 : index
    %c0_19 = arith.constant 0 : index
    %c0_20 = arith.constant 0 : index
    %21 = vector.load %arg6[%c0_18, %c0_19, %c0_20] : memref<1x8x32xbf16, #tpu.memory_space<vmem>>, vector<1x8x32xbf16>
    %22 = vector.shape_cast %21 : vector<1x8x32xbf16> to vector<8x32xbf16>
    %23 = tpu.concatenate %16, %18, %20, %22 in 0 : vector<8x32xbf16>, vector<8x32xbf16>, vector<8x32xbf16>, vector<8x32xbf16> -> vector<32x32xbf16>
    %c0_21 = arith.constant 0 : index
    %c0_22 = arith.constant 0 : index
    %24 = vector.load %arg7[%c0_21, %c0_22] : memref<32x128xbf16, #tpu.memory_space<vmem>>, vector<32x128xbf16>
    %cst = arith.constant dense<0.000000e+00> : vector<32x128xf32>
    %25 = tpu.matmul %23, %24, %cst {dimension_numbers = #tpu.dot_dimension_numbers<[1], [0], [0], [1], [0, 0, 1, 1], [], []>} : vector<32x32xbf16>, vector<32x128xbf16>, vector<32x128xf32> -> vector<32x128xf32>
    %c0_23 = arith.constant 0 : index
    %c0_24 = arith.constant 0 : index
    %26 = vector.load %arg8[%c0_23, %c0_24] : memref<1x128xf32, #tpu.memory_space<vmem>>, vector<1x128xf32>
    %27 = vector.extract_strided_slice %25 {offsets = [0, 0], sizes = [8, 128], strides = [1, 1]} : vector<32x128xf32> to vector<8x128xf32>
    %28 = vector.extract_strided_slice %25 {offsets = [8, 0], sizes = [8, 128], strides = [1, 1]} : vector<32x128xf32> to vector<8x128xf32>
    %29 = vector.extract_strided_slice %25 {offsets = [16, 0], sizes = [8, 64], strides = [1, 1]} : vector<32x128xf32> to vector<8x64xf32>
    %30 = vector.extract_strided_slice %25 {offsets = [24, 0], sizes = [8, 64], strides = [1, 1]} : vector<32x128xf32> to vector<8x64xf32>
    %31 = vector.shape_cast %29 : vector<8x64xf32> to vector<8x1x64xf32>
    %32 = vector.shape_cast %30 : vector<8x64xf32> to vector<1x8x64xf32>
    %33 = vector.broadcast %31 : vector<8x1x64xf32> to vector<8x8x64xf32>
    %34 = vector.broadcast %32 : vector<1x8x64xf32> to vector<8x8x64xf32>
    %35 = arith.addf %33, %34 : vector<8x8x64xf32>
    %cst_25 = arith.constant 5.000000e-01 : f32
    %36 = vector.broadcast %cst_25 : f32 to vector<8x8x64xf32>
    %37 = arith.mulf %36, %35 : vector<8x8x64xf32>
    %38 = vector.extract_strided_slice %26 {offsets = [0, 0], sizes = [1, 64], strides = [1, 1]} : vector<1x128xf32> to vector<1x64xf32>
    %39 = vector.shape_cast %38 : vector<1x64xf32> to vector<1x1x64xf32>
    %40 = vector.broadcast %39 : vector<1x1x64xf32> to vector<8x8x64xf32>
    %41 = arith.addf %37, %40 : vector<8x8x64xf32>
    %42 = arith.truncf %41 : vector<8x8x64xf32> to vector<8x8x64xbf16>
    %c0_26 = arith.constant 0 : index
    %c0_27 = arith.constant 0 : index
    %c0_28 = arith.constant 0 : index
    %c0_29 = arith.constant 0 : index
    %43 = vector.load %arg12[%c0_26, %c0_27, %c0_28, %c0_29] : memref<1x8x8x64xbf16, #tpu.memory_space<vmem>>, vector<1x8x8x64xbf16>
    %44 = vector.shape_cast %43 : vector<1x8x8x64xbf16> to vector<8x8x64xbf16>
    %45 = vector.shape_cast %42 : vector<8x8x64xbf16> to vector<1x8x8x64xbf16>
    tpu.vector_store %arg12[%c0_26, %c0_27, %c0_28, %c0_29], %45 {strides = array<i32>} : memref<1x8x8x64xbf16, #tpu.memory_space<vmem>>, vector<1x8x8x64xbf16>,
    %46 = vector.extract_strided_slice %27 {offsets = [0, 64], sizes = [8, 64], strides = [1, 1]} : vector<8x128xf32> to vector<8x64xf32>
    %47 = vector.shape_cast %46 : vector<8x64xf32> to vector<8x1x64xf32>
    %48 = vector.extract_strided_slice %28 {offsets = [0, 64], sizes = [8, 64], strides = [1, 1]} : vector<8x128xf32> to vector<8x64xf32>
    %49 = vector.shape_cast %48 : vector<8x64xf32> to vector<1x8x64xf32>
    %50 = vector.broadcast %47 : vector<8x1x64xf32> to vector<8x8x64xf32>
    %51 = vector.broadcast %49 : vector<1x8x64xf32> to vector<8x8x64xf32>
    %52 = arith.addf %50, %51 : vector<8x8x64xf32>
    %53 = vector.extract_strided_slice %26 {offsets = [0, 64], sizes = [1, 64], strides = [1, 1]} : vector<1x128xf32> to vector<1x64xf32>
    %54 = vector.shape_cast %53 : vector<1x64xf32> to vector<1x1x64xf32>
    %55 = vector.broadcast %54 : vector<1x1x64xf32> to vector<8x8x64xf32>
    %56 = arith.addf %52, %55 : vector<8x8x64xf32>
    %57 = arith.truncf %56 : vector<8x8x64xf32> to vector<8x8x64xbf16>
    %c0_30 = arith.constant 0 : index
    %c0_31 = arith.constant 0 : index
    %c0_32 = arith.constant 0 : index
    %c0_33 = arith.constant 0 : index
    %58 = vector.load %arg13[%c0_30, %c0_31, %c0_32, %c0_33] : memref<1x8x8x64xbf16, #tpu.memory_space<vmem>>, vector<1x8x8x64xbf16>
    %59 = vector.shape_cast %58 : vector<1x8x8x64xbf16> to vector<8x8x64xbf16>
    %60 = vector.shape_cast %57 : vector<8x8x64xbf16> to vector<1x8x8x64xbf16>
    tpu.vector_store %arg13[%c0_30, %c0_31, %c0_32, %c0_33], %60 {strides = array<i32>} : memref<1x8x8x64xbf16, #tpu.memory_space<vmem>>, vector<1x8x8x64xbf16>,
    %cst_34 = arith.constant dense<0xFF800000> : vector<8x8xf32>
    %61 = vector.multi_reduction <maximumf>, %56, %cst_34 [2] : vector<8x8x64xf32> to vector<8x8xf32>
    %62 = vector.shape_cast %61 : vector<8x8xf32> to vector<8x8x1xf32>
    %63 = vector.broadcast %62 : vector<8x8x1xf32> to vector<8x8x64xf32>
    %64 = arith.subf %56, %63 : vector<8x8x64xf32>
    %65 = math.exp %64 : vector<8x8x64xf32>
    %cst_35 = arith.constant dense<0.000000e+00> : vector<8x8xf32>
    %66 = vector.multi_reduction <add>, %65, %cst_35 [2] : vector<8x8x64xf32> to vector<8x8xf32>
    %67 = vector.shape_cast %66 : vector<8x8xf32> to vector<8x8x1xf32>
    %68 = vector.broadcast %67 : vector<8x8x1xf32> to vector<8x8x64xf32>
    %69 = arith.divf %65, %68 : vector<8x8x64xf32>
    %70 = arith.truncf %69 : vector<8x8x64xf32> to vector<8x8x64xbf16>
    %c0_36 = arith.constant 0 : index
    %c0_37 = arith.constant 0 : index
    %c0_38 = arith.constant 0 : index
    %c0_39 = arith.constant 0 : index
    %71 = vector.load %arg14[%c0_36, %c0_37, %c0_38, %c0_39] : memref<1x8x8x64xbf16, #tpu.memory_space<vmem>>, vector<1x8x8x64xbf16>
    %72 = vector.shape_cast %71 : vector<1x8x8x64xbf16> to vector<8x8x64xbf16>
    %73 = vector.shape_cast %70 : vector<8x8x64xbf16> to vector<1x8x8x64xbf16>
    tpu.vector_store %arg14[%c0_36, %c0_37, %c0_38, %c0_39], %73 {strides = array<i32>} : memref<1x8x8x64xbf16, #tpu.memory_space<vmem>>, vector<1x8x8x64xbf16>,
    %c0_40 = arith.constant 0 : index
    %c0_41 = arith.constant 0 : index
    %c0_42 = arith.constant 0 : index
    %74 = vector.load %arg9[%c0_40, %c0_41, %c0_42] : memref<1x1x64xf32, #tpu.memory_space<vmem>>, vector<1x1x64xf32>
    %75 = vector.broadcast %74 : vector<1x1x64xf32> to vector<8x8x64xf32>
    %76 = arith.mulf %69, %75 : vector<8x8x64xf32>
    %cst_43 = arith.constant dense<0.000000e+00> : vector<8x8xf32>
    %77 = vector.multi_reduction <add>, %76, %cst_43 [2] : vector<8x8x64xf32> to vector<8x8xf32>
    %c0_44 = arith.constant 0 : index
    %c0_45 = arith.constant 0 : index
    %c0_46 = arith.constant 0 : index
    %78 = vector.load %arg15[%c0_44, %c0_45, %c0_46] : memref<1x8x8xf32, #tpu.memory_space<vmem>>, vector<1x8x8xf32>
    %79 = vector.shape_cast %78 : vector<1x8x8xf32> to vector<8x8xf32>
    %80 = vector.shape_cast %77 : vector<8x8xf32> to vector<1x8x8xf32>
    tpu.vector_store %arg15[%c0_44, %c0_45, %c0_46], %80 {strides = array<i32>} : memref<1x8x8xf32, #tpu.memory_space<vmem>>, vector<1x8x8xf32>,
    %c0_47 = arith.constant 0 : index
    %c0_48 = arith.constant 0 : index
    %c0_49 = arith.constant 0 : index
    %81 = vector.load %arg10[%c0_47, %c0_48, %c0_49] : memref<1x1x64xf32, #tpu.memory_space<vmem>>, vector<1x1x64xf32>
    %82 = vector.broadcast %81 : vector<1x1x64xf32> to vector<8x8x64xf32>
    %83 = arith.mulf %69, %82 : vector<8x8x64xf32>
    %cst_50 = arith.constant dense<0.000000e+00> : vector<8x8xf32>
    %84 = vector.multi_reduction <add>, %83, %cst_50 [2] : vector<8x8x64xf32> to vector<8x8xf32>
    %c0_51 = arith.constant 0 : index
    %c0_52 = arith.constant 0 : index
    %c0_53 = arith.constant 0 : index
    %85 = vector.load %arg16[%c0_51, %c0_52, %c0_53] : memref<1x8x8xf32, #tpu.memory_space<vmem>>, vector<1x8x8xf32>
    %86 = vector.shape_cast %85 : vector<1x8x8xf32> to vector<8x8xf32>
    %87 = vector.shape_cast %84 : vector<8x8xf32> to vector<1x8x8xf32>
    tpu.vector_store %arg16[%c0_51, %c0_52, %c0_53], %87 {strides = array<i32>} : memref<1x8x8xf32, #tpu.memory_space<vmem>>, vector<1x8x8xf32>,
    return
  }
  func.func @transform_0(%arg0: i32, %arg1: i32, %arg2: i32) -> (i32, i32, i32) {
    %c0_i32 = arith.constant 0 : i32
    %c0_i32_0 = arith.constant 0 : i32
    return %arg0, %arg1, %c0_i32 : i32, i32, i32
  }
  func.func @transform_1(%arg0: i32, %arg1: i32, %arg2: i32) -> (i32, i32, i32) {
    %c0_i32 = arith.constant 0 : i32
    %c0_i32_0 = arith.constant 0 : i32
    return %arg0, %arg2, %c0_i32 : i32, i32, i32
  }
  func.func @transform_2(%arg0: i32, %arg1: i32, %arg2: i32) -> (i32, i32, i32) {
    %c0_i32 = arith.constant 0 : i32
    %c0_i32_0 = arith.constant 0 : i32
    return %arg0, %arg1, %c0_i32 : i32, i32, i32
  }
  func.func @transform_3(%arg0: i32, %arg1: i32, %arg2: i32) -> (i32, i32, i32) {
    %c0_i32 = arith.constant 0 : i32
    %c0_i32_0 = arith.constant 0 : i32
    return %arg0, %arg2, %c0_i32 : i32, i32, i32
  }
  func.func @transform_4(%arg0: i32, %arg1: i32, %arg2: i32) -> (i32, i32) {
    %c0_i32 = arith.constant 0 : i32
    %c0_i32_0 = arith.constant 0 : i32
    %c0_i32_1 = arith.constant 0 : i32
    return %c0_i32, %c0_i32_0 : i32, i32
  }
  func.func @transform_5(%arg0: i32, %arg1: i32, %arg2: i32) -> (i32, i32) {
    %c0_i32 = arith.constant 0 : i32
    %c0_i32_0 = arith.constant 0 : i32
    %c0_i32_1 = arith.constant 0 : i32
    return %c0_i32, %c0_i32_0 : i32, i32
  }
  func.func @transform_6(%arg0: i32, %arg1: i32, %arg2: i32) -> (i32, i32, i32) {
    %c0_i32 = arith.constant 0 : i32
    %c0_i32_0 = arith.constant 0 : i32
    %c0_i32_1 = arith.constant 0 : i32
    %c0_i32_2 = arith.constant 0 : i32
    return %c0_i32, %c0_i32_0, %c0_i32_1 : i32, i32, i32
  }
  func.func @transform_7(%arg0: i32, %arg1: i32, %arg2: i32) -> (i32, i32, i32) {
    %c0_i32 = arith.constant 0 : i32
    %c0_i32_0 = arith.constant 0 : i32
    %c0_i32_1 = arith.constant 0 : i32
    return %arg0, %c0_i32, %c0_i32_0 : i32, i32, i32
  }
  func.func @transform_8(%arg0: i32, %arg1: i32, %arg2: i32) -> (i32, i32, i32, i32) {
    %c0_i32 = arith.constant 0 : i32
    %c0_i32_0 = arith.constant 0 : i32
    return %arg0, %arg1, %arg2, %c0_i32 : i32, i32, i32, i32
  }
  func.func @transform_9(%arg0: i32, %arg1: i32, %arg2: i32) -> (i32, i32, i32, i32) {
    %c0_i32 = arith.constant 0 : i32
    %c0_i32_0 = arith.constant 0 : i32
    return %arg0, %arg1, %arg2, %c0_i32 : i32, i32, i32, i32
  }
  func.func @transform_10(%arg0: i32, %arg1: i32, %arg2: i32) -> (i32, i32, i32, i32) {
    %c0_i32 = arith.constant 0 : i32
    %c0_i32_0 = arith.constant 0 : i32
    return %arg0, %arg1, %arg2, %c0_i32 : i32, i32, i32, i32
  }
  func.func @transform_11(%arg0: i32, %arg1: i32, %arg2: i32) -> (i32, i32, i32, i32) {
    %c0_i32 = arith.constant 0 : i32
    %c0_i32_0 = arith.constant 0 : i32
    return %arg0, %arg1, %arg2, %c0_i32 : i32, i32, i32, i32
  }
  func.func @transform_12(%arg0: i32, %arg1: i32, %arg2: i32) -> (i32, i32, i32) {
    %c0_i32 = arith.constant 0 : i32
    return %arg0, %arg1, %arg2 : i32, i32, i32
  }
  func.func @transform_13(%arg0: i32, %arg1: i32, %arg2: i32) -> (i32, i32, i32) {
    %c0_i32 = arith.constant 0 : i32
    return %arg0, %arg1, %arg2 : i32, i32, i32
  }
}

module attributes {stable_mosaic.version = 11 : i64} {
  func.func @_lddt_head_kernel(%arg0: i32, %arg1: memref<16x32xbf16, #tpu.memory_space<vmem>>, %arg2: memref<1x32xf32, #tpu.memory_space<vmem>>, %arg3: memref<1x32xf32, #tpu.memory_space<vmem>>, %arg4: memref<32x32xbf16, #tpu.memory_space<vmem>>, %arg5: memref<1x32xf32, #tpu.memory_space<vmem>>, %arg6: memref<32x32xbf16, #tpu.memory_space<vmem>>, %arg7: memref<1x32xf32, #tpu.memory_space<vmem>>, %arg8: memref<32x1920xbf16, #tpu.memory_space<vmem>>, %arg9: memref<1x1920xf32, #tpu.memory_space<vmem>>, %arg10: memref<1920x256xbf16, #tpu.memory_space<vmem>>, %arg11: memref<16x1920xbf16, #tpu.memory_space<vmem>>, %arg12: memref<16x128xf32, #tpu.memory_space<vmem>>) attributes {dimension_semantics = [#tpu.dimension_semantics<parallel>], iteration_bounds = array<i64: 2>, scalar_prefetch = 0 : i64, scratch_operands = 0 : i64, tpu.core_type = #tpu.core_type<tc>, window_params = [{transform_indices = @transform_0, window_bounds = array<i64: 16, 32>}, {pipeline_mode = #tpu.pipeline_mode<synchronous>, transform_indices = @transform_1, window_bounds = array<i64: 1, 32>}, {pipeline_mode = #tpu.pipeline_mode<synchronous>, transform_indices = @transform_2, window_bounds = array<i64: 1, 32>}, {pipeline_mode = #tpu.pipeline_mode<synchronous>, transform_indices = @transform_3, window_bounds = array<i64: 32, 32>}, {pipeline_mode = #tpu.pipeline_mode<synchronous>, transform_indices = @transform_4, window_bounds = array<i64: 1, 32>}, {pipeline_mode = #tpu.pipeline_mode<synchronous>, transform_indices = @transform_5, window_bounds = array<i64: 32, 32>}, {pipeline_mode = #tpu.pipeline_mode<synchronous>, transform_indices = @transform_6, window_bounds = array<i64: 1, 32>}, {pipeline_mode = #tpu.pipeline_mode<synchronous>, transform_indices = @transform_7, window_bounds = array<i64: 32, 1920>}, {pipeline_mode = #tpu.pipeline_mode<synchronous>, transform_indices = @transform_8, window_bounds = array<i64: 1, 1920>}, {pipeline_mode = #tpu.pipeline_mode<synchronous>, transform_indices = @transform_9, window_bounds = array<i64: 1920, 256>}, {transform_indices = @transform_10, window_bounds = array<i64: 16, 1920>}, {transform_indices = @transform_11, window_bounds = array<i64: 16, 128>}]} {
    %c0 = arith.constant 0 : index
    %c0_0 = arith.constant 0 : index
    %0 = vector.load %arg1[%c0, %c0_0] : memref<16x32xbf16, #tpu.memory_space<vmem>>, vector<16x32xbf16>
    %1 = arith.extf %0 : vector<16x32xbf16> to vector<16x32xf32>
    %cst = arith.constant dense<0.000000e+00> : vector<16xf32>
    %2 = vector.multi_reduction <add>, %1, %cst [1] : vector<16x32xf32> to vector<16xf32>
    %3 = vector.shape_cast %2 : vector<16xf32> to vector<16x1xf32>
    %cst_1 = arith.constant 3.200000e+01 : f32
    %4 = vector.broadcast %cst_1 : f32 to vector<16x1xf32>
    %5 = arith.divf %3, %4 : vector<16x1xf32>
    %6 = vector.broadcast %5 : vector<16x1xf32> to vector<16x32xf32>
    %7 = arith.subf %1, %6 : vector<16x32xf32>
    %8 = arith.mulf %7, %7 : vector<16x32xf32>
    %cst_2 = arith.constant dense<0.000000e+00> : vector<16xf32>
    %9 = vector.multi_reduction <add>, %8, %cst_2 [1] : vector<16x32xf32> to vector<16xf32>
    %10 = vector.shape_cast %9 : vector<16xf32> to vector<16x1xf32>
    %cst_3 = arith.constant 3.200000e+01 : f32
    %11 = vector.broadcast %cst_3 : f32 to vector<16x1xf32>
    %12 = arith.divf %10, %11 : vector<16x1xf32>
    %13 = vector.broadcast %5 : vector<16x1xf32> to vector<16x32xf32>
    %14 = arith.subf %1, %13 : vector<16x32xf32>
    %cst_4 = arith.constant 9.99999974E-6 : f32
    %15 = vector.broadcast %cst_4 : f32 to vector<16x1xf32>
    %16 = arith.addf %12, %15 : vector<16x1xf32>
    %17 = math.rsqrt %16 : vector<16x1xf32>
    %18 = vector.broadcast %17 : vector<16x1xf32> to vector<16x32xf32>
    %19 = arith.mulf %14, %18 : vector<16x32xf32>
    %c0_5 = arith.constant 0 : index
    %c0_6 = arith.constant 0 : index
    %20 = vector.load %arg2[%c0_5, %c0_6] : memref<1x32xf32, #tpu.memory_space<vmem>>, vector<1x32xf32>
    %21 = vector.broadcast %20 : vector<1x32xf32> to vector<16x32xf32>
    %22 = arith.mulf %19, %21 : vector<16x32xf32>
    %c0_7 = arith.constant 0 : index
    %c0_8 = arith.constant 0 : index
    %23 = vector.load %arg3[%c0_7, %c0_8] : memref<1x32xf32, #tpu.memory_space<vmem>>, vector<1x32xf32>
    %24 = vector.broadcast %23 : vector<1x32xf32> to vector<16x32xf32>
    %25 = arith.addf %22, %24 : vector<16x32xf32>
    %26 = arith.truncf %25 : vector<16x32xf32> to vector<16x32xbf16>
    %c0_9 = arith.constant 0 : index
    %c0_10 = arith.constant 0 : index
    %27 = vector.load %arg4[%c0_9, %c0_10] : memref<32x32xbf16, #tpu.memory_space<vmem>>, vector<32x32xbf16>
    %cst_11 = arith.constant dense<0.000000e+00> : vector<16x32xf32>
    %28 = tpu.matmul %26, %27, %cst_11 {dimension_numbers = #tpu.dot_dimension_numbers<[1], [0], [0], [1], [0, 0, 1, 1], [], []>} : vector<16x32xbf16>, vector<32x32xbf16>, vector<16x32xf32> -> vector<16x32xf32>
    %c0_12 = arith.constant 0 : index
    %c0_13 = arith.constant 0 : index
    %29 = vector.load %arg5[%c0_12, %c0_13] : memref<1x32xf32, #tpu.memory_space<vmem>>, vector<1x32xf32>
    %30 = vector.broadcast %29 : vector<1x32xf32> to vector<16x32xf32>
    %31 = arith.addf %28, %30 : vector<16x32xf32>
    %32 = arith.truncf %31 : vector<16x32xf32> to vector<16x32xbf16>
    %c0_14 = arith.constant 0 : index
    %c0_15 = arith.constant 0 : index
    %33 = vector.load %arg6[%c0_14, %c0_15] : memref<32x32xbf16, #tpu.memory_space<vmem>>, vector<32x32xbf16>
    %cst_16 = arith.constant dense<0.000000e+00> : vector<16x32xf32>
    %34 = tpu.matmul %32, %33, %cst_16 {dimension_numbers = #tpu.dot_dimension_numbers<[1], [0], [0], [1], [0, 0, 1, 1], [], []>} : vector<16x32xbf16>, vector<32x32xbf16>, vector<16x32xf32> -> vector<16x32xf32>
    %c0_17 = arith.constant 0 : index
    %c0_18 = arith.constant 0 : index
    %35 = vector.load %arg7[%c0_17, %c0_18] : memref<1x32xf32, #tpu.memory_space<vmem>>, vector<1x32xf32>
    %36 = vector.broadcast %35 : vector<1x32xf32> to vector<16x32xf32>
    %37 = arith.addf %34, %36 : vector<16x32xf32>
    %38 = arith.truncf %37 : vector<16x32xf32> to vector<16x32xbf16>
    %c0_19 = arith.constant 0 : index
    %c0_20 = arith.constant 0 : index
    %39 = vector.load %arg8[%c0_19, %c0_20] : memref<32x1920xbf16, #tpu.memory_space<vmem>>, vector<32x1920xbf16>
    %cst_21 = arith.constant dense<0.000000e+00> : vector<16x1920xf32>
    %40 = tpu.matmul %38, %39, %cst_21 {dimension_numbers = #tpu.dot_dimension_numbers<[1], [0], [0], [1], [0, 0, 1, 1], [], []>} : vector<16x32xbf16>, vector<32x1920xbf16>, vector<16x1920xf32> -> vector<16x1920xf32>
    %c0_22 = arith.constant 0 : index
    %c0_23 = arith.constant 0 : index
    %41 = vector.load %arg9[%c0_22, %c0_23] : memref<1x1920xf32, #tpu.memory_space<vmem>>, vector<1x1920xf32>
    %42 = vector.broadcast %41 : vector<1x1920xf32> to vector<16x1920xf32>
    %43 = arith.addf %40, %42 : vector<16x1920xf32>
    %44 = arith.truncf %43 : vector<16x1920xf32> to vector<16x1920xbf16>
    %c0_24 = arith.constant 0 : index
    %c0_25 = arith.constant 0 : index
    %45 = vector.load %arg11[%c0_24, %c0_25] : memref<16x1920xbf16, #tpu.memory_space<vmem>>, vector<16x1920xbf16>
    tpu.vector_store %arg11[%c0_24, %c0_25], %44 {strides = array<i32>} : memref<16x1920xbf16, #tpu.memory_space<vmem>>, vector<16x1920xbf16>,
    %cst_26 = arith.constant dense<0xFF800000> : vector<16xf32>
    %46 = vector.multi_reduction <maximumf>, %43, %cst_26 [1] : vector<16x1920xf32> to vector<16xf32>
    %47 = vector.shape_cast %46 : vector<16xf32> to vector<16x1xf32>
    %48 = vector.broadcast %47 : vector<16x1xf32> to vector<16x1920xf32>
    %49 = arith.subf %43, %48 : vector<16x1920xf32>
    %50 = math.exp %49 : vector<16x1920xf32>
    %51 = arith.truncf %50 : vector<16x1920xf32> to vector<16x1920xbf16>
    %c0_27 = arith.constant 0 : index
    %c0_28 = arith.constant 0 : index
    %52 = vector.load %arg10[%c0_27, %c0_28] : memref<1920x256xbf16, #tpu.memory_space<vmem>>, vector<1920x256xbf16>
    %cst_29 = arith.constant dense<0.000000e+00> : vector<16x256xf32>
    %53 = tpu.matmul %51, %52, %cst_29 {dimension_numbers = #tpu.dot_dimension_numbers<[1], [0], [0], [1], [0, 0, 1, 1], [], []>} : vector<16x1920xbf16>, vector<1920x256xbf16>, vector<16x256xf32> -> vector<16x256xf32>
    %54 = vector.extract_strided_slice %53 {offsets = [0, 0], sizes = [16, 128], strides = [1, 1]} : vector<16x256xf32> to vector<16x128xf32>
    %55 = vector.extract_strided_slice %53 {offsets = [0, 128], sizes = [16, 128], strides = [1, 1]} : vector<16x256xf32> to vector<16x128xf32>
    %cst_30 = arith.constant 9.99999993E-9 : f32
    %56 = vector.broadcast %cst_30 : f32 to vector<16x128xf32>
    %57 = arith.addf %54, %56 : vector<16x128xf32>
    %58 = arith.divf %55, %57 : vector<16x128xf32>
    %c0_31 = arith.constant 0 : index
    %c0_32 = arith.constant 0 : index
    %59 = vector.load %arg12[%c0_31, %c0_32] : memref<16x128xf32, #tpu.memory_space<vmem>>, vector<16x128xf32>
    tpu.vector_store %arg12[%c0_31, %c0_32], %58 {strides = array<i32>} : memref<16x128xf32, #tpu.memory_space<vmem>>, vector<16x128xf32>,
    return
  }
  func.func @transform_0(%arg0: i32) -> (i32, i32) {
    %c0_i32 = arith.constant 0 : i32
    %c0_i32_0 = arith.constant 0 : i32
    return %arg0, %c0_i32 : i32, i32
  }
  func.func @transform_1(%arg0: i32) -> (i32, i32) {
    %c0_i32 = arith.constant 0 : i32
    %c0_i32_0 = arith.constant 0 : i32
    %c0_i32_1 = arith.constant 0 : i32
    return %c0_i32, %c0_i32_0 : i32, i32
  }
  func.func @transform_2(%arg0: i32) -> (i32, i32) {
    %c0_i32 = arith.constant 0 : i32
    %c0_i32_0 = arith.constant 0 : i32
    %c0_i32_1 = arith.constant 0 : i32
    return %c0_i32, %c0_i32_0 : i32, i32
  }
  func.func @transform_3(%arg0: i32) -> (i32, i32) {
    %c0_i32 = arith.constant 0 : i32
    %c0_i32_0 = arith.constant 0 : i32
    %c0_i32_1 = arith.constant 0 : i32
    return %c0_i32, %c0_i32_0 : i32, i32
  }
  func.func @transform_4(%arg0: i32) -> (i32, i32) {
    %c0_i32 = arith.constant 0 : i32
    %c0_i32_0 = arith.constant 0 : i32
    %c0_i32_1 = arith.constant 0 : i32
    return %c0_i32, %c0_i32_0 : i32, i32
  }
  func.func @transform_5(%arg0: i32) -> (i32, i32) {
    %c0_i32 = arith.constant 0 : i32
    %c0_i32_0 = arith.constant 0 : i32
    %c0_i32_1 = arith.constant 0 : i32
    return %c0_i32, %c0_i32_0 : i32, i32
  }
  func.func @transform_6(%arg0: i32) -> (i32, i32) {
    %c0_i32 = arith.constant 0 : i32
    %c0_i32_0 = arith.constant 0 : i32
    %c0_i32_1 = arith.constant 0 : i32
    return %c0_i32, %c0_i32_0 : i32, i32
  }
  func.func @transform_7(%arg0: i32) -> (i32, i32) {
    %c0_i32 = arith.constant 0 : i32
    %c0_i32_0 = arith.constant 0 : i32
    %c0_i32_1 = arith.constant 0 : i32
    return %c0_i32, %c0_i32_0 : i32, i32
  }
  func.func @transform_8(%arg0: i32) -> (i32, i32) {
    %c0_i32 = arith.constant 0 : i32
    %c0_i32_0 = arith.constant 0 : i32
    %c0_i32_1 = arith.constant 0 : i32
    return %c0_i32, %c0_i32_0 : i32, i32
  }
  func.func @transform_9(%arg0: i32) -> (i32, i32) {
    %c0_i32 = arith.constant 0 : i32
    %c0_i32_0 = arith.constant 0 : i32
    %c0_i32_1 = arith.constant 0 : i32
    return %c0_i32, %c0_i32_0 : i32, i32
  }
  func.func @transform_10(%arg0: i32) -> (i32, i32) {
    %c0_i32 = arith.constant 0 : i32
    %c0_i32_0 = arith.constant 0 : i32
    return %arg0, %c0_i32 : i32, i32
  }
  func.func @transform_11(%arg0: i32) -> (i32, i32) {
    %c0_i32 = arith.constant 0 : i32
    %c0_i32_0 = arith.constant 0 : i32
    return %arg0, %c0_i32 : i32, i32
  }
}

module attributes {stable_mosaic.version = 11 : i64} {
  func.func @kernel(%arg0: i32, %arg1: memref<16x32xbf16, #tpu.memory_space<vmem>>, %arg2: memref<32x128xbf16, #tpu.memory_space<vmem>>, %arg3: memref<1x128xf32, #tpu.memory_space<vmem>>, %arg4: memref<16x128xf32, #tpu.memory_space<vmem>>) attributes {dimension_semantics = [#tpu.dimension_semantics<parallel>], iteration_bounds = array<i64: 2>, scalar_prefetch = 0 : i64, scratch_operands = 0 : i64, tpu.core_type = #tpu.core_type<tc>, window_params = [{transform_indices = @transform_0, window_bounds = array<i64: 16, 32>}, {pipeline_mode = #tpu.pipeline_mode<synchronous>, transform_indices = @transform_1, window_bounds = array<i64: 32, 128>}, {pipeline_mode = #tpu.pipeline_mode<synchronous>, transform_indices = @transform_2, window_bounds = array<i64: 1, 128>}, {transform_indices = @transform_3, window_bounds = array<i64: 16, 128>}]} {
    %c0 = arith.constant 0 : index
    %c0_0 = arith.constant 0 : index
    %0 = vector.load %arg1[%c0, %c0_0] : memref<16x32xbf16, #tpu.memory_space<vmem>>, vector<16x32xbf16>
    %c0_1 = arith.constant 0 : index
    %c0_2 = arith.constant 0 : index
    %1 = vector.load %arg2[%c0_1, %c0_2] : memref<32x128xbf16, #tpu.memory_space<vmem>>, vector<32x128xbf16>
    %cst = arith.constant dense<0.000000e+00> : vector<16x128xf32>
    %2 = tpu.matmul %0, %1, %cst {dimension_numbers = #tpu.dot_dimension_numbers<[1], [0], [0], [1], [0, 0, 1, 1], [], []>} : vector<16x32xbf16>, vector<32x128xbf16>, vector<16x128xf32> -> vector<16x128xf32>
    %c0_3 = arith.constant 0 : index
    %c0_4 = arith.constant 0 : index
    %3 = vector.load %arg3[%c0_3, %c0_4] : memref<1x128xf32, #tpu.memory_space<vmem>>, vector<1x128xf32>
    %4 = vector.broadcast %3 : vector<1x128xf32> to vector<16x128xf32>
    %5 = arith.addf %2, %4 : vector<16x128xf32>
    %c0_5 = arith.constant 0 : index
    %c0_6 = arith.constant 0 : index
    %6 = vector.load %arg4[%c0_5, %c0_6] : memref<16x128xf32, #tpu.memory_space<vmem>>, vector<16x128xf32>
    tpu.vector_store %arg4[%c0_5, %c0_6], %5 {strides = array<i32>} : memref<16x128xf32, #tpu.memory_space<vmem>>, vector<16x128xf32>,
    return
  }
  func.func @transform_0(%arg0: i32) -> (i32, i32) {
    %c0_i32 = arith.constant 0 : i32
    %c0_i32_0 = arith.constant 0 : i32
    return %arg0, %c0_i32 : i32, i32
  }
  func.func @transform_1(%arg0: i32) -> (i32, i32) {
    %c0_i32 = arith.constant 0 : i32
    %c0_i32_0 = arith.constant 0 : i32
    %c0_i32_1 = arith.constant 0 : i32
    return %c0_i32, %c0_i32_0 : i32, i32
  }
  func.func @transform_2(%arg0: i32) -> (i32, i32) {
    %c0_i32 = arith.constant 0 : i32
    %c0_i32_0 = arith.constant 0 : i32
    %c0_i32_1 = arith.constant 0 : i32
    return %c0_i32, %c0_i32_0 : i32, i32
  }
  func.func @transform_3(%arg0: i32) -> (i32, i32) {
    %c0_i32 = arith.constant 0 : i32
    %c0_i32_0 = arith.constant 0 : i32
    return %arg0, %c0_i32 : i32, i32
  }
}

module attributes {stable_mosaic.version = 11 : i64} {
  func.func @kernel(%arg0: i32, %arg1: memref<8x32xbf16, #tpu.memory_space<vmem>>, %arg2: memref<32x128xbf16, #tpu.memory_space<vmem>>, %arg3: memref<1x128xf32, #tpu.memory_space<vmem>>, %arg4: memref<8x128xf32, #tpu.memory_space<vmem>>) attributes {dimension_semantics = [#tpu.dimension_semantics<parallel>], iteration_bounds = array<i64: 2>, scalar_prefetch = 0 : i64, scratch_operands = 0 : i64, tpu.core_type = #tpu.core_type<tc>, window_params = [{transform_indices = @transform_0, window_bounds = array<i64: 8, 32>}, {pipeline_mode = #tpu.pipeline_mode<synchronous>, transform_indices = @transform_1, window_bounds = array<i64: 32, 128>}, {pipeline_mode = #tpu.pipeline_mode<synchronous>, transform_indices = @transform_2, window_bounds = array<i64: 1, 128>}, {transform_indices = @transform_3, window_bounds = array<i64: 8, 128>}]} {
    %c0 = arith.constant 0 : index
    %c0_0 = arith.constant 0 : index
    %0 = vector.load %arg1[%c0, %c0_0] : memref<8x32xbf16, #tpu.memory_space<vmem>>, vector<8x32xbf16>
    %c0_1 = arith.constant 0 : index
    %c0_2 = arith.constant 0 : index
    %1 = vector.load %arg2[%c0_1, %c0_2] : memref<32x128xbf16, #tpu.memory_space<vmem>>, vector<32x128xbf16>
    %cst = arith.constant dense<0.000000e+00> : vector<8x128xf32>
    %2 = tpu.matmul %0, %1, %cst {dimension_numbers = #tpu.dot_dimension_numbers<[1], [0], [0], [1], [0, 0, 1, 1], [], []>} : vector<8x32xbf16>, vector<32x128xbf16>, vector<8x128xf32> -> vector<8x128xf32>
    %c0_3 = arith.constant 0 : index
    %c0_4 = arith.constant 0 : index
    %3 = vector.load %arg3[%c0_3, %c0_4] : memref<1x128xf32, #tpu.memory_space<vmem>>, vector<1x128xf32>
    %4 = vector.broadcast %3 : vector<1x128xf32> to vector<8x128xf32>
    %5 = arith.addf %2, %4 : vector<8x128xf32>
    %c0_5 = arith.constant 0 : index
    %c0_6 = arith.constant 0 : index
    %6 = vector.load %arg4[%c0_5, %c0_6] : memref<8x128xf32, #tpu.memory_space<vmem>>, vector<8x128xf32>
    tpu.vector_store %arg4[%c0_5, %c0_6], %5 {strides = array<i32>} : memref<8x128xf32, #tpu.memory_space<vmem>>, vector<8x128xf32>,
    return
  }
  func.func @transform_0(%arg0: i32) -> (i32, i32) {
    %c0_i32 = arith.constant 0 : i32
    %c0_i32_0 = arith.constant 0 : i32
    return %arg0, %c0_i32 : i32, i32
  }
  func.func @transform_1(%arg0: i32) -> (i32, i32) {
    %c0_i32 = arith.constant 0 : i32
    %c0_i32_0 = arith.constant 0 : i32
    %c0_i32_1 = arith.constant 0 : i32
    return %c0_i32, %c0_i32_0 : i32, i32
  }
  func.func @transform_2(%arg0: i32) -> (i32, i32) {
    %c0_i32 = arith.constant 0 : i32
    %c0_i32_0 = arith.constant 0 : i32
    %c0_i32_1 = arith.constant 0 : i32
    return %c0_i32, %c0_i32_0 : i32, i32
  }
  func.func @transform_3(%arg0: i32) -> (i32, i32) {
    %c0_i32 = arith.constant 0 : i32
    %c0_i32_0 = arith.constant 0 : i32
    return %arg0, %c0_i32 : i32, i32
  }
}

</mosaic_0001>

<bundles_post_ra>
// kernel: esmfold_forward.9
= control target key start
LH: loop header
LB: loop body
LE: loop exit
PB: predicated region body
PF: predicated region fallthrough
CT: control target
= control target key end

     0   :  { %s377_s12 = smov 0   ;;  %s409_s0 = inlined_call_operand.vmem [shape: bf16[16,32], index: 0, kind: input, shape index: {}]   ;;  %s410_s1 = inlined_call_operand.vmem [shape: bf16[32,256], index: 1, kind: input, shape index: {}]   ;;  %s411_s2 = inlined_call_operand.vmem [shape: f32[1,256], index: 2, kind: input, shape index: {}]   ;;  %s412_s3 = inlined_call_operand.vmem [shape: bf16[16,256], index: 3, kind: output, shape index: {}]  }
   0x1 LB: > { %s315_s13 = sadd.s32 4294967295, %s354_s12   ;;  %p319_p0 = scmp.ge.s32.totalorder %s354_s12, 1  ;;  %s354_s12 = sphi %s377_s12, %s13_s12  }
   0x2   : > { %p136_p1 = scmp.lt.s32.totalorder %s354_s12, 3 }
   0x4   : > { %p137_p2 = pnand %p319_p0, %p136_p1 }
   0x5   : > { %v342_v0 = vld [vmem:[%s410_s1 + $0x4] ss:$8 sps:$4 sm:$0xff] (!%p137_p2)   ;;  %p159_p3 = scmp.lt.s32.totalorder (!%p137_p2), %s315_s13, 1  ;;  %v344_v1 = vld [vmem:[%s410_s1] ss:$8 sps:$4 sm:$0xff] (!%p137_p2)   ;;  %v356_v2 = vmov (!%p137_p2), 0   ;;  %v176_v6 = vlaneseq (!%p137_p2) }
   0x6   : > { %140 = sbr.rel (%p137_p2) target bundleno = 235 (0xeb), region = 32  ;;  %242 = vmatprep.mubr.bf16.mxu0 (!%p137_p2), %v356_v2  ;;  %210 = vmatprep.subr.bf16.mxu0 (!%p137_p2), %v342_v0  ;;  %v345_v3 = vld [vmem:[%s410_s1 + $0x14] ss:$8 sps:$4 sm:$0xff] (!%p137_p2)   ;;  %v347_v4 = vld [vmem:[%s410_s1 + $0x10] ss:$8 sps:$4 sm:$0xff] (!%p137_p2)   ;;  %vm206_vm0 = vcmask (!%p137_p2), 261120  }
   0x7   : > { %211 = vmatpush1.bf16.msra.mxu0 (!%p137_p2), %v344_v1  ;;  %v177_v7 = vshrl.u32 (!%p137_p2), %v176_v6, 7  ;;  %v174_v9 = vld [vmem:[%s411_s2] sm:$0x3] (!%p137_p2) }
   0x8   : > { %212 = vmatprep.subr.bf16.mxu0 (!%p137_p2), %v345_v3 }
   0x9   : > { %v178_v8 = vsub.s32 (!%p137_p2), 0, %v177_v7  ;;  %v182_v10 = vsub.s32 (!%p137_p2), 1, %v177_v7 }
   0xb   : > { %213 = vmatpush1.bf16.msra.mxu0 (!%p137_p2), %v347_v4  ;;  %v179_v11 = vrot.slane (!%p137_p2), %v174_v9, %v178_v8  ;;  %v183_v12 = vrot.slane (!%p137_p2), %v174_v9, %v182_v10 }
   0xd   : > { %s414_s13 = smov (!%p159_p3, %s315_s13), 1 }
   0xe   : > { %s320_s22 = sshll.u32 %s414_s13, 2  ;;  %s331_s28 = sshll.u32 %s414_s13, 3 }
   0xf   : > { %s162_s25 = scalar_lea.vmem %s409_s0, %s320_s22  ;;  %s167_s4 = scalar_lea.vmem %s412_s3, %s331_s28 }
  0x10   : > { %v169_v5 = vld [vmem:[%s162_s25] sm:$0xf] }
  0x11   : > { %327 = vmatmul.mubr.msk.bf16.vlgmr.msra.gmra.mrb[0].mxu0 %vm206_vm0, %v169_v5 }
  0xe4   : > { %v244_v13 = vpop.f32.mrb[0].mxu0 }
  0xe5   : > { %v245_v14 = vadd.f32 %v244_v13, %v179_v11  ;;  %v246_v15 = vpop.f32.mrb[1].mxu0 }
  0xe6   : > { %v247_v16 = vadd.f32 %v246_v15, %v183_v12  ;;  %v248_v17 = vpop.f32.mrb[2].mxu0 }
  0xe7   : > { %v249_v18 = vpop.f32.mrb[3].mxu0 }
  0xe8   : > { %v332_v19 = vpack.c.bf16 %v247_v16, %v245_v14 }
  0xea   : > { %259 = vst [vmem:[%s167_s4] sm:$0xff] %v332_v19 }
  0xeb PF: > { %s13_s12 = sadd.s32 1, %s354_s12  }
  0xec   : > { %p10_p4 = scmp.ge.s32.totalorder %s13_s12, 4  }
  0xee   :  { %12 = sbr.rel (!%p10_p4) target bundleno = 1 (0x1), region = 62 }

// kernel: esmfold_forward.8
= control target key start
LH: loop header
LB: loop body
LE: loop exit
PB: predicated region body
PF: predicated region fallthrough
CT: control target
= control target key end

     0   :  { %s356_s12 = smov 0   ;;  %s382_s0 = inlined_call_operand.vmem [shape: bf16[16,32], index: 0, kind: input, shape index: {}]   ;;  %s383_s1 = inlined_call_operand.vmem [shape: bf16[32,128], index: 1, kind: input, shape index: {}]   ;;  %s384_s2 = inlined_call_operand.vmem [shape: f32[1,128], index: 2, kind: input, shape index: {}]   ;;  %s385_s3 = inlined_call_operand.vmem [shape: bf16[16,128], index: 3, kind: output, shape index: {}]  }
   0x1 LB: > { %s290_s13 = sadd.s32 4294967295, %s332_s12   ;;  %p294_p0 = scmp.ge.s32.totalorder %s332_s12, 1  ;;  %s332_s12 = sphi %s356_s12, %s13_s12  }
   0x2   : > { %p136_p1 = scmp.lt.s32.totalorder %s332_s12, 3 }
   0x4   : > { %p137_p2 = pnand %p294_p0, %p136_p1 }
   0x5   : > { %v324_v0 = vld [vmem:[%s383_s1] sm:$0xff] (!%p137_p2)   ;;  %v334_v1 = vmov (!%p137_p2), 0.0   ;;  %v325_v2 = vld [vmem:[%s383_s1 + $0x8] sm:$0xff] (!%p137_p2)   ;;  %vm335_vm0 = vmmov (!%p137_p2), 0   ;;  %p158_p3 = scmp.lt.s32.totalorder (!%p137_p2), %s290_s13, 1  ;;  %vm191_vm1 = vcmask (!%p137_p2), 261120  }
   0x6   : > { %140 = sbr.rel (%p137_p2) target bundleno = 234 (0xea), region = 32  ;;  %306 = vmatprep.subr.bf16.mxu0 (!%p137_p2), %v334_v1  ;;  %310 = vmatprep.mubr.msk.bf16.mxu0 (!%p137_p2), %vm335_vm0, %v334_v1  ;;  %v297_v4 = vld [vmem:[%s384_s2] ss:$0 sm:$0xff] (!%p137_p2) }
   0x7   : > { %307 = vmatpush3.bf16.msra.mxu0 (!%p137_p2), %v324_v0 }
   0x8   : > { %308 = vmatprep.subr.bf16.mxu0 (!%p137_p2), %v334_v1 }
   0xb   : > { %309 = vmatpush3.bf16.msra.mxu0 (!%p137_p2), %v325_v2 }
   0xd   : > { %s387_s13 = smov (!%p158_p3, %s290_s13), 1 }
   0xe   : > { %s295_s18 = sshll.u32 %s387_s13, 2 }
   0xf   : > { %s161_s21 = scalar_lea.vmem %s382_s0, %s295_s18  ;;  %s165_s26 = scalar_lea.vmem %s385_s3, %s295_s18 }
  0x10   : > { %v167_v3 = vld [vmem:[%s161_s21] sm:$0xf] }
  0x11   : > { %311 = vmatmul.mubr.msk.bf16.vlgmr.msra.gmra.mrb[0].mxu0 %vm191_vm1, %v167_v3 }
  0xe4   : > { %v229_v5 = vpop.f32.mrb[0].mxu0 }
  0xe5   : > { %v230_v6 = vadd.f32 %v297_v4, %v229_v5  ;;  %v312_v7 = vpop.f32.mrb[1].mxu0 }
  0xe6   : > { %v232_v8 = vpop.f32.mrb[2].mxu0 }
  0xe7   : > { %v235_v9 = vpack.c.bf16 %v230_v6, %v230_v6  ;;  %v313_v10 = vpop.f32.mrb[3].mxu0 }
  0xe9   : > { %236 = vst [vmem:[%s165_s26] sm:$0xf] %v235_v9 }
  0xea PF: > { %s13_s12 = sadd.s32 1, %s332_s12  }
  0xeb   : > { %p10_p4 = scmp.ge.s32.totalorder %s13_s12, 4  }
  0xed   :  { %12 = sbr.rel (!%p10_p4) target bundleno = 1 (0x1), region = 62 }

// kernel: esmfold_forward.7
= control target key start
LH: loop header
LB: loop body
LE: loop exit
PB: predicated region body
PF: predicated region fallthrough
CT: control target
= control target key end

     0   :  { %s825_s27 = smov 0   ;;  %s827_s28 = smov 0   ;;  %s911_s0 = inlined_call_operand.vmem [shape: bf16[16,64], index: 0, kind: input, shape index: {}]   ;;  %s912_s1 = inlined_call_operand.vmem [shape: f32[16,32], index: 1, kind: input, shape index: {}]   ;;  %s913_s2 = inlined_call_operand.vmem [shape: f32[1,64], index: 2, kind: input, shape index: {}]   ;;  %s914_s3 = inlined_call_operand.vmem [shape: f32[1,64], index: 3, kind: input, shape index: {}]   ;;  %s915_s4 = inlined_call_operand.vmem [shape: bf16[64,32], index: 4, kind: input, shape index: {}]   ;;  %s916_s5 = inlined_call_operand.vmem [shape: f32[1,32], index: 5, kind: input, shape index: {}, may-alias: {5,7}]   ;;  %s917_s6 = inlined_call_operand.vmem [shape: bf16[32,32], index: 6, kind: input, shape index: {}]   ;;  %s918_s7 = inlined_call_operand.vmem [shape: f32[1,32], index: 7, kind: input, shape index: {}, may-alias: {5,7}]   ;;  %s919_s8 = inlined_call_operand.vmem [shape: bf16[16,32], index: 8, kind: output, shape index: {}]  }
   0x1   :  { %s829_s29 = smov 0  }
   0x2 LB: > { %s30_s30 = sadd.s32 1, %s771_s28  ;;  %p670_p0 = scmp.ge.s32.totalorder %s775_s29, 1  ;;  %s775_s29 = sphi %s829_s29, %s18_s29   ;;  %s771_s28 = sphi %s827_s28, %s921_s28   ;;  %s767_s27 = sphi %s825_s27, %s920_s27  }
   0x3   : > { %p32_p1 = scmp.ge.s32.totalorder %s30_s30, 2  ;;  %p293_p2 = scmp.lt.s32.totalorder %s775_s29, 3 }
   0x5   : > { %s923_s30 = smov (%p32_p1, %s30_s30), 0  ;;  %p294_p3 = pnand %p670_p0, %p293_p2 }
   0x6   : > { %p334_p4 = scmp.lt.s32.totalorder (!%p294_p3), %s767_s27, 1  ;;  %vm359_vm0 = vcmask (!%p294_p3), 523264   ;;  %v777_v3 = vmov (!%p294_p3), 0   ;;  %vm371_vm1 = vcmask (!%p294_p3), 7168   ;;  %v745_v10 = vld [vmem:[%s915_s4] sm:$0xff] (!%p294_p3)   ;;  %v778_v11 = vmov (!%p294_p3), 0.0  }
   0x7   : > { %297 = sbr.rel (%p294_p3) target bundleno = 918 (0x396), region = 52  ;;  %743 = vset.pattern.permute.xlu1 (!%p294_p3), %v777_v3  ;;  %744 = vset.pattern.permute.xlu0 (!%p294_p3), %v777_v3  ;;  %v746_v12 = vld [vmem:[%s915_s4 + $0x8] sm:$0xff] (!%p294_p3)   ;;  %v747_v18 = vld [vmem:[%s915_s4 + $0x10] sm:$0xff] (!%p294_p3)   ;;  %v748_v19 = vld [vmem:[%s915_s4 + $0x18] sm:$0xff] (!%p294_p3)   ;;  %vm779_vm2 = vmmov (!%p294_p3), 0   ;;  %vm376_vm3 = vcmask (!%p294_p3), 261120  }
   0x8   : > { %696 = vmatprep.subr.bf16.mxu0 (!%p294_p3), %v778_v11  ;;  %708 = vmatprep.subr.bf16.mxu1 (!%p294_p3), %v778_v11  ;;  %377 = vst.msk [vmem:[#allocation2] sm:$0xff] (!%p294_p3), %vm376_vm3, %v778_v11  ;;  %v674_v24 = vld [vmem:[%s913_s2] ss:$0 sm:$0xff] (!%p294_p3)  ;;  %v750_v32 = vld [vmem:[%s917_s6 + $0x8] sm:$0xff] (!%p294_p3)   ;;  %vm574_vm4 = vcmask (!%p294_p3), 257024  }
   0x9   : > { %697 = vmatpush3.bf16.msra.mxu0 (!%p294_p3), %v745_v10  ;;  %704 = vmatprep.mubr.msk.bf16.mxu0 (!%p294_p3), %vm779_vm2, %v778_v11  ;;  %v675_v27 = vld [vmem:[%s914_s3] ss:$0 sm:$0xff] (!%p294_p3) }
   0xa   : > { %698 = vmatprep.subr.bf16.mxu0 (!%p294_p3), %v778_v11  ;;  %712 = vmatprep.mubr.msk.bf16.mxu1 (!%p294_p3), %vm779_vm2, %v778_v11  ;;  %v749_v31 = vld [vmem:[%s917_s6] sm:$0xff] (!%p294_p3)  }
   0xb   : > { %709 = vmatpush3.bf16.msra.mxu1 (!%p294_p3), %v749_v31  ;;  %v681_v39 = vld [vmem:[%s916_s5] ss:$0 sm:$0xff] (!%p294_p3) }
   0xc   : > { %710 = vmatprep.subr.bf16.mxu1 (!%p294_p3), %v778_v11  ;;  %v682_v44 = vld [vmem:[%s918_s7] ss:$0 sm:$0xff] (!%p294_p3) }
   0xd   : > { %699 = vmatpush3.bf16.msra.mxu0 (!%p294_p3), %v746_v12 }
   0xe   : > { %s925_s27 = smov (!%p334_p4, %s767_s27), 1  ;;  %700 = vmatprep.subr.bf16.mxu0 %v778_v11 }
   0xf   : > { %s671_s9 = sshll.u32 %s925_s27, 2  ;;  %711 = vmatpush3.bf16.msra.mxu1 %v750_v32  ;;  %v410_v33 = vld [vmem:[#allocation2] sm:$0xff]  ;;  %s672_s14 = sshll.u32 %s925_s27, 3 }
  0x10   : > { %s851_s12 = scalar_lea.vmem %s911_s0, %s671_s9  ;;  %s341_s17 = scalar_lea.vmem %s912_s1, %s672_s14 }
  0x11   : > { %v357_v0 = vld [vmem:[%s851_s12] sm:$0xf]  ;;  %701 = vmatpush3.bf16.msra.mxu0 %v747_v18  ;;  %s351_s22 = scalar_lea.vmem %s919_s8, %s671_s9 }
  0x12   : > { %v358_v1 = vunpack.c.l.bf16 %v357_v0  ;;  %702 = vmatprep.subr.bf16.mxu0 %v778_v11  ;;  %v378_v20 = vld [vmem:[%s851_s12] sm:$0xf] }
  0x13   : > { %v381_v21 = vunpack.c.l.bf16 %v378_v20  ;;  %v571_v46 = vld [vmem:[%s341_s17] sm:$0xff] }
  0x14   : > { %v360_v2 = vsel %vm359_vm0, %v358_v1, 0.0 }
  0x15   : > { %361 = vadd.xlane.f32.xlu0 %v360_v2  ;;  %703 = vmatpush3.bf16.msra.mxu0 %v748_v19 }
  0xa2   : > { %v362_v4 = vpop.xlane.xlu0 %361 }
  0xa3   : > { %v364_v5 = vmul.f32 0.015625, %v362_v4 }
  0xa5   : > { %v365_v6 = vsub.f32 %v358_v1, %v364_v5  ;;  %372 = vst.msk [vmem:[#allocation3] sm:$0xff] %vm371_vm1, %v364_v5 }
  0xa7   : > { %v366_v7 = vmul.f32 %v365_v6, %v365_v6 }
  0xa9   : > { %v367_v8 = vsel %vm359_vm0, %v366_v7, 0.0 }
  0xaa   : > { %368 = vadd.xlane.f32.xlu0 %v367_v8 }
  0xac   : > { %v382_v9 = vld [vmem:[#allocation3] sm:$0xff] }
  0xad   : > { %385 = vperm.xlu1 %743, %v382_v9  }
 0x12c   : > { %v386_v22 = vpop.permute.xlu1 %385 }
 0x12d   : > { %v388_v23 = vsub.f32 %v381_v21, %v386_v22 }
 0x137   : > { %v369_v13 = vpop.xlane.xlu0 %368 }
 0x138   : > { %v370_v14 = vmul.f32 0.015625, %v369_v13 }
 0x13a   : > { %v373_v15 = vadd.f32 1e-05, %v370_v14 }
 0x13c   : > { %751 = vrsqrt.f32 %v373_v15 }
 0x146   : > { %v752_v16 = vpop.eup %751 }
 0x147   : > { %375 = vst.msk [vmem:[#allocation4] sm:$0xff] %vm371_vm1, %v752_v16 }
 0x14e   : > { %v389_v17 = vld [vmem:[#allocation4] sm:$0xff] }
 0x14f   : > { %392 = vperm.xlu1 %743, %v389_v17  }
 0x1ce   : > { %v393_v25 = vpop.permute.xlu1 %392 }
 0x1cf   : > { %v395_v26 = vmul.f32 %v393_v25, %v388_v23 }
 0x1d1   : > { %v402_v28 = vmul.f32 %v674_v24, %v395_v26 }
 0x1d3   : > { %v409_v29 = vadd.f32 %v675_v27, %v402_v28 }
 0x1d5   : > { %v411_v30 = vpack.c.bf16 %v409_v29, %v409_v29 }
 0x1d7   : > { %705 = vmatmul.mubr.msk.bf16.vlgmr.msra.gmra.mrb[0].mxu0 %vm359_vm0, %v411_v30 }
 0x2aa   : > { %v482_v34 = vpop.f32.mrb[0].mxu0 }
 0x2ab   : > { %v488_v35 = vadd.f32 %v482_v34, %v410_v33  ;;  %v706_v36 = vpop.f32.mrb[1].mxu0 }
 0x2ac   : > { %v485_v37 = vpop.f32.mrb[2].mxu0 }
 0x2ad   : > { %490 = vst.msk [vmem:[#allocation2] sm:$0xff] %vm376_vm3, %v488_v35  ;;  %v707_v38 = vpop.f32.mrb[3].mxu0 }
 0x2b4   : > { %v494_v40 = vld [vmem:[#allocation2] sm:$0xff] }
 0x2b5   : > { %v502_v41 = vadd.f32 %v681_v39, %v494_v40 }
 0x2b7   : > { %v503_v42 = vmax.f32 %v502_v41, 0.0 }
 0x2b9   : > { %v504_v43 = vpack.c.bf16 %v503_v42, %v503_v42 }
 0x2bb   : > { %713 = vmatmul.mubr.msk.bf16.vlgmr.msra.gmra.mrb[0].mxu1 %vm376_vm3, %v504_v43 }
 0x38e   : > { %v565_v45 = vpop.f32.mrb[0].mxu1 }
 0x38f   : > { %v566_v47 = vadd.f32 %v682_v44, %v565_v45  ;;  %v714_v48 = vpop.f32.mrb[1].mxu1 }
 0x390   : > { %v568_v49 = vpop.f32.mrb[2].mxu1 }
 0x391   : > { %v572_v50 = vadd.f32 %v571_v46, %v566_v47  ;;  %v715_v51 = vpop.f32.mrb[3].mxu1 }
 0x393   : > { %v573_v52 = vpack.c.bf16 %v572_v50, %v572_v50 }
 0x395   : > { %575 = vst.msk [vmem:[%s351_s22] sm:$0xf] %vm574_vm4, %v573_v52 }
 0x396 PF: > { %s18_s29 = sadd.s32 1, %s775_s29   ;;  %s920_s27 = smov %s771_s28 }
 0x397   : > { %p15_p5 = scmp.ge.s32.totalorder %s18_s29, 4   ;;  %s921_s28 = smov %s923_s30 }
 0x399   :  { %17 = sbr.rel (!%p15_p5) target bundleno = 2 (0x2), region = 96 }

// kernel: esmfold_forward.11
= control target key start
LH: loop header
LB: loop body
LE: loop exit
PB: predicated region body
PF: predicated region fallthrough
CT: control target
= control target key end

     0   :  { %s3218_s0 = inlined_call_operand.vmem [shape: bf16[2,8,32], index: 0, kind: input, shape index: {}]   ;;  %s3219_s1 = inlined_call_operand.vmem [shape: bf16[2,8,32], index: 1, kind: input, shape index: {}]   ;;  %s3220_s2 = inlined_call_operand.vmem [shape: bf16[2,8,32], index: 2, kind: input, shape index: {}, may-alias: {2,3}]   ;;  %s3221_s3 = inlined_call_operand.vmem [shape: bf16[2,8,32], index: 3, kind: input, shape index: {}, may-alias: {2,3}]   ;;  %s3222_s4 = inlined_call_operand.vmem [shape: bf16[32,128], index: 4, kind: input, shape index: {}]   ;;  %s3223_s5 = inlined_call_operand.vmem [shape: f32[1,128], index: 5, kind: input, shape index: {}]   ;;  %s3224_s6 = inlined_call_operand.vmem [shape: f32[1,1,64], index: 6, kind: input, shape index: {}]   ;;  %s3225_s7 = inlined_call_operand.vmem [shape: f32[2,1,64], index: 7, kind: input, shape index: {}]   ;;  %s3226_s8 = inlined_call_operand.hbm [shape: bf16[2,8,8,32], index: 8, kind: output, shape index: {0}]   ;;  %s3227_s9 = inlined_call_operand.hbm [shape: bf16[2,8,8,64], index: 9, kind: output, shape index: {1}]   ;;  %s3228_s10 = inlined_call_operand.hbm [shape: bf16[2,8,8,64], index: 10, kind: output, shape index: {2}]   ;;  %s3229_s11 = inlined_call_operand.hbm [shape: bf16[2,8,8,64], index: 11, kind: output, shape index: {3}]   ;;  %s3230_s12 = inlined_call_operand.hbm [shape: f32[2,8,8], index: 12, kind: output, shape index: {4}]   ;;  %s3231_s13 = inlined_call_operand.vmem [shape: f32[2,8,8], index: 13, kind: output, shape index: {5}]  }
   0x1   :  { %3241 = sst [smem:[#allocation19_spill]] %s3218_s0 }
   0x2   :  { %3242 = sst [smem:[#allocation20_spill]] %s3219_s1 }
   0x3   :  { %3243 = sst [smem:[#allocation21_spill]] %s3220_s2 }
   0x4   :  { %3244 = sst [smem:[#allocation22_spill]] %s3221_s3 }
   0x5   :  { %3245 = sst [smem:[#allocation23_spill]] %s3222_s4 }
   0x6   :  { %3246 = sst [smem:[#allocation24_spill]] %s3223_s5 }
   0x7   :  { %3247 = sst [smem:[#allocation25_spill]] %s3224_s6 }
   0x8   :  { %19 = vsyncpa [#allocation3], 0 }
   0x9   :  { %21 = vsyncpa [#allocation3 + $0x1], 0 }
   0xa   :  { %22 = vsyncpa [#allocation5], 0 }
   0xb   :  { %24 = vsyncpa [#allocation5 + $0x1], 0 }
   0xc   :  { %25 = vsyncpa [#allocation8], 0 }
   0xd   :  { %27 = vsyncpa [#allocation8 + $0x1], 0  ;;  %s2514_s25 = smov 0   ;;  %s2516_s26 = smov 0  }
   0xe   :  { %s2518_s27 = smov 0   ;;  %s2520_s28 = smov 0  }
   0xf   :  { %s2522_s29 = smov 0   ;;  %s2524_s30 = smov 0  }
  0x10 LB: > { %3248 = sst [smem:[#allocation13_spill]] %s2414_s25  ;;  %s3233_s14 = sadd.s32 4294967295, %s2434_s30   ;;  %s2434_s30 = sphi %s2524_s30, %s33_s30   ;;  %s2430_s29 = sphi %s2522_s29, %s3273_s29   ;;  %s2426_s28 = sphi %s2520_s28, %s3272_s28   ;;  %s2422_s27 = sphi %s2518_s27, %s3271_s27   ;;  %s2418_s26 = sphi %s2516_s26, %s3275_s26   ;;  %s2414_s25 = sphi %s2514_s25, %s3274_s25  }
  0x11   : > { %3249 = sst [smem:[#allocation14_spill]] %s2422_s27  ;;  %s3232_s15 = sadd.s32 4294967294, %s2434_s30  }
  0x12   : > { %3250 = sst [smem:[#allocation15_spill]] %s2430_s29  ;;  %s52_s16 = sadd.s32 1, %s2430_s29 }
  0x13   : > { %s264_s17 = sadd.s32 1, %s2422_s27  ;;  %p54_p0 = scmp.ge.s32.totalorder %s52_s16, 2 }
  0x14   : > { %p274_p1 = scmp.ne.s32.totalorder %s2422_s27, %s2418_s26  ;;  %p275_p2 = scmp.eq.s32.totalorder %s3233_s14, 1 }
  0x15   : > { %p280_p3 = scmp.ne.s32.totalorder %s2418_s26, %s2414_s25  ;;  %s3277_s16 = smov (%p54_p0, %s52_s16), 0 }
  0x16   : > { %3251 = sst [smem:[#allocation16_spill]] %s3277_s16  ;;  %p2556_p4 = por %p275_p2, %p274_p1 }
  0x17   : > { %p281_p5 = scmp.eq.s32.totalorder %s3232_s15, 1  ;;  %s257_s19 = ssub.s32 %s2430_s29, %s3277_s16 }
  0x18   : > { %p2038_p6 = scmp.ge.s32.totalorder %s2434_s30, 1  ;;  %p262_p7 = scmp.eq.s32.totalorder %s257_s19, 0 }
  0x19   : > { %p2565_p8 = por %p281_p5, %p280_p3  ;;  %p504_p9 = scmp.lt.s32.totalorder %s2434_s30, 3 }
  0x1a   : > { %s2571_s21 = scalar_select %p262_p7, %s2422_s27, %s264_s17  }
  0x1b   : > { %s3253_s20 = scalar_select %p2565_p8, 1, 0 }
  0x1c   : > { %3255 = sst [smem:[#allocation18_spill]] %s2571_s21  ;;  %p505_p10 = pnand %p2038_p6, %p504_p9 }
  0x1d   : > { %3254 = sst [smem:[#allocation17_spill]] %s3253_s20  ;;  %v659_v2 = vlaneseq (!%p505_p10)  ;;  %p604_p11 = scmp.lt.s32.totalorder (!%p505_p10), %s2426_s28, 1  ;;  %v2436_v3 = vmov (!%p505_p10), 1966171168   ;;  %vm779_vm0 = vcmask (!%p505_p10), 1043456   ;;  %vm802_vm1 = vcmask (!%p505_p10), 261120  }
  0x1e   : > { %508 = sbr.rel (%p505_p10) target bundleno = 1038 (0x40e), region = 52  ;;  %s3256_s4 = sld [smem:[#allocation23_spill]] (!%p505_p10)  ;;  %v657_v4 = vunpack.c.l.s4 (!%p505_p10), %v2436_v3  ;;  %vm760_vm2 = vcmask (!%p505_p10), 257024   ;;  %vm985_vm3 = vcmask (!%p505_p10), 519168   ;;  %vm1164_vm4 = vcmask (!%p505_p10), 1048064  }
  0x1f   : > { %v2584_v6 = vshrl.u32 (!%p505_p10), %v659_v2, 7  ;;  %s3257_s0 = sld [smem:[#allocation19_spill]] (!%p505_p10)  ;;  %s3258_s1 = sld [smem:[#allocation20_spill]] (!%p505_p10)  ;;  %vm1245_vm5 = vcmask (!%p505_p10), 523264  }
  0x20   : > { %v658_v5 = vunpack.c.0.s8 (!%p505_p10), %v657_v4  ;;  %s3259_s2 = sld [smem:[#allocation21_spill]] (!%p505_p10)  ;;  %s3260_s3 = sld [smem:[#allocation22_spill]] (!%p505_p10) }
  0x21   : > { %v2608_v23 = vsub.s32 (!%p505_p10), 0, %v2584_v6  ;;  %s3261_s5 = sld [smem:[#allocation24_spill]] (!%p505_p10)  ;;  %s3239_s20 = smov (!%p505_p10), 64  }
  0x22   : > { %v2600_v10 = vsub.s32 (!%p505_p10), %v658_v5, %v2584_v6  ;;  %s3262_s6 = sld [smem:[#allocation25_spill]] (!%p505_p10)  ;;  %s3263_s14 = sadd.s32 (!%p505_p10), 4294967295, %s2434_s30  }
  0x24   : > { %v2200_v0 = vld [vmem:[%s3256_s4] sm:$0xff] (!%p505_p10)   ;;  %v2201_v1 = vld [vmem:[%s3256_s4 + $0x8] sm:$0xff] (!%p505_p10)  }
  0x25   : > { %2114 = vmatprep.subr.bf16.mxu0 %v2200_v0  ;;  %s2581_s17 = scalar_select %p604_p11, %s2426_s28, 1 }
  0x26   : > { %2115 = vmatpush3.bf16.msra.mxu0 %v2200_v0 }
  0x27   : > { %2116 = vmatprep.subr.bf16.mxu0 %v2201_v1  ;;  %s2044_s19 = sshll.u32 %s2581_s17, 2  ;;  %s634_s22 = scalar_lea.vmem %s3225_s7, %s2581_s17 }
  0x28   : > { %s610_s15 = scalar_lea.vmem %s3257_s0, %s2044_s19  ;;  %s617_s4 = scalar_lea.vmem %s3258_s1, %s2044_s19 }
  0x29   : > { %v650_v7 = vld [vmem:[%s610_s15] sm:$0xf]  ;;  %s624_s21 = scalar_lea.vmem %s3259_s2, %s2044_s19  ;;  %s631_s25 = scalar_lea.vmem %s3260_s3, %s2044_s19 }
  0x2a   : > { %2117 = vmatpush3.bf16.msra.mxu0 %v2201_v1  ;;  %v769_v8 = vld [vmem:[%s610_s15] sm:$0xf]  ;;  %v651_v9 = vunpack.c.l.bf16 %v650_v7  ;;  %s2977_s19 = sshll.u32 %s2426_s28, 9 }
  0x2b   : > { %v2202_v11 = vld [vmem:[%s617_s4] ss:$0 sps:$4 sm:$0xff]   ;;  %s2983_s15 = scalar_lea.hbm %s3227_s9, %s2977_s19 }
  0x2c   : > { %v771_v12 = vld [vmem:[%s624_s21] sm:$0xf]  ;;  %v655_v15 = vcombine.high %v651_v9, %v651_v9  ;;  %v662_v16 = vrot.slane %v651_v9, %v2600_v10  ;;  %v782_v17 = vsel %vm779_vm0, %v769_v8, %v2202_v11  ;;  %s2974_s21 = sand.u32 1, %s3263_s14   ;;  %s2438_s14 = smov [#allocation4]  }
  0x2d   : > { %v2203_v13 = vld [vmem:[%s631_s25] ss:$0 sps:$4 sm:$0xff]   ;;  %2118 = vmatprep.mubr.msk.bf16.mxu0 %vm802_vm1, %v782_v17  ;;  %s2611_s25 = sand.u32 1, %s2418_s26   ;;  %s2240_s1 = sshll.u32 %s2438_s14, 4  ;;  %s2241_s1 = int_to_ptr.vmem [resolvable:$false] %s2240_s1 }
  0x2e   : > { %v652_v14 = vld [vmem:[%s617_s4] sm:$0xf]  ;;  %v785_v18 = vsel %vm779_vm0, %v771_v12, %v2203_v13  ;;  %v669_v19 = vrot.slane %v655_v15, %v2600_v10  ;;  %v670_v20 = vcombine.high %v662_v16, %v662_v16  ;;  %v678_v21 = vrot.slane %v662_v16, %v2600_v10  ;;  %s2619_s4 = sshll.u32 %s2611_s25, 5  ;;  %s2242_s2 = scalar_lea.vmem %s2241_s1, 1024 }
  0x2f   : > { %2119 = vmatmul.mubr.msk.bf16.vlgmr.msra.gmra.mrb[0].mxu0 %vm802_vm1, %v785_v18  ;;  %v653_v22 = vunpack.c.l.bf16 %v652_v14  ;;  %s2628_s27 = scalar_lea.vmem [#allocation2], %s2619_s4  ;;  %s2705_s16 = scalar_lea.vmem [#allocation4], %s2619_s4 }
  0x30   : > { %v671_v24 = vcombine.high %v669_v19, %v669_v19  ;;  %v685_v25 = vrot.slane %v669_v19, %v2600_v10  ;;  %v692_v26 = vrot.slane %v670_v20, %v2600_v10  ;;  %v700_v27 = vcombine.high %v678_v21, %v678_v21  ;;  %s2868_s24 = scalar_lea.vmem [#allocation6], %s2619_s4  ;;  %s2944_s29 = scalar_lea.vmem [#allocation7], %s2619_s4 }
  0x31   : > { %v707_v28 = vrot.slane %v678_v21, %v2608_v23  ;;  %s1689_s4 = sshll.u32 %s2868_s24, 4  ;;  %s2970_s4 = int_to_ptr.vmem [resolvable:$true] %s1689_s4 }
  0x32   : > { %v699_v29 = vrot.slane %v671_v24, %v2600_v10  ;;  %v701_v30 = vcombine.high %v685_v25, %v685_v25  ;;  %v702_v31 = vcombine.high %v692_v26, %v692_v26  ;;  %v711_v32 = vrot.slane %v692_v26, %v2608_v23 }
  0x33   : > { %v715_v33 = vrot.slane %v700_v27, %v2608_v23  ;;  %v723_v34 = vrot.slane %v685_v25, %v2608_v23  ;;  %v744_v35 = vadd.f32 %v707_v28, %v653_v22 }
  0x34   : > { %v703_v36 = vcombine.high %v699_v29, %v699_v29  ;;  %v719_v37 = vrot.slane %v702_v31, %v2608_v23  ;;  %v727_v38 = vrot.slane %v699_v29, %v2608_v23  ;;  %v731_v39 = vrot.slane %v701_v30, %v2608_v23 }
  0x35   : > { %v745_v40 = vadd.f32 %v711_v32, %v653_v22  ;;  %v746_v41 = vadd.f32 %v715_v33, %v653_v22  ;;  %v748_v42 = vadd.f32 %v723_v34, %v653_v22  ;;  %v752_v43 = vpack.c.bf16 %v744_v35, %v744_v35 }
  0x36   : > { %v735_v44 = vrot.slane %v703_v36, %v2608_v23  ;;  %v747_v45 = vadd.f32 %v719_v37, %v653_v22  ;;  %v749_v46 = vadd.f32 %v727_v38, %v653_v22  ;;  %v750_v47 = vadd.f32 %v731_v39, %v653_v22 }
  0x37   : > { %v753_v48 = vpack.c.bf16 %v745_v40, %v745_v40  ;;  %v754_v49 = vpack.c.bf16 %v746_v41, %v746_v41  ;;  %v756_v50 = vpack.c.bf16 %v748_v42, %v748_v42  ;;  %761 = vst.msk [vmem:[%s2628_s27] sm:$0xf] %vm760_vm2, %v752_v43  ;;  %v2694_v41 = vld [vmem:[%s3261_s5] ss:$0 sm:$0xff] }
  0x38   : > { %v751_v51 = vadd.f32 %v735_v44, %v653_v22  ;;  %v755_v52 = vpack.c.bf16 %v747_v45, %v747_v45  ;;  %v757_v53 = vpack.c.bf16 %v749_v46, %v749_v46  ;;  %v758_v54 = vpack.c.bf16 %v750_v47, %v750_v47 }
  0x39   : > { %762 = vst.msk [vmem:[%s2628_s27 + $0x4] sm:$0xf] %vm760_vm2, %v753_v48  ;;  %763 = vst.msk [vmem:[%s2628_s27 + $0x8] sm:$0xf] %vm760_vm2, %v754_v49 }
  0x3a   : > { %765 = vst.msk [vmem:[%s2628_s27 + $0x10] sm:$0xf] %vm760_vm2, %v756_v50  ;;  %v759_v55 = vpack.c.bf16 %v751_v51, %v751_v51  ;;  %764 = vst.msk [vmem:[%s2628_s27 + $0xc] sm:$0xf] %vm760_vm2, %v755_v52 }
  0x3b   : > { %766 = vst.msk [vmem:[%s2628_s27 + $0x14] sm:$0xf] %vm760_vm2, %v757_v53  ;;  %767 = vst.msk [vmem:[%s2628_s27 + $0x18] sm:$0xf] %vm760_vm2, %v758_v54 }
  0x3c   : > { %768 = vst.msk [vmem:[%s2628_s27 + $0x1c] sm:$0xf] %vm760_vm2, %v759_v55 }
 0x102   : > { %v2120_v56 = vpop.f32.mrb[0].mxu0 }
 0x103   : > { %v858_v57 = vcombine.high %v2120_v56, %v2120_v56  ;;  %v865_v58 = vrot.slane %v2120_v56, %v2600_v10  ;;  %v841_v59 = vpop.f32.mrb[1].mxu0 }
 0x104   : > { %v995_v60 = vcombine.high %v841_v59, %v841_v59  ;;  %v1002_v61 = vrot.slane %v841_v59, %v2600_v10  ;;  %v2121_v62 = vpop.f32.mrb[2].mxu0 }
 0x105   : > { %v872_v63 = vrot.slane %v858_v57, %v2600_v10  ;;  %v873_v0 = vcombine.high %v865_v58, %v865_v58  ;;  %v881_v1 = vrot.slane %v865_v58, %v2600_v10  ;;  %v2650_v3 = vpop.f32.mrb[3].mxu0 }
 0x106   : > { %v1009_v4 = vrot.slane %v995_v60, %v2600_v10  ;;  %v1010_v5 = vcombine.high %v1002_v61, %v1002_v61  ;;  %v2654_v7 = vrot.slane %v1002_v61, %v2600_v10 }
 0x107   : > { %v874_v8 = vcombine.high %v872_v63, %v872_v63  ;;  %v888_v9 = vrot.slane %v872_v63, %v2600_v10  ;;  %v895_v11 = vrot.slane %v873_v0, %v2600_v10  ;;  %v903_v12 = vcombine.high %v881_v1, %v881_v1 }
 0x108   : > { %v910_v13 = vrot.slane %v881_v1, %v2608_v23  ;;  %v1011_v14 = vcombine.high %v1009_v4, %v1009_v4  ;;  %v2660_v15 = vrot.slane %v1009_v4, %v2600_v10  ;;  %v2663_v16 = vrot.slane %v1010_v5, %v2600_v10 }
 0x109   : > { %v902_v17 = vrot.slane %v874_v8, %v2600_v10  ;;  %v904_v18 = vcombine.high %v888_v9, %v888_v9  ;;  %v905_v19 = vcombine.high %v895_v11, %v895_v11  ;;  %v914_v20 = vrot.slane %v895_v11, %v2608_v23 }
 0x10a   : > { %v918_v21 = vrot.slane %v903_v12, %v2608_v23  ;;  %v926_v22 = vrot.slane %v888_v9, %v2608_v23  ;;  %v2670_v24 = vrot.slane %v1011_v14, %v2600_v10  ;;  %v1040_v25 = vcombine.high %v2654_v7, %v2654_v7 }
 0x10b   : > { %v906_v26 = vcombine.high %v902_v17, %v902_v17  ;;  %v922_v27 = vrot.slane %v905_v19, %v2608_v23  ;;  %v930_v28 = vrot.slane %v902_v17, %v2608_v23  ;;  %v934_v29 = vrot.slane %v904_v18, %v2608_v23 }
 0x10c   : > { %v1041_v30 = vcombine.high %v2660_v15, %v2660_v15  ;;  %v1042_v31 = vcombine.high %v2663_v16, %v2663_v16  ;;  %v1043_v10 = vcombine.high %v2670_v24, %v2670_v24  ;;  %v1047_v32 = vrot.slane %v2654_v7, %v2608_v23 }
 0x10d   : > { %v938_v33 = vrot.slane %v906_v26, %v2608_v23  ;;  %v1051_v34 = vrot.slane %v2663_v16, %v2608_v23  ;;  %v1055_v35 = vrot.slane %v1040_v25, %v2608_v23  ;;  %v1063_v36 = vrot.slane %v2660_v15, %v2608_v23 }
 0x10e   : > { %v947_v37 = vadd.f32 %v2121_v62, %v910_v13  ;;  %v948_v38 = vadd.f32 %v2121_v62, %v914_v20  ;;  %v949_v39 = vadd.f32 %v2121_v62, %v918_v21  ;;  %v950_v40 = vadd.f32 %v2121_v62, %v922_v27 }
 0x10f   : > { %v951_v42 = vadd.f32 %v2121_v62, %v926_v22  ;;  %v952_v43 = vadd.f32 %v2121_v62, %v930_v28  ;;  %v953_v44 = vadd.f32 %v2121_v62, %v934_v29  ;;  %v954_v45 = vadd.f32 %v2121_v62, %v938_v33 }
 0x110   : > { %v955_v46 = vmul.f32 0.5, %v947_v37  ;;  %v956_v47 = vmul.f32 0.5, %v948_v38  ;;  %v957_v48 = vmul.f32 0.5, %v949_v39  ;;  %v958_v49 = vmul.f32 0.5, %v950_v40 }
 0x111   : > { %v959_v50 = vmul.f32 0.5, %v951_v42  ;;  %v960_v51 = vmul.f32 0.5, %v952_v43  ;;  %v961_v52 = vmul.f32 0.5, %v953_v44  ;;  %v962_v53 = vmul.f32 0.5, %v954_v45 }
 0x112   : > { %v969_v54 = vadd.f32 %v2694_v41, %v955_v46  ;;  %v970_v55 = vadd.f32 %v2694_v41, %v956_v47  ;;  %v971_v56 = vadd.f32 %v2694_v41, %v957_v48  ;;  %v972_v57 = vadd.f32 %v2694_v41, %v958_v49 }
 0x113   : > { %v973_v58 = vadd.f32 %v2694_v41, %v959_v50  ;;  %v974_v59 = vadd.f32 %v2694_v41, %v960_v51  ;;  %v975_v60 = vadd.f32 %v2694_v41, %v961_v52  ;;  %v976_v61 = vadd.f32 %v2694_v41, %v962_v53 }
 0x114   : > { %v977_v62 = vpack.c.bf16 %v969_v54, %v969_v54  ;;  %v978_v63 = vpack.c.bf16 %v970_v55, %v970_v55  ;;  %v979_v0 = vpack.c.bf16 %v971_v56, %v971_v56  ;;  %v980_v1 = vpack.c.bf16 %v972_v57, %v972_v57 }
 0x115   : > { %v981_v4 = vpack.c.bf16 %v973_v58, %v973_v58  ;;  %v982_v5 = vpack.c.bf16 %v974_v59, %v974_v59  ;;  %v983_v7 = vpack.c.bf16 %v975_v60, %v975_v60  ;;  %v984_v8 = vpack.c.bf16 %v976_v61, %v976_v61 }
 0x116   : > { %986 = vst.msk [vmem:[%s2705_s16] sm:$0xf] %vm985_vm3, %v977_v62  ;;  %987 = vst.msk [vmem:[%s2705_s16 + $0x4] sm:$0xf] %vm985_vm3, %v978_v63  ;;  %v1084_v9 = vadd.f32 %v1047_v32, %v2650_v3  ;;  %v1086_v11 = vadd.f32 %v1055_v35, %v2650_v3  ;;  %v1085_v12 = vadd.f32 %v1051_v34, %v2650_v3 }
 0x117   : > { %988 = vst.msk [vmem:[%s2705_s16 + $0x8] sm:$0xf] %vm985_vm3, %v979_v0  ;;  %989 = vst.msk [vmem:[%s2705_s16 + $0xc] sm:$0xf] %vm985_vm3, %v980_v1  ;;  %v1059_v13 = vrot.slane %v1042_v31, %v2608_v23  ;;  %v1088_v14 = vadd.f32 %v1063_v36, %v2650_v3  ;;  %v1067_v15 = vrot.slane %v2670_v24, %v2608_v23 }
 0x118   : > { %990 = vst.msk [vmem:[%s2705_s16 + $0x10] sm:$0xf] %vm985_vm3, %v981_v4  ;;  %991 = vst.msk [vmem:[%s2705_s16 + $0x14] sm:$0xf] %vm985_vm3, %v982_v5  ;;  %v1071_v16 = vrot.slane %v1041_v30, %v2608_v23  ;;  %v1075_v17 = vrot.slane %v1043_v10, %v2608_v23  ;;  %v2733_v18 = vadd.f32 %v2694_v41, %v1084_v9 }
 0x119   : > { %992 = vst.msk [vmem:[%s2705_s16 + $0x18] sm:$0xf] %vm985_vm3, %v983_v7  ;;  %993 = vst.msk [vmem:[%s2705_s16 + $0x1c] sm:$0xf] %vm985_vm3, %v984_v8  ;;  %v2736_v19 = vadd.f32 %v2694_v41, %v1086_v11  ;;  %v1087_v20 = vadd.f32 %v1059_v13, %v2650_v3  ;;  %v1089_v21 = vadd.f32 %v1067_v15, %v2650_v3 }
 0x11a   : > { %v1090_v22 = vadd.f32 %v1071_v16, %v2650_v3  ;;  %v1091_v25 = vadd.f32 %v1075_v17, %v2650_v3  ;;  %v1165_v24 = vsel %vm1164_vm4, %v2733_v18, -inf  ;;  %v2747_v26 = vadd.f32 %v2694_v41, %v1085_v12 }
 0x11b   : > { %v1171_v23 = vsel %vm1164_vm4, %v2736_v19, -inf  ;;  %v2750_v27 = vadd.f32 %v2694_v41, %v1087_v20  ;;  %1166 = vmax.xlane.f32.xlu0 %v1165_v24  ;;  %v2757_v29 = vadd.f32 %v2694_v41, %v1088_v14  ;;  %v2760_v30 = vadd.f32 %v2694_v41, %v1089_v21 }
 0x11c   : > { %1172 = vmax.xlane.f32.xlu1 %v1171_v23  ;;  %v1168_v28 = vsel %vm1164_vm4, %v2747_v26, -inf  ;;  %v2767_v32 = vadd.f32 %v2694_v41, %v1090_v22  ;;  %v2770_v33 = vadd.f32 %v2694_v41, %v1091_v25 }
 0x11d   : > { %v1174_v3 = vsel %vm1164_vm4, %v2750_v27, -inf  ;;  %v1177_v31 = vsel %vm1164_vm4, %v2757_v29, -inf  ;;  %v1180_v10 = vsel %vm1164_vm4, %v2760_v30, -inf }
 0x11e   : > { %v1183_v34 = vsel %vm1164_vm4, %v2767_v32, -inf  ;;  %v1186_v35 = vsel %vm1164_vm4, %v2770_v33, -inf }
 0x11f   : > { %1169 = vmax.xlane.f32.xlu0 %v1168_v28  ;;  %v2073_v28 = vld [vmem:[%s634_s22] ss:$0 sm:$0xff] }
 0x120   : > { %1175 = vmax.xlane.f32.xlu1 %v1174_v3  ;;  %v2090_v3 = vpack.c.bf16 %v2733_v18, %v2733_v18 }
 0x123   : > { %1178 = vmax.xlane.f32.xlu0 %v1177_v31  ;;  %v2072_v31 = vld [vmem:[%s3262_s6] ss:$0 sm:$0xff] }
 0x124   : > { %1181 = vmax.xlane.f32.xlu1 %v1180_v10  ;;  %v2091_v10 = vpack.c.bf16 %v2747_v26, %v2747_v26 }
 0x127   : > { %1184 = vmax.xlane.f32.xlu0 %v1183_v34  ;;  %v2092_v34 = vpack.c.bf16 %v2736_v19, %v2736_v19 }
 0x128   : > { %1187 = vmax.xlane.f32.xlu1 %v1186_v35  ;;  %v2094_v35 = vpack.c.bf16 %v2757_v29, %v2757_v29 }
 0x1a8   : > { %v1167_v36 = vpop.xlane.xlu0 %1166 }
 0x1a9   : > { %v1173_v37 = vpop.xlane.xlu1 %1172  ;;  %v1189_v38 = vsub.f32 %v2733_v18, %v1167_v36  ;;  %v2093_v18 = vpack.c.bf16 %v2750_v27, %v2750_v27 }
 0x1aa   : > { %v1191_v40 = vsub.f32 %v2736_v19, %v1173_v37  ;;  %v2096_v19 = vpack.c.bf16 %v2767_v32, %v2767_v32 }
 0x1ab   : > { %v1197_v39 = vmul.f32 1.442695, %v1189_v38 }
 0x1ac   : > { %v1170_v42 = vpop.xlane.xlu0 %1169  ;;  %v1201_v45 = vmul.f32 1.442695, %v1191_v40 }
 0x1ad   : > { %v1176_v41 = vpop.xlane.xlu1 %1175  ;;  %2204 = vpow2.f32 %v1197_v39  ;;  %v1190_v43 = vsub.f32 %v2747_v26, %v1170_v42  ;;  %v2095_v26 = vpack.c.bf16 %v2760_v30, %v2760_v30 }
 0x1ae   : > { %v1192_v46 = vsub.f32 %v2750_v27, %v1176_v41 }
 0x1af   : > { %v1199_v44 = vmul.f32 1.442695, %v1190_v43 }
 0x1b0   : > { %v1179_v47 = vpop.xlane.xlu0 %1178  ;;  %v1203_v51 = vmul.f32 1.442695, %v1192_v46 }
 0x1b1   : > { %v1182_v48 = vpop.xlane.xlu1 %1181  ;;  %2206 = vpow2.f32 %v1199_v44  ;;  %v1193_v49 = vsub.f32 %v2757_v29, %v1179_v47 }
 0x1b2   : > { %2208 = vpow2.f32 %v1201_v45  ;;  %v1194_v53 = vsub.f32 %v2760_v30, %v1182_v48 }
 0x1b3   : > { %v1205_v50 = vmul.f32 1.442695, %v1193_v49 }
 0x1b4   : > { %v1185_v52 = vpop.xlane.xlu0 %1184  ;;  %v1207_v58 = vmul.f32 1.442695, %v1194_v53 }
 0x1b5   : > { %2210 = vpow2.f32 %v1205_v50  ;;  %v1195_v54 = vsub.f32 %v2767_v32, %v1185_v52  ;;  %v1188_v55 = vpop.xlane.xlu1 %1187 }
 0x1b6   : > { %2212 = vpow2.f32 %v1203_v51  ;;  %v1196_v59 = vsub.f32 %v2770_v33, %v1188_v55 }
 0x1b7   : > { %v2783_v56 = vpop.eup %2204  ;;  %v1209_v57 = vmul.f32 1.442695, %v1195_v54 }
 0x1b8   : > { %1221 = vrot.lane.b32.xlu0 %v2783_v56, %s3239_s20  ;;  %v1211_v61 = vmul.f32 1.442695, %v1196_v59 }
 0x1b9   : > { %2214 = vpow2.f32 %v1209_v57 }
 0x1ba   : > { %2216 = vpow2.f32 %v1207_v58 }
 0x1bb   : > { %v2788_v60 = vpop.eup %2206  ;;  %2218 = vpow2.f32 %v1211_v61 }
 0x1bc   : > { %1223 = vrot.lane.b32.xlu1 %v2788_v60, %s3239_s20  ;;  %v2792_v62 = vpop.eup %2208 }
 0x1bf   : > { %v2794_v63 = vpop.eup %2210 }
 0x1c0   : > { %1225 = vrot.lane.b32.xlu1 %v2792_v62, %s3239_s20  ;;  %1229 = vrot.lane.b32.xlu0 %v2794_v63, %s3239_s20  ;;  %v2800_v0 = vpop.eup %2212 }
 0x1c3   : > { %v2802_v1 = vpop.eup %2214 }
 0x1c4   : > { %1227 = vrot.lane.b32.xlu1 %v2800_v0, %s3239_s20  ;;  %1233 = vrot.lane.b32.xlu0 %v2802_v1, %s3239_s20  ;;  %v2808_v4 = vpop.eup %2216 }
 0x1c5   : > { %v2812_v5 = vpop.eup %2218 }
 0x1c8   : > { %1231 = vrot.lane.b32.xlu1 %v2808_v4, %s3239_s20 }
 0x1cc   : > { %1235 = vrot.lane.b32.xlu1 %v2812_v5, %s3239_s20 }
 0x22a   : > { %v1222_v7 = vpop.permute.xlu0 %1221 }
 0x22b   : > { %v1246_v8 = vsel %vm1245_vm5, %v1222_v7, 0.0 }
 0x22c   : > { %1247 = vadd.xlane.f32.xlu0 %v1246_v8 }
 0x22e   : > { %v1224_v9 = vpop.permute.xlu1 %1223 }
 0x22f   : > { %v1249_v11 = vsel %vm1245_vm5, %v1224_v9, 0.0 }
 0x230   : > { %1250 = vadd.xlane.f32.xlu1 %v1249_v11 }
 0x232   : > { %v1226_v12 = vpop.permute.xlu1 %1225  ;;  %v1230_v14 = vpop.permute.xlu0 %1229 }
 0x233   : > { %v1252_v13 = vsel %vm1245_vm5, %v1226_v12, 0.0  ;;  %v1258_v16 = vsel %vm1245_vm5, %v1230_v14, 0.0 }
 0x234   : > { %1253 = vadd.xlane.f32.xlu0 %v1252_v13 }
 0x236   : > { %v1228_v15 = vpop.permute.xlu1 %1227  ;;  %v1234_v22 = vpop.permute.xlu0 %1233 }
 0x237   : > { %v1255_v21 = vsel %vm1245_vm5, %v1228_v15, 0.0  ;;  %v1264_v23 = vsel %vm1245_vm5, %v1234_v22, 0.0 }
 0x238   : > { %1259 = vadd.xlane.f32.xlu0 %v1258_v16 }
 0x23a   : > { %v1232_v17 = vpop.permute.xlu1 %1231 }
 0x23b   : > { %v1261_v20 = vsel %vm1245_vm5, %v1232_v17, 0.0 }
 0x23c   : > { %1262 = vadd.xlane.f32.xlu1 %v1261_v20  ;;  %1256 = vadd.xlane.f32.xlu0 %v1255_v21 }
 0x23e   : > { %v1236_v25 = vpop.permute.xlu1 %1235 }
 0x23f   : > { %v1267_v24 = vsel %vm1245_vm5, %v1236_v25, 0.0 }
 0x240   : > { %1268 = vadd.xlane.f32.xlu1 %v1267_v24  ;;  %1265 = vadd.xlane.f32.xlu0 %v1264_v23  ;;  %v2097_v24 = vpack.c.bf16 %v2770_v33, %v2770_v33 }
 0x251   : > { %1488 = vrot.lane.b32.xlu1 %v2073_v28, %s3239_s20 }
 0x255   : > { %1132 = vrot.lane.b32.xlu1 %v2090_v3, %s3239_s20 }
 0x256   : > { %1356 = vrot.lane.b32.xlu0 %v2072_v31, %s3239_s20 }
 0x259   : > { %1134 = vrot.lane.b32.xlu1 %v2091_v10, %s3239_s20 }
 0x25a   : > { %1136 = vrot.lane.b32.xlu0 %v2092_v34, %s3239_s20 }
 0x25d   : > { %1138 = vrot.lane.b32.xlu1 %v2093_v18, %s3239_s20 }
 0x25e   : > { %1140 = vrot.lane.b32.xlu0 %v2094_v35, %s3239_s20 }
 0x261   : > { %1142 = vrot.lane.b32.xlu1 %v2095_v26, %s3239_s20 }
 0x262   : > { %1144 = vrot.lane.b32.xlu0 %v2096_v19, %s3239_s20 }
 0x2b9   : > { %v1248_v36 = vpop.xlane.xlu0 %1247 }
 0x2ba   : > { %2220 = vrcp.f32 %v1248_v36 }
 0x2bd   : > { %v1251_v27 = vpop.xlane.xlu1 %1250 }
 0x2be   : > { %2222 = vrcp.f32 %v1251_v27 }
 0x2c1   : > { %v1254_v37 = vpop.xlane.xlu0 %1253 }
 0x2c2   : > { %2224 = vrcp.f32 %v1254_v37 }
 0x2c4   : > { %v2221_v40 = vpop.eup %2220 }
 0x2c5   : > { %v1260_v38 = vpop.xlane.xlu0 %1259  ;;  %v1271_v32 = vmul.f32 %v2221_v40, %v2783_v56 }
 0x2c6   : > { %2226 = vrcp.f32 %v1260_v38 }
 0x2c7   : > { %v2098_v17 = vpack.c.bf16 %v1271_v32, %v1271_v32 }
 0x2c8   : > { %v2223_v41 = vpop.eup %2222 }
 0x2c9   : > { %v1263_v29 = vpop.xlane.xlu1 %1262  ;;  %v1257_v39 = vpop.xlane.xlu0 %1256  ;;  %v2864_v49 = vmul.f32 %v2223_v41, %v2788_v60 }
 0x2ca   : > { %2228 = vrcp.f32 %v1257_v39 }
 0x2cb   : > { %2230 = vrcp.f32 %v1263_v29  ;;  %v2099_v3 = vpack.c.bf16 %v2864_v49, %v2864_v49 }
 0x2cc   : > { %v2225_v43 = vpop.eup %2224 }
 0x2cd   : > { %v1269_v30 = vpop.xlane.xlu1 %1268  ;;  %v1266_v42 = vpop.xlane.xlu0 %1265  ;;  %v1275_v50 = vmul.f32 %v2225_v43, %v2792_v62 }
 0x2ce   : > { %2232 = vrcp.f32 %v1266_v42 }
 0x2cf   : > { %2234 = vrcp.f32 %v1269_v30 }
 0x2d0   : > { %v2227_v48 = vpop.eup %2226 }
 0x2d1   : > { %v2855_v44 = vpop.permute.xlu1 %1488  ;;  %v2857_v45 = vpop.permute.xlu0 %1356  ;;  %v1279_v55 = vmul.f32 %v2227_v48, %v2794_v63 }
 0x2d2   : > { %v1491_v46 = vmul.f32 %v2855_v44, %v1271_v32  ;;  %v1359_v47 = vmul.f32 %v2857_v45, %v1271_v32  ;;  %v1360_v53 = vmul.f32 %v2857_v45, %v2864_v49  ;;  %v1361_v54 = vmul.f32 %v2857_v45, %v1275_v50 }
 0x2d3   : > { %v1363_v59 = vmul.f32 %v2857_v45, %v1279_v55  ;;  %v1492_v60 = vmul.f32 %v2855_v44, %v2864_v49  ;;  %v1493_v9 = vmul.f32 %v2855_v44, %v1275_v50  ;;  %v1495_v14 = vmul.f32 %v2855_v44, %v1279_v55 }
 0x2d4   : > { %1507 = vrot.lane.b32.xlu0 %v1491_v46, %s3239_s20  ;;  %1375 = vrot.lane.b32.xlu1 %v1359_v47, %s3239_s20  ;;  %v2229_v56 = vpop.eup %2228  ;;  %v2102_v25 = vpack.c.bf16 %v1279_v55, %v1279_v55 }
 0x2d5   : > { %v1137_v51 = vpop.permute.xlu0 %1136  ;;  %v1133_v52 = vpop.permute.xlu1 %1132  ;;  %v1277_v61 = vmul.f32 %v2229_v56, %v2800_v0 }
 0x2d6   : > { %1158 = vst.msk [vmem:[%s2868_s24 + $0x8] sm:$0xf] %vm985_vm3, %v1137_v51  ;;  %1156 = vst.msk [vmem:[%s2868_s24] sm:$0xf] %vm985_vm3, %v1133_v52  ;;  %v2231_v62 = vpop.eup %2230 }
 0x2d7   : > { %v1362_v8 = vmul.f32 %v2857_v45, %v1277_v61  ;;  %v1281_v11 = vmul.f32 %v2231_v62, %v2808_v4  ;;  %v1494_v16 = vmul.f32 %v2855_v44, %v1277_v61  ;;  %v2101_v10 = vpack.c.bf16 %v1277_v61, %v1277_v61 }
 0x2d8   : > { %1377 = vrot.lane.b32.xlu0 %v1360_v53, %s3239_s20  ;;  %1379 = vrot.lane.b32.xlu1 %v1361_v54, %s3239_s20  ;;  %v2233_v12 = vpop.eup %2232 }
 0x2d9   : > { %v1141_v57 = vpop.permute.xlu0 %1140  ;;  %v1135_v58 = vpop.permute.xlu1 %1134  ;;  %v1364_v13 = vmul.f32 %v2857_v45, %v1281_v11  ;;  %v1283_v15 = vmul.f32 %v2233_v12, %v2802_v1  ;;  %v1496_v20 = vmul.f32 %v2855_v44, %v1281_v11  ;;  %v2100_v1 = vpack.c.bf16 %v1275_v50, %v1275_v50 }
 0x2da   : > { %1160 = vst.msk [vmem:[%s2868_s24 + $0x10] sm:$0xf] %vm985_vm3, %v1141_v57  ;;  %1157 = vst.msk [vmem:[%s2868_s24 + $0x4] sm:$0xf] %vm985_vm3, %v1135_v58  ;;  %v2235_v22 = vpop.eup %2234 }
 0x2db   : > { %v1365_v4 = vmul.f32 %v2857_v45, %v1283_v15  ;;  %v1497_v21 = vmul.f32 %v2855_v44, %v1283_v15  ;;  %v1285_v23 = vmul.f32 %v2235_v22, %v2812_v5  ;;  %v2104_v33 = vpack.c.bf16 %v1283_v15, %v1283_v15 }
 0x2dc   : > { %1383 = vrot.lane.b32.xlu0 %v1363_v59, %s3239_s20  ;;  %1509 = vrot.lane.b32.xlu1 %v1492_v60, %s3239_s20  ;;  %v2103_v5 = vpack.c.bf16 %v1281_v11, %v1281_v11 }
 0x2dd   : > { %v1145_v63 = vpop.permute.xlu0 %1144  ;;  %v1139_v7 = vpop.permute.xlu1 %1138  ;;  %v1366_v28 = vmul.f32 %v2857_v45, %v1285_v23  ;;  %v1498_v31 = vmul.f32 %v2855_v44, %v1285_v23  ;;  %v2105_v34 = vpack.c.bf16 %v1285_v23, %v1285_v23 }
 0x2de   : > { %1162 = vst.msk [vmem:[%s2868_s24 + $0x18] sm:$0xf] %vm985_vm3, %v1145_v63  ;;  %1159 = vst.msk [vmem:[%s2868_s24 + $0xc] sm:$0xf] %vm985_vm3, %v1139_v7 }
 0x2e0   : > { %1381 = vrot.lane.b32.xlu0 %v1362_v8, %s3239_s20  ;;  %1511 = vrot.lane.b32.xlu1 %v1493_v9, %s3239_s20 }
 0x2e1   : > { %v1143_v0 = vpop.permute.xlu1 %1142 }
 0x2e2   : > { %1161 = vst.msk [vmem:[%s2868_s24 + $0x14] sm:$0xf] %vm985_vm3, %v1143_v0 }
 0x2e4   : > { %1385 = vrot.lane.b32.xlu0 %v1364_v13, %s3239_s20  ;;  %1515 = vrot.lane.b32.xlu1 %v1495_v14, %s3239_s20 }
 0x2e8   : > { %1387 = vrot.lane.b32.xlu0 %v1365_v4, %s3239_s20  ;;  %1513 = vrot.lane.b32.xlu1 %v1494_v16, %s3239_s20 }
 0x2ec   : > { %1318 = vrot.lane.b32.xlu0 %v2098_v17, %s3239_s20  ;;  %1517 = vrot.lane.b32.xlu1 %v1496_v20, %s3239_s20 }
 0x2f0   : > { %1322 = vrot.lane.b32.xlu0 %v2100_v1, %s3239_s20  ;;  %1519 = vrot.lane.b32.xlu1 %v1497_v21, %s3239_s20 }
 0x2f4   : > { %1326 = vrot.lane.b32.xlu0 %v2102_v25, %s3239_s20  ;;  %1146 = vrot.lane.b32.xlu1 %v2097_v24, %s3239_s20 }
 0x2f8   : > { %1389 = vrot.lane.b32.xlu0 %v1366_v28, %s3239_s20  ;;  %1320 = vrot.lane.b32.xlu1 %v2099_v3, %s3239_s20 }
 0x2fc   : > { %1521 = vrot.lane.b32.xlu0 %v1498_v31, %s3239_s20  ;;  %1324 = vrot.lane.b32.xlu1 %v2101_v10, %s3239_s20 }
 0x300   : > { %1330 = vrot.lane.b32.xlu0 %v2104_v33, %s3239_s20  ;;  %1328 = vrot.lane.b32.xlu1 %v2103_v5, %s3239_s20 }
 0x304   : > { %1332 = vrot.lane.b32.xlu1 %v2105_v34, %s3239_s20  ;;  %s1670_s20 = sshll.u32 %s2705_s16, 4  ;;  %s2986_s20 = int_to_ptr.vmem [resolvable:$true] %s1670_s20 }
 0x305   : > { %s2236_s0 = scalar_lea.vmem %s2986_s20, 512  ;;  %p2243_p1 = scmp.lt.s32.totalorder %s2986_s20, %s2241_s1 }
 0x306   : > { %p2237_p12 = scmp.ne.s32.totalorder %s2986_s20, %s2236_s0  ;;  %p2244_p2 = scmp.lt.s32.totalorder %s2242_s2, %s2236_s0 }
 0x308   : > { %p2238_p13 = pnand %p2237_p12, %p2556_p4  ;;  %p2245_p3 = por %p2244_p2, %p2243_p1 }
 0x30a   : > { %p2239_p0 = pneg %p2238_p13 }
 0x30c   : > { %p2246_p5 = pnand %p2245_p3, %p2239_p0 }
 0x346   : > { %v1508_v18 = vpop.permute.xlu0 %1507  ;;  %v1376_v35 = vpop.permute.xlu1 %1375 }
 0x347   : > { %v1399_v26 = vsel %vm1245_vm5, %v1376_v35, 0.0  ;;  %v1531_v27 = vsel %vm1245_vm5, %v1508_v18, 0.0 }
 0x348   : > { %1400 = vadd.xlane.f32.xlu0 %v1399_v26 }
 0x34a   : > { %v1378_v19 = vpop.permute.xlu0 %1377  ;;  %v1380_v36 = vpop.permute.xlu1 %1379 }
 0x34b   : > { %v1402_v37 = vsel %vm1245_vm5, %v1378_v19, 0.0  ;;  %v1405_v40 = vsel %vm1245_vm5, %v1380_v36, 0.0 }
 0x34c   : > { %1403 = vadd.xlane.f32.xlu1 %v1402_v37  ;;  %1532 = vadd.xlane.f32.xlu0 %v1531_v27 }
 0x34e   : > { %v1384_v38 = vpop.permute.xlu0 %1383  ;;  %v1510_v29 = vpop.permute.xlu1 %1509 }
 0x34f   : > { %v1411_v39 = vsel %vm1245_vm5, %v1384_v38, 0.0  ;;  %v1534_v32 = vsel %vm1245_vm5, %v1510_v29, 0.0 }
 0x350   : > { %1412 = vadd.xlane.f32.xlu1 %v1411_v39  ;;  %1406 = vadd.xlane.f32.xlu0 %v1405_v40 }
 0x352   : > { %v1382_v30 = vpop.permute.xlu0 %1381  ;;  %v1512_v42 = vpop.permute.xlu1 %1511 }
 0x353   : > { %v1408_v41 = vsel %vm1245_vm5, %v1382_v30, 0.0  ;;  %v1537_v46 = vsel %vm1245_vm5, %v1512_v42, 0.0 }
 0x354   : > { %1409 = vadd.xlane.f32.xlu1 %v1408_v41  ;;  %1535 = vadd.xlane.f32.xlu0 %v1534_v32 }
 0x356   : > { %v1386_v43 = vpop.permute.xlu0 %1385  ;;  %v1516_v44 = vpop.permute.xlu1 %1515 }
 0x357   : > { %v1414_v45 = vsel %vm1245_vm5, %v1386_v43, 0.0  ;;  %v1543_v50 = vsel %vm1245_vm5, %v1516_v44, 0.0 }
 0x358   : > { %1415 = vadd.xlane.f32.xlu1 %v1414_v45  ;;  %1538 = vadd.xlane.f32.xlu0 %v1537_v46 }
 0x35a   : > { %v1388_v47 = vpop.permute.xlu0 %1387  ;;  %v1514_v48 = vpop.permute.xlu1 %1513 }
 0x35b   : > { %v1417_v49 = vsel %vm1245_vm5, %v1388_v47, 0.0  ;;  %v1540_v53 = vsel %vm1245_vm5, %v1514_v48, 0.0 }
 0x35c   : > { %1418 = vadd.xlane.f32.xlu1 %v1417_v49  ;;  %1544 = vadd.xlane.f32.xlu0 %v1543_v50 }
 0x35e   : > { %v1319_v51 = vpop.permute.xlu0 %1318  ;;  %v1518_v52 = vpop.permute.xlu1 %1517 }
 0x35f   : > { %1342 = vst.msk [vmem:[%s2944_s29] sm:$0xf] %vm985_vm3, %v1319_v51  ;;  %v1546_v56 = vsel %vm1245_vm5, %v1518_v52, 0.0 }
 0x360   : > { %1541 = vadd.xlane.f32.xlu0 %v1540_v53 }
 0x362   : > { %v1323_v54 = vpop.permute.xlu0 %1322  ;;  %v1520_v55 = vpop.permute.xlu1 %1519 }
 0x363   : > { %1344 = vst.msk [vmem:[%s2944_s29 + $0x8] sm:$0xf] %vm985_vm3, %v1323_v54  ;;  %v1549_v59 = vsel %vm1245_vm5, %v1520_v55, 0.0 }
 0x364   : > { %1547 = vadd.xlane.f32.xlu0 %v1546_v56 }
 0x366   : > { %v1327_v57 = vpop.permute.xlu0 %1326  ;;  %v1147_v58 = vpop.permute.xlu1 %1146 }
 0x367   : > { %1346 = vst.msk [vmem:[%s2944_s29 + $0x10] sm:$0xf] %vm985_vm3, %v1327_v57  ;;  %1163 = vst.msk [vmem:[%s2868_s24 + $0x1c] sm:$0xf] %vm985_vm3, %v1147_v58 }
 0x368   : > { %1550 = vadd.xlane.f32.xlu0 %v1549_v59 }
 0x36a   : > { %v1390_v60 = vpop.permute.xlu0 %1389  ;;  %v1321_v61 = vpop.permute.xlu1 %1320 }
 0x36b   : > { %1343 = vst.msk [vmem:[%s2944_s29 + $0x4] sm:$0xf] %vm985_vm3, %v1321_v61  ;;  %v1420_v62 = vsel %vm1245_vm5, %v1390_v60, 0.0 }
 0x36c   : > { %1421 = vadd.xlane.f32.xlu1 %v1420_v62 }
 0x36e   : > { %v1522_v63 = vpop.permute.xlu0 %1521  ;;  %v1325_v7 = vpop.permute.xlu1 %1324 }
 0x36f   : > { %1345 = vst.msk [vmem:[%s2944_s29 + $0xc] sm:$0xf] %vm985_vm3, %v1325_v7  ;;  %v1552_v8 = vsel %vm1245_vm5, %v1522_v63, 0.0 }
 0x370   : > { %1553 = vadd.xlane.f32.xlu1 %v1552_v8 }
 0x372   : > { %v1331_v9 = vpop.permute.xlu0 %1330  ;;  %v1329_v11 = vpop.permute.xlu1 %1328 }
 0x373   : > { %1348 = vst.msk [vmem:[%s2944_s29 + $0x18] sm:$0xf] %vm985_vm3, %v1331_v9  ;;  %1347 = vst.msk [vmem:[%s2944_s29 + $0x14] sm:$0xf] %vm985_vm3, %v1329_v11 }
 0x376   : > { %v1333_v12 = vpop.permute.xlu1 %1332 }
 0x377   : > { %1349 = vst.msk [vmem:[%s2944_s29 + $0x1c] sm:$0xf] %vm985_vm3, %v1333_v12 }
 0x378   : > { %2249 = shalt.err (!%p2246_p5)
}
 0x379   : > { %s2250_s16 = scalar_lea.hbm %s2983_s15, 512  ;;  %s2254_s14 = scalar_lea.hbm %s3227_s9, 1024 }
 0x37a   : > { %p2251_p6 = scmp.ne.s32.totalorder %s2983_s15, %s2250_s16  ;;  %p2255_p10 = scmp.lt.u32.totalorder %s2983_s15, %s3227_s9 }
 0x37b   : > { %p2256_p11 = scmp.lt.u32.totalorder %s2254_s14, %s2250_s16  ;;  %p2258_p13 = scmp.lt.u32.totalorder %s2250_s16, %s2983_s15 }
 0x37c   : > { %p2252_p7 = pnand %p2251_p6, %p2556_p4 }
 0x37d   : > { %p2257_p12 = por %p2256_p11, %p2255_p10 }
 0x37e   : > { %p2253_p9 = pneg %p2252_p7 }
 0x37f   : > { %p2259_p0 = por %p2258_p13, %p2257_p12 }
 0x381   : > { %p2260_p1 = pnand %p2259_p0, %p2253_p9 }
 0x383   : > { %2263 = shalt.err (!%p2260_p1)
}
 0x384   : > { %s2439_s0 = smov 4   ;;  %s3264_s2 = smov 64  }
 0x385   : > { %s3265_s3 = scalar_lea.sflag [#allocation5], %s2974_s21  ;;  %s3019_s22 = scalar_lea.hbm %s3229_s11, %s2977_s19 }
 0x386   : > { %2123 = dma.vmem_to_hbm [thread:$0]  (%p2556_p4), %s2986_s20, 512, %s2983_s15, %s3265_s3, %s3264_s2, %s3264_s2, %s2439_s0  }
 0x387   : > { %s1708_s23 = sshll.u32 %s2944_s29, 4  ;;  %s1620_s14 = scalar_lea.sflag [#allocation8], %s2974_s21  ;;  %s3022_s23 = int_to_ptr.vmem [resolvable:$true] %s1708_s23 }
 0x388   : > { %s2264_s1 = scalar_lea.vmem %s3022_s23, 512  ;;  %s2440_s5 = smov [#allocation7]  }
 0x389   : > { %p2265_p2 = scmp.ne.s32.totalorder %s3022_s23, %s2264_s1  ;;  %s2268_s6 = sshll.u32 %s2440_s5, 4  ;;  %s2269_s6 = int_to_ptr.vmem [resolvable:$false] %s2268_s6 }
 0x38a   : > { %s2270_s3 = scalar_lea.vmem %s2269_s6, 1024  ;;  %p2271_p6 = scmp.lt.s32.totalorder %s3022_s23, %s2269_s6 }
 0x38b   : > { %p2266_p3 = pnand %p2265_p2, %p2556_p4  ;;  %p2272_p7 = scmp.lt.s32.totalorder %s2270_s3, %s2264_s1 }
 0x38d   : > { %p2267_p5 = pneg %p2266_p3  ;;  %p2273_p9 = por %p2272_p7, %p2271_p6 }
 0x38f   : > { %p2274_p10 = pnand %p2273_p9, %p2267_p5 }
 0x391   : > { %2277 = shalt.err (!%p2274_p10)
}
 0x392   : > { %s2278_s20 = scalar_lea.hbm %s3019_s22, 512  ;;  %s2282_s5 = scalar_lea.hbm %s3229_s11, 1024 }
 0x393   : > { %p2279_p11 = scmp.ne.s32.totalorder %s3019_s22, %s2278_s20  ;;  %p2283_p0 = scmp.lt.u32.totalorder %s3019_s22, %s3229_s11 }
 0x394   : > { %p2284_p1 = scmp.lt.u32.totalorder %s2282_s5, %s2278_s20  ;;  %p2286_p3 = scmp.lt.u32.totalorder %s2278_s20, %s3019_s22 }
 0x395   : > { %p2280_p12 = pnand %p2279_p11, %p2556_p4 }
 0x396   : > { %p2285_p2 = por %p2284_p1, %p2283_p0 }
 0x397   : > { %p2281_p13 = pneg %p2280_p12 }
 0x398   : > { %p2287_p5 = por %p2286_p3, %p2285_p2 }
 0x39a   : > { %p2288_p6 = pnand %p2287_p5, %p2281_p13 }
 0x39c   : > { %2291 = shalt.err (!%p2288_p6)
}
 0x39d   : > { %2125 = dma.vmem_to_hbm [thread:$0]  (%p2556_p4), %s3022_s23, 512, %s3019_s22, %s1620_s14, %s3264_s2, %s3264_s2, %s2439_s0  }
 0x39e   : > { %s3055_s3 = scalar_lea.hbm %s3226_s8, %s2977_s19  ;;  %s1651_s20 = sshll.u32 %s2628_s27, 4  ;;  %s3058_s20 = int_to_ptr.vmem [resolvable:$true] %s1651_s20 }
 0x39f   : > { %s3064_s5 = scalar_lea.hbm %s3228_s10, %s2977_s19  ;;  %s1605_s24 = scalar_lea.sflag [#allocation3], %s2611_s25 }
 0x3a0   : > { %s2292_s6 = scalar_lea.vmem %s3058_s20, 512  ;;  %s2441_s22 = smov [#allocation2]  }
 0x3a1   : > { %p2293_p7 = scmp.ne.s32.totalorder %s3058_s20, %s2292_s6  ;;  %s2296_s23 = sshll.u32 %s2441_s22, 4  ;;  %s2297_s23 = int_to_ptr.vmem [resolvable:$false] %s2296_s23 }
 0x3a2   : > { %s2298_s27 = scalar_lea.vmem %s2297_s23, 1024  ;;  %p2299_p11 = scmp.lt.s32.totalorder %s3058_s20, %s2297_s23 }
 0x3a3   : > { %p2294_p9 = pnand %p2293_p7, %p2556_p4  ;;  %p2300_p12 = scmp.lt.s32.totalorder %s2298_s27, %s2292_s6 }
 0x3a5   : > { %p2295_p10 = pneg %p2294_p9  ;;  %p2301_p13 = por %p2300_p12, %p2299_p11 }
 0x3a7   : > { %p2302_p0 = pnand %p2301_p13, %p2295_p10 }
 0x3a9   : > { %2305 = shalt.err (!%p2302_p0)
}
 0x3aa   : > { %s2306_s19 = scalar_lea.hbm %s3055_s3, 512  ;;  %s2310_s29 = scalar_lea.hbm %s3226_s8, 1024 }
 0x3ab   : > { %p2307_p1 = scmp.ne.s32.totalorder %s3055_s3, %s2306_s19  ;;  %p2311_p5 = scmp.lt.u32.totalorder %s3055_s3, %s3226_s8 }
 0x3ac   : > { %p2312_p6 = scmp.lt.u32.totalorder %s2310_s29, %s2306_s19  ;;  %p2314_p9 = scmp.lt.u32.totalorder %s2306_s19, %s3055_s3 }
 0x3ad   : > { %p2308_p2 = pnand %p2307_p1, %p2556_p4 }
 0x3ae   : > { %p2313_p7 = por %p2312_p6, %p2311_p5 }
 0x3af   : > { %p2309_p3 = pneg %p2308_p2 }
 0x3b0   : > { %p2315_p10 = por %p2314_p9, %p2313_p7 }
 0x3b2   : > { %p2316_p11 = pnand %p2315_p10, %p2309_p3 }
 0x3b4   : > { %2319 = shalt.err (!%p2316_p11)
}
 0x3b5   : > { %2122 = dma.vmem_to_hbm [thread:$0]  (%p2556_p4), %s3058_s20, 512, %s3055_s3, %s1605_s24, %s3264_s2, %s3264_s2, %s2439_s0  }
 0x3b6   : > { %s2320_s6 = scalar_lea.vmem %s2970_s4, 512  ;;  %s2442_s23 = smov [#allocation6]  }
 0x3b7   : > { %p2321_p12 = scmp.ne.s32.totalorder %s2970_s4, %s2320_s6  ;;  %s2324_s27 = sshll.u32 %s2442_s23, 4  ;;  %s2325_s27 = int_to_ptr.vmem [resolvable:$false] %s2324_s27 }
 0x3b8   : > { %s2326_s19 = scalar_lea.vmem %s2325_s27, 1024  ;;  %p2327_p1 = scmp.lt.s32.totalorder %s2970_s4, %s2325_s27 }
 0x3b9   : > { %p2322_p13 = pnand %p2321_p12, %p2556_p4  ;;  %p2328_p2 = scmp.lt.s32.totalorder %s2326_s19, %s2320_s6 }
 0x3bb   : > { %p2323_p0 = pneg %p2322_p13  ;;  %p2329_p3 = por %p2328_p2, %p2327_p1 }
 0x3bd   : > { %p2330_p5 = pnand %p2329_p3, %p2323_p0 }
 0x3bf   : > { %2333 = shalt.err (!%p2330_p5)
}
 0x3c0   : > { %s2334_s3 = scalar_lea.hbm %s3064_s5, 512  ;;  %s2338_s16 = scalar_lea.hbm %s3228_s10, 1024 }
 0x3c1   : > { %p2335_p6 = scmp.ne.s32.totalorder %s3064_s5, %s2334_s3  ;;  %p2339_p10 = scmp.lt.u32.totalorder %s3064_s5, %s3228_s10 }
 0x3c2   : > { %p2340_p11 = scmp.lt.u32.totalorder %s2338_s16, %s2334_s3  ;;  %p2342_p13 = scmp.lt.u32.totalorder %s2334_s3, %s3064_s5 }
 0x3c3   : > { %p2336_p7 = pnand %p2335_p6, %p2556_p4 }
 0x3c4   : > { %p2341_p12 = por %p2340_p11, %p2339_p10 }
 0x3c5   : > { %p2337_p9 = pneg %p2336_p7 }
 0x3c6   : > { %p2343_p0 = por %p2342_p13, %p2341_p12 }
 0x3c8   : > { %p2344_p1 = pnand %p2343_p0, %p2337_p9 }
 0x3ca   : > { %2347 = shalt.err (!%p2344_p1)
}
 0x3cb   : > { %s3266_s15 = scalar_lea.sflag [#allocation5], %s2974_s21  ;;  %v1432_v21 = vand.u32 127, %v659_v2  ;;  %vm1465_vm6 = vcmask 1041409   ;;  %vm1467_vm7 = vcmask 1042434   ;;  %vm1469_vm8 = vcmask 1043459   ;;  %s2443_s3 = smov [#allocation9]  }
 0x3cc   : > { %2124 = dma.vmem_to_hbm [thread:$0]  (%p2556_p4), %s2970_s4, 512, %s3064_s5, %s3266_s15, %s3264_s2, %s3264_s2, %s2439_s0   ;;  %vm1471_vm9 = vcmask 1044484   ;;  %vm1473_vm10 = vcmask 1045509   ;;  %vm1475_vm11 = vcmask 1046534   ;;  %vm1477_vm12 = vcmask 1047559  }
 0x3cd   : > { %v3121_v25 = vsub.s32 %v1432_v21, %v2584_v6  ;;  %s2043_s4 = sshll.u32 %s2611_s25, 3  ;;  %s2087_s25 = sshll.u32 %s2426_s28, 7  ;;  %vm1480_vm13 = vcmask 64512  }
 0x3ce   : > { %s591_s0 = scalar_lea.vmem [#allocation9], %s2043_s4  ;;  %s2048_s5 = sshll.u32 %s2581_s17, 3 }
 0x3cf   : > { %s1726_s2 = sshll.u32 %s591_s0, 4  ;;  %s3153_s6 = scalar_lea.hbm %s3230_s12, %s2087_s25  ;;  %s3155_s2 = int_to_ptr.vmem [resolvable:$true] %s1726_s2 }
 0x3d0   : > { %s3162_s27 = scalar_lea.vmem %s3231_s13, %s2048_s5  ;;  %s2348_s19 = scalar_lea.vmem %s3155_s2, 128 }
 0x3d1   : > { %p2349_p2 = scmp.ne.s32.totalorder %s3155_s2, %s2348_s19  ;;  %s2352_s20 = sshll.u32 %s2443_s3, 4  ;;  %s2353_s20 = int_to_ptr.vmem [resolvable:$false] %s2352_s20 }
 0x3d2   : > { %s2354_s24 = scalar_lea.vmem %s2353_s20, 256  ;;  %p2355_p6 = scmp.lt.s32.totalorder %s3155_s2, %s2353_s20 }
 0x3d3   : > { %p2350_p3 = pnand %p2349_p2, %p2556_p4  ;;  %p2356_p7 = scmp.lt.s32.totalorder %s2354_s24, %s2348_s19 }
 0x3d5   : > { %v1401_v0 = vpop.xlane.xlu0 %1400  ;;  %p2351_p5 = pneg %p2350_p3  ;;  %p2357_p9 = por %p2356_p7, %p2355_p6 }
 0x3d6   : > { %v1436_v3 = vrot.slane %v1401_v0, %v3121_v25 }
 0x3d7   : > { %p2358_p10 = pnand %p2357_p9, %p2351_p5 }
 0x3d9   : > { %v1533_v13 = vpop.xlane.xlu0 %1532  ;;  %v1404_v14 = vpop.xlane.xlu1 %1403 }
 0x3da   : > { %v1440_v23 = vrot.slane %v1404_v14, %v3121_v25  ;;  %v1566_v18 = vrot.slane %v1533_v13, %v3121_v25 }
 0x3dc   : > { %v1466_v33 = vsel %vm1465_vm6, %v1440_v23, %v1436_v3 }
 0x3dd   : > { %v1407_v15 = vpop.xlane.xlu0 %1406  ;;  %v1413_v16 = vpop.xlane.xlu1 %1412 }
 0x3de   : > { %v1444_v28 = vrot.slane %v1407_v15, %v3121_v25  ;;  %v1452_v36 = vrot.slane %v1413_v16, %v3121_v25 }
 0x3e0   : > { %v1468_v5 = vsel %vm1467_vm7, %v1444_v28, %v1466_v33 }
 0x3e1   : > { %v1536_v4 = vpop.xlane.xlu0 %1535  ;;  %v1410_v20 = vpop.xlane.xlu1 %1409 }
 0x3e2   : > { %v1448_v31 = vrot.slane %v1410_v20, %v3121_v25  ;;  %v1570_v2 = vrot.slane %v1536_v4, %v3121_v25 }
 0x3e4   : > { %v1470_v35 = vsel %vm1469_vm8, %v1448_v31, %v1468_v5  ;;  %v1595_v27 = vsel %vm1465_vm6, %v1570_v2, %v1566_v18 }
 0x3e5   : > { %v1539_v17 = vpop.xlane.xlu0 %1538  ;;  %v1416_v24 = vpop.xlane.xlu1 %1415  ;;  %v1472_v39 = vsel %vm1471_vm9, %v1452_v36, %v1470_v35 }
 0x3e6   : > { %v1574_v34 = vrot.slane %v1539_v17, %v3121_v25  ;;  %v1456_v26 = vrot.slane %v1416_v24, %v3121_v25 }
 0x3e8   : > { %v1596_v29 = vsel %vm1467_vm7, %v1574_v34, %v1595_v27  ;;  %v1474_v30 = vsel %vm1473_vm10, %v1456_v26, %v1472_v39 }
 0x3e9   : > { %v1545_v1 = vpop.xlane.xlu0 %1544  ;;  %v1419_v6 = vpop.xlane.xlu1 %1418 }
 0x3ea   : > { %v1460_v37 = vrot.slane %v1419_v6, %v3121_v25  ;;  %v1582_v43 = vrot.slane %v1545_v1, %v3121_v25 }
 0x3ec   : > { %v1476_v44 = vsel %vm1475_vm11, %v1460_v37, %v1474_v30 }
 0x3ed   : > { %v1542_v22 = vpop.xlane.xlu0 %1541 }
 0x3ee   : > { %v1578_v19 = vrot.slane %v1542_v22, %v3121_v25 }
 0x3f0   : > { %v1597_v42 = vsel %vm1469_vm8, %v1578_v19, %v1596_v29 }
 0x3f1   : > { %v1548_v10 = vpop.xlane.xlu0 %1547  ;;  %v1598_v47 = vsel %vm1471_vm9, %v1582_v43, %v1597_v42 }
 0x3f2   : > { %v1586_v41 = vrot.slane %v1548_v10, %v3121_v25 }
 0x3f4   : > { %v1599_v49 = vsel %vm1473_vm10, %v1586_v41, %v1598_v47 }
 0x3f5   : > { %v1551_v38 = vpop.xlane.xlu0 %1550 }
 0x3f6   : > { %v1590_v45 = vrot.slane %v1551_v38, %v3121_v25 }
 0x3f9   : > { %v1422_v40 = vpop.xlane.xlu1 %1421 }
 0x3fa   : > { %v1464_v32 = vrot.slane %v1422_v40, %v3121_v25 }
 0x3fc   : > { %v1478_v46 = vsel %vm1477_vm12, %v1464_v32, %v1476_v44 }
 0x3fd   : > { %v1554_v48 = vpop.xlane.xlu1 %1553  ;;  %1481 = vst.msk [vmem:[%s591_s0] sm:$0xff] %vm1480_vm13, %v1478_v46 }
 0x3fe   : > { %v1594_v50 = vrot.slane %v1554_v48, %v3121_v25 }
 0x3ff   : > { %2361 = shalt.err (!%p2358_p10)
}
 0x400   : > { %s2362_s16 = scalar_lea.hbm %s3153_s6, 128  ;;  %s2366_s15 = scalar_lea.hbm %s3230_s12, 256 }
 0x401   : > { %p2363_p11 = scmp.ne.s32.totalorder %s3153_s6, %s2362_s16  ;;  %p2367_p0 = scmp.lt.u32.totalorder %s3153_s6, %s3230_s12 }
 0x402   : > { %p2368_p1 = scmp.lt.u32.totalorder %s2366_s15, %s2362_s16  ;;  %p2370_p3 = scmp.lt.u32.totalorder %s2362_s16, %s3153_s6 }
 0x403   : > { %p2364_p12 = pnand %p2363_p11, %p2556_p4 }
 0x404   : > { %p2369_p2 = por %p2368_p1, %p2367_p0 }
 0x405   : > { %p2365_p13 = pneg %p2364_p12 }
 0x406   : > { %p2371_p5 = por %p2370_p3, %p2369_p2 }
 0x408   : > { %p2372_p6 = pnand %p2371_p5, %p2365_p13 }
 0x40a   : > { %2375 = shalt.err (!%p2372_p6)
}
 0x40b   : > { %2126 = dma.vmem_to_hbm [thread:$0]  (%p2556_p4), %s3155_s2, 128, %s3153_s6, %s1620_s14   ;;  %v1600_v51 = vsel %vm1475_vm11, %v1590_v45, %v1599_v49 }
 0x40c   : > { %v1601_v52 = vsel %vm1477_vm12, %v1594_v50, %v1600_v51 }
 0x40d   : > { %1603 = vst.msk [vmem:[%s3162_s27] sm:$0xff] %vm1480_vm13, %v1601_v52 }
 0x40e PF: > { %s3267_s0 = sld [smem:[#allocation13_spill]]  ;;  %p2148_p7 = scmp.ge.s32.totalorder %s2434_s30, 2 }
 0x410   : > { %p2133_p9 = pnand %p2148_p7, %p2565_p8 }
 0x414   : > { %s1741_s28 = sand.u32 1, %s3267_s0  }
 0x415   : > { %s1742_s18 = scalar_lea.sflag [#allocation3], %s1741_s28 }
 0x416   : > { %2401 = dma.done.wait (!%p2133_p9), %s1742_s18, 512  }
 0x417   : > { %2403 = vsyncadd (!%p2133_p9), %s1742_s18, 4294966784  ;;  %s3269_s21 = sadd.s32 4294967294, %s2434_s30  }
 0x418   : > { %s1750_s14 = sand.u32 1, %s3269_s21  }
 0x419   : > { %s1751_s2 = scalar_lea.sflag [#allocation5], %s1750_s14 }
 0x41a   : > { %2405 = dma.done.wait (!%p2133_p9), %s1751_s2, 1024  }
 0x41b   : > { %2407 = vsyncadd (!%p2133_p9), %s1751_s2, 4294966272  ;;  %s1769_s22 = scalar_lea.sflag [#allocation8], %s1750_s14 }
 0x41c   : > { %2409 = dma.done.wait (!%p2133_p9), %s1769_s22, 640  }
 0x41d   : > { %2411 = vsyncadd (!%p2133_p9), %s1769_s22, 4294966656  ;;  %s33_s30 = sadd.s32 1, %s2434_s30   ;;  %s3270_s6 = sld [smem:[#allocation14_spill]] }
 0x41e   : > { %p30_p4 = scmp.ge.s32.totalorder %s33_s30, 4   ;;  %s3271_s27 = sld [smem:[#allocation18_spill]] }
 0x41f   : > { %s3272_s28 = sld [smem:[#allocation15_spill]]  ;;  %s3273_s29 = sld [smem:[#allocation16_spill]] }
 0x420   : > { %s3274_s25 = smov %s2418_s26  ;;  %32 = sbr.rel (!%p30_p4) target bundleno = 16 (0x10), region = 175 }
 0x423   : > { %s3275_s26 = smov %s3270_s6 }
 0x427   :  { %1796 = vsyncpa [#allocation3], 1 }
 0x428   :  { %1798 = vsyncpa [#allocation3 + $0x1], 1 }
 0x429   :  { %1799 = vsyncpa [#allocation5], 1 }
 0x42a   :  { %1801 = vsyncpa [#allocation5 + $0x1], 1 }
 0x42b   :  { %1802 = vsyncpa [#allocation8], 1 }
 0x42c   :  { %1804 = vsyncpa [#allocation8 + $0x1], 1 }

// kernel: mul.64
= control target key start
LH: loop header
LB: loop body
LE: loop exit
PB: predicated region body
PF: predicated region fallthrough
CT: control target
= control target key end

     0   :  { %s66_s0 = inlined_call_operand.<no memory space> [shape: f32[], index: 0, kind: input, shape index: {}]   ;;  %s67_s1 = inlined_call_operand.hbm [shape: f32[2], index: 1, kind: output, shape index: {}]  }
   0x1   :  { %v2_v0 = vstv %s66_s0 }
   0x2   :  { %3 = vsyncpa [#allocation1], 0  ;;  %4 = vst [vmem:[#allocation0] sm:$0x1] %v2_v0  ;;  %s40_s0 = smov [#allocation0]  }
   0x3   :  { %s9_s8 = sshll.u32 %s40_s0, 4  ;;  %s10_s8 = int_to_ptr.vmem [resolvable:$true] %s9_s8 }
   0x4   :  { %s16_s9 = scalar_lea.vmem %s10_s8, 16  ;;  %s20_s10 = scalar_lea.vmem %s10_s8, 32 }
   0x5   :  { %p17_p0 = scmp.ne.s32.totalorder %s10_s8, %s16_s9  ;;  %p21_p1 = scmp.lt.s32.totalorder %s10_s8, %s10_s8 }
   0x6   :  { %p22_p2 = scmp.lt.s32.totalorder %s20_s10, %s16_s9 }
   0x8   :  { %p23_p3 = por %p22_p2, %p21_p1 }
   0xa   :  { %p24_p4 = pnand %p23_p3, %p17_p0 }
   0xc   :  { %27 = shalt.err (!%p24_p4)
}
   0xd   :  { %s28_s13 = scalar_lea.hbm %s67_s1, 16 }
   0xe   :  { %p29_p5 = scmp.ne.s32.totalorder %s67_s1, %s28_s13  ;;  %p32_p6 = scmp.lt.u32.totalorder %s28_s13, %s67_s1 }
  0x10   :  { %p34_p7 = pnand %p32_p6, %p29_p5 }
  0x12   :  { %37 = shalt.err (!%p34_p7)
}
  0x13   :  { %12 = dma.vmem_to_hbm [thread:$0]  %s10_s8, 16, %s67_s1, [#allocation1]  }
  0x14   :  { %38 = dma.done.wait [#allocation1], 16  }
  0x15   :  { %39 = vsyncadd [#allocation1], 4294967280 }
  0x16   :  { %14 = vsyncpa [#allocation1], 1 }

// kernel: esmfold_forward.10
= control target key start
LH: loop header
LB: loop body
LE: loop exit
PB: predicated region body
PF: predicated region fallthrough
CT: control target
= control target key end

     0   :  { %s378_s12 = smov 0   ;;  %s404_s0 = inlined_call_operand.vmem [shape: bf16[32,32], index: 0, kind: input, shape index: {}]   ;;  %s405_s1 = inlined_call_operand.vmem [shape: bf16[32,128], index: 1, kind: input, shape index: {}]   ;;  %s406_s2 = inlined_call_operand.vmem [shape: f32[1,128], index: 2, kind: input, shape index: {}]   ;;  %s407_s3 = inlined_call_operand.vmem [shape: f32[32,128], index: 3, kind: output, shape index: {}]  }
   0x1 LB: > { %s308_s13 = sadd.s32 4294967295, %s354_s12   ;;  %p312_p0 = scmp.ge.s32.totalorder %s354_s12, 1  ;;  %s354_s12 = sphi %s378_s12, %s13_s12  }
   0x2   : > { %p138_p1 = scmp.lt.s32.totalorder %s354_s12, 3 }
   0x4   : > { %p139_p2 = pnand %p312_p0, %p138_p1 }
   0x5   : > { %v345_v0 = vld [vmem:[%s405_s1] sm:$0xff] (!%p139_p2)   ;;  %v356_v1 = vmov (!%p139_p2), 0.0   ;;  %v346_v2 = vld [vmem:[%s405_s1 + $0x8] sm:$0xff] (!%p139_p2)   ;;  %vm357_vm0 = vmmov (!%p139_p2), 0   ;;  %s313_s18 = sshll.u32 (!%p139_p2), %s308_s13, 1  ;;  %vm205_vm1 = vcmask (!%p139_p2), 261120  }
   0x6   : > { %142 = sbr.rel (%p139_p2) target bundleno = 234 (0xea), region = 32  ;;  %327 = vmatprep.subr.bf16.mxu0 (!%p139_p2), %v356_v1  ;;  %331 = vmatprep.mubr.msk.bf16.mxu0 (!%p139_p2), %vm357_vm0, %v356_v1  ;;  %p163_p3 = scmp.lt.s32.totalorder (!%p139_p2), %s313_s18, 3  ;;  %v317_v4 = vld [vmem:[%s406_s2] ss:$0 sm:$0xff] (!%p139_p2) }
   0x7   : > { %328 = vmatpush3.bf16.msra.mxu0 (!%p139_p2), %v345_v0 }
   0x8   : > { %329 = vmatprep.subr.bf16.mxu0 (!%p139_p2), %v356_v1 }
   0xb   : > { %330 = vmatpush3.bf16.msra.mxu0 (!%p139_p2), %v346_v2 }
   0xd   : > { %s409_s18 = smov (!%p163_p3, %s313_s18), 3 }
   0xe   : > { %s314_s19 = sshll.u32 %s409_s18, 2  ;;  %s316_s23 = sshll.u32 %s409_s18, 3 }
   0xf   : > { %s166_s22 = scalar_lea.vmem %s404_s0, %s314_s19  ;;  %s172_s28 = scalar_lea.vmem %s407_s3, %s316_s23 }
  0x10   : > { %v347_v3 = vld [vmem:[%s166_s22] sm:$0xff]  }
  0x11   : > { %332 = vmatmul.mubr.msk.bf16.vlgmr.msra.gmra.mrb[0].mxu0 %vm205_vm1, %v347_v3 }
  0xe4   : > { %v243_v5 = vpop.f32.mrb[0].mxu0 }
  0xe5   : > { %v244_v6 = vadd.f32 %v317_v4, %v243_v5  ;;  %v333_v7 = vpop.f32.mrb[1].mxu0 }
  0xe6   : > { %v246_v8 = vpop.f32.mrb[2].mxu0 }
  0xe7   : > { %250 = vst [vmem:[%s172_s28] sm:$0xff] %v244_v6  ;;  %v247_v9 = vadd.f32 %v317_v4, %v246_v8  ;;  %v334_v10 = vpop.f32.mrb[3].mxu0 }
  0xe9   : > { %251 = vst [vmem:[%s172_s28 + $0x8] sm:$0xff] %v247_v9 }
  0xea PF: > { %s13_s12 = sadd.s32 1, %s354_s12  }
  0xeb   : > { %p10_p4 = scmp.ge.s32.totalorder %s13_s12, 4  }
  0xed   :  { %12 = sbr.rel (!%p10_p4) target bundleno = 1 (0x1), region = 62 }

// kernel: esmfold_forward.13
= control target key start
LH: loop header
LB: loop body
LE: loop exit
PB: predicated region body
PF: predicated region fallthrough
CT: control target
= control target key end

     0   :  { %s4288_s17 = smov 0   ;;  %s5517_s0 = inlined_call_operand.vmem [shape: bf16[32,32], index: 0, kind: input, shape index: {}]   ;;  %s5518_s1 = inlined_call_operand.vmem [shape: f32[1,32], index: 1, kind: input, shape index: {}]   ;;  %s5519_s2 = inlined_call_operand.vmem [shape: f32[1,32], index: 2, kind: input, shape index: {}, may-alias: {2,4,6}]   ;;  %s5520_s3 = inlined_call_operand.vmem [shape: bf16[32,32], index: 3, kind: input, shape index: {}]   ;;  %s5521_s4 = inlined_call_operand.vmem [shape: f32[1,32], index: 4, kind: input, shape index: {}, may-alias: {2,4,6}]   ;;  %s5522_s5 = inlined_call_operand.vmem [shape: bf16[32,32], index: 5, kind: input, shape index: {}]   ;;  %s5523_s6 = inlined_call_operand.vmem [shape: f32[1,32], index: 6, kind: input, shape index: {}, may-alias: {2,4,6}]   ;;  %s5524_s7 = inlined_call_operand.vmem [shape: bf16[32,1920], index: 7, kind: input, shape index: {}]   ;;  %s5525_s8 = inlined_call_operand.vmem [shape: f32[1,1920], index: 8, kind: input, shape index: {}]   ;;  %s5526_s9 = inlined_call_operand.vmem [shape: bf16[1920,256], index: 9, kind: input, shape index: {}]   ;;  %s5527_s10 = inlined_call_operand.vmem [shape: bf16[32,1920], index: 10, kind: output, shape index: {0}]   ;;  %s5528_s11 = inlined_call_operand.vmem [shape: f32[32,128], index: 11, kind: output, shape index: {1}]  }
   0x1 LB: > { %s3331_s18 = sadd.s32 4294967295, %s4223_s17   ;;  %p3335_p0 = scmp.ge.s32.totalorder %s4223_s17, 1  ;;  %s4223_s17 = sphi %s4288_s17, %s22_s17  }
   0x2   : > { %p341_p1 = scmp.lt.s32.totalorder %s4223_s17, 3 }
   0x4   : > { %p342_p2 = pnand %p3335_p0, %p341_p1 }
   0x5   : > { %s3336_s19 = sshll.u32 (!%p342_p2), %s3331_s18, 1  ;;  %vm411_vm0 = vcmask (!%p342_p2), 261120   ;;  %v3741_v15 = vld [vmem:[%s5520_s3] sm:$0xff] (!%p342_p2)   ;;  %v4225_v16 = vmov (!%p342_p2), 0.0   ;;  %v3742_v17 = vld [vmem:[%s5520_s3 + $0x8] sm:$0xff] (!%p342_p2)   ;;  %vm4226_vm1 = vmmov (!%p342_p2), 0  }
   0x6   : > { %345 = sbr.rel (%p342_p2) target bundleno = 1614 (0x64e), region = 60  ;;  %p388_p3 = scmp.lt.s32.totalorder (!%p342_p2), %s3336_s19, 3  ;;  %3677 = vmatprep.subr.bf16.mxu0 (!%p342_p2), %v4225_v16  ;;  %3681 = vmatprep.mubr.msk.bf16.mxu0 (!%p342_p2), %vm4226_vm1, %v4225_v16  ;;  %v3342_v26 = vld [vmem:[%s5518_s1] ss:$0 sm:$0xff] (!%p342_p2)  ;;  %v3744_v36 = vld [vmem:[%s5522_s5 + $0x8] sm:$0xff] (!%p342_p2)   ;;  %v4227_v54 = vmov (!%p342_p2), 0  }
   0x7   : > { %3678 = vmatpush3.bf16.msra.mxu0 (!%p342_p2), %v3741_v15  ;;  %v3343_v30 = vld [vmem:[%s5519_s2] ss:$0 sm:$0xff] (!%p342_p2)  ;;  %v3748_v38 = vld [vmem:[%s5524_s7 + $0x1c] ss:$60 sps:$4 sm:$0xff] (!%p342_p2)   ;;  %v3754_v50 = vld [vmem:[%s5524_s7 + $0x94] ss:$60 sps:$4 sm:$0xff] (!%p342_p2)   ;;  %1021 = vmatprep.mubr.bf16.mxu1 (!%p342_p2), %v4227_v54 }
   0x8   : > { %3679 = vmatprep.subr.bf16.mxu0 (!%p342_p2), %v4225_v16  ;;  %v3743_v34 = vld [vmem:[%s5522_s5] sm:$0xff] (!%p342_p2)   ;;  %989 = vmatprep.subr.bf16.mxu1 (!%p342_p2), %v3748_v38  ;;  %v3750_v48 = vld [vmem:[%s5524_s7 + $0x18] ss:$60 sps:$4 sm:$0xff] (!%p342_p2)   ;;  %v3756_v52 = vld [vmem:[%s5524_s7 + $0x90] ss:$60 sps:$4 sm:$0xff] (!%p342_p2)  }
   0x9   : > { %v3747_v37 = vld [vmem:[%s5524_s7 + $0x4] ss:$60 sps:$4 sm:$0xff] (!%p342_p2)   ;;  %990 = vmatpush1.bf16.msra.mxu1 (!%p342_p2), %v3750_v48  ;;  %v3753_v49 = vld [vmem:[%s5524_s7 + $0x7c] ss:$60 sps:$4 sm:$0xff] (!%p342_p2)   ;;  %v3759_v53 = vld [vmem:[%s5524_s7 + $0xc] ss:$60 sps:$4 sm:$0xff] (!%p342_p2)  }
   0xa   : > { %v3344_v39 = vld [vmem:[%s5521_s4] ss:$0 sm:$0xff] (!%p342_p2)  ;;  %v3751_v51 = vld [vmem:[%s5524_s7 + $0x78] ss:$60 sps:$4 sm:$0xff] (!%p342_p2)   ;;  %991 = vmatprep.subr.bf16.mxu1 (!%p342_p2), %v3754_v50  ;;  %v3762_v55 = vld [vmem:[%s5524_s7 + $0x2c] ss:$60 sps:$4 sm:$0xff] (!%p342_p2)  }
   0xb   : > { %3680 = vmatpush3.bf16.msra.mxu0 (!%p342_p2), %v3742_v17  ;;  %v3745_v46 = vld [vmem:[%s5524_s7] ss:$60 sps:$4 sm:$0xff] (!%p342_p2)   ;;  %v3757_v63 = vld [vmem:[%s5524_s7 + $0x8] ss:$60 sps:$4 sm:$0xff] (!%p342_p2)   ;;  %v3780_v15 = vld [vmem:[%s5524_s7 + $0x98] ss:$60 sps:$4 sm:$0xff] (!%p342_p2)  }
   0xc   : > { %3685 = vmatprep.subr.bf16.mxu0 (!%p342_p2), %v4225_v16  ;;  %v3348_v56 = vld [vmem:[%s5523_s6] ss:$0 sm:$0xff] (!%p342_p2)  ;;  %v3783_v17 = vld [vmem:[%s5524_s7 + $0x30] ss:$60 sps:$4 sm:$0xff] (!%p342_p2)   ;;  %v3833_v48 = vld [vmem:[%s5526_s9 + $0x74] ss:$8 sps:$4 sm:$0xff] (!%p342_p2)  }
   0xd   : > { %s5530_s19 = smov (!%p388_p3, %s3336_s19), 3  ;;  %992 = vmatpush1.bf16.msra.mxu1 %v3756_v52  ;;  %v3813_v38 = vld [vmem:[%s5526_s9 + $0x40] ss:$8 sps:$4 sm:$0xff]   ;;  %v3831_v50 = vld [vmem:[%s5526_s9 + $0x70] ss:$8 sps:$4 sm:$0xff]  }
   0xe   : > { %s3337_s20 = sshll.u32 %s5530_s19, 2  ;;  %1075 = vmatprep.subr.bf16.mxu1 %v3762_v55  ;;  %v3839_v52 = vld [vmem:[%s5526_s9 + $0x84] ss:$8 sps:$4 sm:$0xff]   ;;  %v3837_v55 = vld [vmem:[%s5526_s9 + $0x80] ss:$8 sps:$4 sm:$0xff]   ;;  %s3729_s28 = smul.u32 60, %s5530_s19 }
   0xf   : > { %s391_s23 = scalar_lea.vmem %s5517_s0, %s3337_s20  ;;  %s3341_s27 = sshll.u32 %s5530_s19, 3 }
  0x10   : > { %v3665_v0 = vld [vmem:[%s391_s23] sm:$0xff]   ;;  %s4631_s14 = scalar_lea.vmem %s5527_s10, %s3729_s28  ;;  %s404_s30 = scalar_lea.vmem %s5528_s11, %s3341_s27 }
  0x11   : > { %v3666_v1 = vunpack.c.l.bf16 %v3665_v0  ;;  %v3667_v2 = vunpack.c.h.bf16 %v3665_v0  ;;  %v3760_v0 = vld [vmem:[%s5524_s7 + $0x28] ss:$60 sps:$4 sm:$0xff]  }
  0x13   : > { %v412_v3 = vsel %vm411_vm0, %v3666_v1, 0.0  ;;  %v415_v4 = vsel %vm411_vm0, %v3667_v2, 0.0 }
  0x14   : > { %413 = vadd.xlane.f32.xlu0 %v412_v3  ;;  %v3768_v3 = vld [vmem:[%s5524_s7 + $0xa4] ss:$60 sps:$4 sm:$0xff]  }
  0x18   : > { %416 = vadd.xlane.f32.xlu0 %v415_v4  ;;  %v3763_v4 = vld [vmem:[%s5524_s7 + $0x80] ss:$60 sps:$4 sm:$0xff]  }
  0xa1   : > { %v414_v5 = vpop.xlane.xlu0 %413 }
  0xa2   : > { %v419_v6 = vmul.f32 0.03125, %v414_v5  ;;  %v3766_v5 = vld [vmem:[%s5524_s7 + $0xa0] ss:$60 sps:$4 sm:$0xff]  }
  0xa4   : > { %v421_v7 = vsub.f32 %v3666_v1, %v419_v6  ;;  %v3771_v6 = vld [vmem:[%s5524_s7 + $0x14] ss:$60 sps:$4 sm:$0xff]  }
  0xa5   : > { %v417_v8 = vpop.xlane.xlu0 %416 }
  0xa6   : > { %v420_v9 = vmul.f32 0.03125, %v417_v8  ;;  %v423_v10 = vmul.f32 %v421_v7, %v421_v7  ;;  %v3772_v8 = vld [vmem:[%s5524_s7 + $0x38] ss:$60 sps:$4 sm:$0xff]  }
  0xa8   : > { %v422_v11 = vsub.f32 %v3667_v2, %v420_v9  ;;  %v425_v12 = vsel %vm411_vm0, %v423_v10, 0.0  ;;  %v3765_v2 = vld [vmem:[%s5524_s7 + $0x84] ss:$60 sps:$4 sm:$0xff]   ;;  %v3775_v9 = vld [vmem:[%s5524_s7 + $0x8c] ss:$60 sps:$4 sm:$0xff]  }
  0xa9   : > { %426 = vadd.xlane.f32.xlu1 %v425_v12  ;;  %v3773_v10 = vld [vmem:[%s5524_s7 + $0x88] ss:$60 sps:$4 sm:$0xff]  }
  0xaa   : > { %v424_v13 = vmul.f32 %v422_v11, %v422_v11  ;;  %v3779_v12 = vld [vmem:[%s5524_s7 + $0x24] ss:$60 sps:$4 sm:$0xff]  }
  0xac   : > { %v428_v14 = vsel %vm411_vm0, %v424_v13, 0.0  ;;  %v3777_v13 = vld [vmem:[%s5524_s7 + $0x20] ss:$60 sps:$4 sm:$0xff]  }
  0xad   : > { %429 = vadd.xlane.f32.xlu1 %v428_v14  ;;  %v3782_v14 = vld [vmem:[%s5524_s7 + $0x9c] ss:$60 sps:$4 sm:$0xff]  }
 0x136   : > { %v427_v18 = vpop.xlane.xlu1 %426 }
 0x137   : > { %v431_v19 = vmul.f32 0.03125, %v427_v18  ;;  %v3788_v18 = vld [vmem:[%s5524_s7 + $0xac] ss:$60 sps:$4 sm:$0xff]  }
 0x139   : > { %v433_v20 = vadd.f32 1e-05, %v431_v19  ;;  %v3786_v19 = vld [vmem:[%s5524_s7 + $0xa8] ss:$60 sps:$4 sm:$0xff]  }
 0x13a   : > { %v430_v21 = vpop.xlane.xlu1 %429 }
 0x13b   : > { %4149 = vrsqrt.f32 %v433_v20  ;;  %v432_v22 = vmul.f32 0.03125, %v430_v21  ;;  %v3789_v20 = vld [vmem:[%s5526_s9] ss:$8 sps:$4 sm:$0xff]   ;;  %v3791_v21 = vld [vmem:[%s5526_s9 + $0x4] ss:$8 sps:$4 sm:$0xff]  }
 0x13d   : > { %v434_v23 = vadd.f32 1e-05, %v432_v22  ;;  %v3792_v22 = vld [vmem:[%s5526_s9 + $0x400] ss:$8 sps:$4 sm:$0xff]  }
 0x13f   : > { %4151 = vrsqrt.f32 %v434_v23  ;;  %v3794_v23 = vld [vmem:[%s5526_s9 + $0x404] ss:$8 sps:$4 sm:$0xff]  }
 0x145   : > { %v4150_v24 = vpop.eup %4149 }
 0x146   : > { %v437_v25 = vmul.f32 %v4150_v24, %v421_v7  ;;  %v3769_v7 = vld [vmem:[%s5524_s7 + $0x10] ss:$60 sps:$4 sm:$0xff]   ;;  %v3797_v24 = vld [vmem:[%s5526_s9 + $0x14] ss:$8 sps:$4 sm:$0xff]  }
 0x148   : > { %v446_v29 = vmul.f32 %v3342_v26, %v437_v25  ;;  %v3800_v25 = vld [vmem:[%s5526_s9 + $0x414] ss:$8 sps:$4 sm:$0xff]  }
 0x149   : > { %v4152_v27 = vpop.eup %4151 }
 0x14a   : > { %v438_v28 = vmul.f32 %v4152_v27, %v422_v11  ;;  %v455_v32 = vadd.f32 %v3343_v30, %v446_v29  ;;  %v3776_v11 = vld [vmem:[%s5524_s7 + $0xb0] ss:$60 sps:$4 sm:$0xff]  }
 0x14b   : > { %v3798_v27 = vld [vmem:[%s5526_s9 + $0x410] ss:$8 sps:$4 sm:$0xff]   ;;  %v3806_v29 = vld [vmem:[%s5526_s9 + $0x424] ss:$8 sps:$4 sm:$0xff]  }
 0x14c   : > { %v447_v31 = vmul.f32 %v3342_v26, %v438_v28  ;;  %v3795_v26 = vld [vmem:[%s5526_s9 + $0x10] ss:$8 sps:$4 sm:$0xff]   ;;  %v3803_v28 = vld [vmem:[%s5526_s9 + $0x24] ss:$8 sps:$4 sm:$0xff]  }
 0x14e   : > { %v456_v33 = vadd.f32 %v3343_v30, %v447_v31  ;;  %v3801_v30 = vld [vmem:[%s5526_s9 + $0x20] ss:$8 sps:$4 sm:$0xff]  }
 0x14f   : > { %v3804_v31 = vld [vmem:[%s5526_s9 + $0x420] ss:$8 sps:$4 sm:$0xff]  }
 0x150   : > { %v457_v35 = vpack.c.bf16 %v456_v33, %v455_v32  ;;  %v3809_v32 = vld [vmem:[%s5526_s9 + $0x34] ss:$8 sps:$4 sm:$0xff]  }
 0x151   : > { %v3812_v33 = vld [vmem:[%s5526_s9 + $0x434] ss:$8 sps:$4 sm:$0xff]  }
 0x152   : > { %3682 = vmatmul.mubr.msk.bf16.vlgmr.msra.gmra.mrb[0].mxu0 %vm411_vm0, %v457_v35  ;;  %v3810_v35 = vld [vmem:[%s5526_s9 + $0x430] ss:$8 sps:$4 sm:$0xff]  }
 0x153   : > { %3686 = vmatpush3.bf16.msra.mxu0 %v3743_v34  ;;  %3689 = vmatprep.mubr.msk.bf16.mxu0 %vm4226_vm1, %v4225_v16  ;;  %v3807_v34 = vld [vmem:[%s5526_s9 + $0x30] ss:$8 sps:$4 sm:$0xff]  }
 0x154   : > { %3687 = vmatprep.subr.bf16.mxu0 %v4225_v16 }
 0x157   : > { %3688 = vmatpush3.bf16.msra.mxu0 %v3744_v36  ;;  %v3815_v36 = vld [vmem:[%s5526_s9 + $0x44] ss:$8 sps:$4 sm:$0xff]  }
 0x158   : > { %860 = vmatprep.subr.bf16.mxu0 %v3747_v37  ;;  %v3818_v37 = vld [vmem:[%s5526_s9 + $0x444] ss:$8 sps:$4 sm:$0xff]  }
 0x225   : > { %v518_v40 = vpop.f32.mrb[0].mxu0 }
 0x226   : > { %v3683_v41 = vpop.f32.mrb[1].mxu0  ;;  %v519_v43 = vadd.f32 %v3344_v39, %v518_v40  ;;  %v3821_v40 = vld [vmem:[%s5526_s9 + $0x54] ss:$8 sps:$4 sm:$0xff]  }
 0x227   : > { %v521_v42 = vpop.f32.mrb[2].mxu0  ;;  %v3824_v41 = vld [vmem:[%s5526_s9 + $0x454] ss:$8 sps:$4 sm:$0xff]  }
 0x228   : > { %v522_v44 = vadd.f32 %v3344_v39, %v521_v42  ;;  %v3684_v45 = vpop.f32.mrb[3].mxu0  ;;  %v3816_v39 = vld [vmem:[%s5526_s9 + $0x440] ss:$8 sps:$4 sm:$0xff]   ;;  %v3819_v42 = vld [vmem:[%s5526_s9 + $0x50] ss:$8 sps:$4 sm:$0xff]  }
 0x229   : > { %v3830_v45 = vld [vmem:[%s5526_s9 + $0x464] ss:$8 sps:$4 sm:$0xff]  }
 0x22a   : > { %v525_v47 = vpack.c.bf16 %v522_v44, %v519_v43  ;;  %v3822_v43 = vld [vmem:[%s5526_s9 + $0x450] ss:$8 sps:$4 sm:$0xff]   ;;  %v3827_v44 = vld [vmem:[%s5526_s9 + $0x64] ss:$8 sps:$4 sm:$0xff]  }
 0x22c   : > { %3690 = vmatmul.mubr.msk.bf16.vlgmr.msra.gmra.mrb[4].mxu0 %vm411_vm0, %v525_v47  ;;  %v3828_v47 = vld [vmem:[%s5526_s9 + $0x460] ss:$8 sps:$4 sm:$0xff]  }
 0x22d   : > { %861 = vmatpush1.bf16.msra.mxu0 %v3745_v46  ;;  %892 = vmatprep.mubr.bf16.mxu0 %v4227_v54  ;;  %v3825_v46 = vld [vmem:[%s5526_s9 + $0x60] ss:$8 sps:$4 sm:$0xff]  }
 0x22e   : > { %862 = vmatprep.subr.bf16.mxu0 %v3753_v49  ;;  %v3836_v49 = vld [vmem:[%s5526_s9 + $0x474] ss:$8 sps:$4 sm:$0xff]  }
 0x231   : > { %863 = vmatpush1.bf16.msra.mxu0 %v3751_v51  ;;  %v3834_v51 = vld [vmem:[%s5526_s9 + $0x470] ss:$8 sps:$4 sm:$0xff]  }
 0x232   : > { %903 = vmatprep.subr.bf16.mxu0 %v3759_v53  ;;  %v3842_v53 = vld [vmem:[%s5526_s9 + $0x484] ss:$8 sps:$4 sm:$0xff]  }
 0x2ff   : > { %v586_v57 = vpop.f32.mrb[4].mxu0 }
 0x300   : > { %v3691_v58 = vpop.f32.mrb[5].mxu0  ;;  %v587_v60 = vadd.f32 %v3348_v56, %v586_v57  ;;  %v3845_v57 = vld [vmem:[%s5526_s9 + $0x94] ss:$8 sps:$4 sm:$0xff]  }
 0x301   : > { %v589_v59 = vpop.f32.mrb[6].mxu0  ;;  %v3848_v58 = vld [vmem:[%s5526_s9 + $0x494] ss:$8 sps:$4 sm:$0xff]  }
 0x302   : > { %v590_v61 = vadd.f32 %v3348_v56, %v589_v59  ;;  %v3692_v62 = vpop.f32.mrb[7].mxu0  ;;  %v3840_v56 = vld [vmem:[%s5526_s9 + $0x480] ss:$8 sps:$4 sm:$0xff]   ;;  %v3843_v59 = vld [vmem:[%s5526_s9 + $0x90] ss:$8 sps:$4 sm:$0xff]  }
 0x303   : > { %v3854_v62 = vld [vmem:[%s5526_s9 + $0x4a4] ss:$8 sps:$4 sm:$0xff]  }
 0x304   : > { %v593_v1 = vpack.c.bf16 %v590_v61, %v587_v60  ;;  %v3846_v60 = vld [vmem:[%s5526_s9 + $0x490] ss:$8 sps:$4 sm:$0xff]   ;;  %v3851_v61 = vld [vmem:[%s5526_s9 + $0xa4] ss:$8 sps:$4 sm:$0xff]  }
 0x306   : > { %3382 = vmatmul.mubr.msk.bf16.vlgmr.msra.gmra.mrb[8].mxu0 %vm411_vm0, %v593_v1  ;;  %3385 = vmatmul.mubr.msk.bf16.vlgmr.msra.gmra.mrb[0].mxu1 %vm411_vm0, %v593_v1 }
 0x307   : > { %904 = vmatpush1.bf16.msra.mxu0 %v3757_v63  ;;  %1076 = vmatpush1.bf16.msra.mxu1 %v3760_v0  ;;  %v3849_v63 = vld [vmem:[%s5526_s9 + $0xa0] ss:$8 sps:$4 sm:$0xff]  }
 0x308   : > { %905 = vmatprep.subr.bf16.mxu0 %v3765_v2  ;;  %1077 = vmatprep.subr.bf16.mxu1 %v3768_v3  ;;  %v3852_v0 = vld [vmem:[%s5526_s9 + $0x4a0] ss:$8 sps:$4 sm:$0xff]   ;;  %v3860_v2 = vld [vmem:[%s5526_s9 + $0x4b4] ss:$8 sps:$4 sm:$0xff]   ;;  %v3855_v3 = vld [vmem:[%s5526_s9 + $0xb0] ss:$8 sps:$4 sm:$0xff]  }
 0x309   : > { %935 = vmatprep.mubr.bf16.mxu0 %v4227_v54  ;;  %1107 = vmatprep.mubr.bf16.mxu1 %v4227_v54 }
 0x30b   : > { %906 = vmatpush1.bf16.msra.mxu0 %v3763_v4  ;;  %1078 = vmatpush1.bf16.msra.mxu1 %v3766_v5  ;;  %v3858_v4 = vld [vmem:[%s5526_s9 + $0x4b0] ss:$8 sps:$4 sm:$0xff]   ;;  %v630_v5 = vlaneseq }
 0x30c   : > { %946 = vmatprep.subr.bf16.mxu0 %v3771_v6  ;;  %3693 = vmatprep.subr.bf16.mxu1 %v4225_v16 }
 0x30d   : > { %v4593_v6 = vshrl.u32 %v630_v5, 7 }
 0x30e   : > { %3383 = vmatmul.mubr.msk.bf16.vlgmr.msra.gmra.mrb[12].mxu0 %vm411_vm0, %v593_v1  ;;  %3387 = vmatmul.mubr.msk.bf16.vlgmr.msra.gmra.mrb[4].mxu1 %vm411_vm0, %v593_v1 }
 0x30f   : > { %947 = vmatpush1.bf16.msra.mxu0 %v3769_v7  ;;  %3694 = vmatpush3.bf16.msra.mxu1 %v3772_v8  ;;  %v632_v7 = vsub.s32 0, %v4593_v6  ;;  %v656_v8 = vsub.s32 6, %v4593_v6 }
 0x310   : > { %948 = vmatprep.subr.bf16.mxu0 %v3775_v9  ;;  %3695 = vmatprep.subr.bf16.mxu1 %v4225_v16  ;;  %v4600_v9 = vld [vmem:[%s5525_s8] sm:$0xff] }
 0x311   : > { %978 = vmatprep.mubr.bf16.mxu0 %v4227_v54  ;;  %3697 = vmatprep.mubr.msk.bf16.mxu1 %vm4226_vm1, %v4225_v16  ;;  %v3785_v16 = vld [vmem:[%s5524_s7 + $0x34] ss:$60 sps:$4 sm:$0xff]  }
 0x313   : > { %949 = vmatpush1.bf16.msra.mxu0 %v3773_v10  ;;  %3696 = vmatpush3.bf16.msra.mxu1 %v3776_v11  ;;  %v636_v10 = vsub.s32 1, %v4593_v6  ;;  %v660_v11 = vsub.s32 7, %v4593_v6 }
 0x314   : > { %1032 = vmatprep.subr.bf16.mxu0 %v3779_v12  ;;  %2887 = vmatprep.subr.bf16.mxu1 %v3791_v21  ;;  %v633_v12 = vrot.slane %v4600_v9, %v632_v7 }
 0x316   : > { %3384 = vmatmul.mubr.msk.bf16.vlgmr.msra.gmra.mrb[16].mxu0 %vm411_vm0, %v593_v1  ;;  %3698 = vmatmul.mubr.msk.bf16.vlgmr.msra.gmra.mrb[8].mxu1 %vm411_vm0, %v593_v1 }
 0x317   : > { %1033 = vmatpush1.bf16.msra.mxu0 %v3777_v13  ;;  %1064 = vmatprep.mubr.bf16.mxu0 %v4227_v54  ;;  %v657_v13 = vrot.slane %v4600_v9, %v656_v8 }
 0x318   : > { %1034 = vmatprep.subr.bf16.mxu0 %v3782_v14  ;;  %2888 = vmatpush1.bf16.msra.mxu1 %v3789_v20  ;;  %v637_v14 = vrot.slane %v4600_v9, %v636_v10 }
 0x319   : > { %2889 = vmatprep.subr.bf16.mxu1 %v3797_v24 }
 0x31b   : > { %1035 = vmatpush1.bf16.msra.mxu0 %v3780_v15  ;;  %v661_v15 = vrot.slane %v4600_v9, %v660_v11 }
 0x31c   : > { %1118 = vmatprep.subr.bf16.mxu0 %v3785_v16  ;;  %2890 = vmatpush1.bf16.msra.mxu1 %v3795_v26 }
 0x31d   : > { %2891 = vmatprep.subr.bf16.mxu1 %v3803_v28  ;;  %v644_v28 = vsub.s32 3, %v4593_v6 }
 0x31e   : > { %3386 = vmatmul.mubr.msk.bf16.vlgmr.msra.gmra.mrb[20].mxu0 %vm411_vm0, %v593_v1 }
 0x31f   : > { %1119 = vmatpush1.bf16.msra.mxu0 %v3783_v17  ;;  %1150 = vmatprep.mubr.bf16.mxu0 %v4227_v54 }
 0x320   : > { %1120 = vmatprep.subr.bf16.mxu0 %v3788_v18  ;;  %2892 = vmatpush1.bf16.msra.mxu1 %v3801_v30 }
 0x321   : > { %2893 = vmatprep.subr.bf16.mxu1 %v3809_v32 }
 0x323   : > { %1121 = vmatpush1.bf16.msra.mxu0 %v3786_v19 }
 0x324   : > { %3059 = vmatprep.subr.bf16.mxu0 %v3794_v23  ;;  %2894 = vmatpush1.bf16.msra.mxu1 %v3807_v34 }
 0x325   : > { %2895 = vmatprep.subr.bf16.mxu1 %v3815_v36 }
 0x326   : > { %3388 = vmatmul.mubr.msk.bf16.vlgmr.msra.gmra.mrb[24].mxu0 %vm411_vm0, %v593_v1  ;;  %v3857_v1 = vld [vmem:[%s5526_s9 + $0xb4] ss:$8 sps:$4 sm:$0xff]  }
 0x327   : > { %3060 = vmatpush1.bf16.msra.mxu0 %v3792_v22  ;;  %v640_v22 = vsub.s32 2, %v4593_v6 }
 0x328   : > { %3061 = vmatprep.subr.bf16.mxu0 %v3800_v25  ;;  %2896 = vmatpush1.bf16.msra.mxu1 %v3813_v38 }
 0x329   : > { %2897 = vmatprep.subr.bf16.mxu1 %v3821_v40 }
 0x32b   : > { %3062 = vmatpush1.bf16.msra.mxu0 %v3798_v27  ;;  %v4625_v27 = vld [vmem:[%s5525_s8 + $0x8] sm:$0xff] }
 0x32c   : > { %3063 = vmatprep.subr.bf16.mxu0 %v3806_v29  ;;  %2898 = vmatpush1.bf16.msra.mxu1 %v3819_v42  ;;  %v673_v38 = vrot.slane %v4625_v27, %v640_v22  ;;  %v677_v42 = vrot.slane %v4625_v27, %v644_v28 }
 0x32d   : > { %2899 = vmatprep.subr.bf16.mxu1 %v3827_v44 }
 0x32f   : > { %3064 = vmatpush1.bf16.msra.mxu0 %v3804_v31 }
 0x330   : > { %3065 = vmatprep.subr.bf16.mxu0 %v3812_v33  ;;  %2900 = vmatpush1.bf16.msra.mxu1 %v3825_v46 }
 0x331   : > { %2901 = vmatprep.subr.bf16.mxu1 %v3833_v48 }
 0x333   : > { %3066 = vmatpush1.bf16.msra.mxu0 %v3810_v35 }
 0x334   : > { %3067 = vmatprep.subr.bf16.mxu0 %v3818_v37  ;;  %2902 = vmatpush1.bf16.msra.mxu1 %v3831_v50  ;;  %v641_v37 = vrot.slane %v4600_v9, %v640_v22 }
 0x335   : > { %2903 = vmatprep.subr.bf16.mxu1 %v3839_v52 }
 0x337   : > { %3068 = vmatpush1.bf16.msra.mxu0 %v3816_v39 }
 0x338   : > { %3069 = vmatprep.subr.bf16.mxu0 %v3824_v41  ;;  %2904 = vmatpush1.bf16.msra.mxu1 %v3837_v55  ;;  %v645_v41 = vrot.slane %v4600_v9, %v644_v28  ;;  %v652_v55 = vsub.s32 5, %v4593_v6 }
 0x339   : > { %2905 = vmatprep.subr.bf16.mxu1 %v3845_v57 }
 0x33b   : > { %3070 = vmatpush1.bf16.msra.mxu0 %v3822_v43 }
 0x33c   : > { %3071 = vmatprep.subr.bf16.mxu0 %v3830_v45  ;;  %2906 = vmatpush1.bf16.msra.mxu1 %v3843_v59 }
 0x33d   : > { %2907 = vmatprep.subr.bf16.mxu1 %v3851_v61 }
 0x33f   : > { %3072 = vmatpush1.bf16.msra.mxu0 %v3828_v47 }
 0x340   : > { %3073 = vmatprep.subr.bf16.mxu0 %v3836_v49  ;;  %2908 = vmatpush1.bf16.msra.mxu1 %v3849_v63  ;;  %v648_v49 = vsub.s32 4, %v4593_v6 }
 0x341   : > { %2909 = vmatprep.subr.bf16.mxu1 %v3857_v1  ;;  %v689_v1 = vrot.slane %v4625_v27, %v656_v8 }
 0x343   : > { %3074 = vmatpush1.bf16.msra.mxu0 %v3834_v51 }
 0x344   : > { %3075 = vmatprep.subr.bf16.mxu0 %v3842_v53  ;;  %2910 = vmatpush1.bf16.msra.mxu1 %v3855_v3  ;;  %v653_v3 = vrot.slane %v4600_v9, %v652_v55 }
 0x347   : > { %3076 = vmatpush1.bf16.msra.mxu0 %v3840_v56 }
 0x348   : > { %3077 = vmatprep.subr.bf16.mxu0 %v3848_v58 }
 0x34b   : > { %3078 = vmatpush1.bf16.msra.mxu0 %v3846_v60 }
 0x34c   : > { %3079 = vmatprep.subr.bf16.mxu0 %v3854_v62 }
 0x34f   : > { %3080 = vmatpush1.bf16.msra.mxu0 %v3852_v0  ;;  %v649_v0 = vrot.slane %v4600_v9, %v648_v49 }
 0x350   : > { %3081 = vmatprep.subr.bf16.mxu0 %v3860_v2 }
 0x353   : > { %3082 = vmatpush1.bf16.msra.mxu0 %v3858_v4 }
 0x3d9   : > { %v894_v16 = vpop.f32.mrb[8].mxu0  ;;  %v1023_v17 = vpop.f32.mrb[0].mxu1 }
 0x3da   : > { %v4613_v18 = vadd.f32 %v894_v16, %v633_v12  ;;  %v4615_v19 = vadd.f32 %v1023_v17, %v657_v13  ;;  %v896_v20 = vpop.f32.mrb[9].mxu0  ;;  %v1025_v21 = vpop.f32.mrb[1].mxu1 }
 0x3db   : > { %v4618_v23 = vadd.f32 %v896_v20, %v637_v14  ;;  %v4620_v24 = vadd.f32 %v1025_v21, %v661_v15  ;;  %v898_v25 = vpop.f32.mrb[10].mxu0  ;;  %v1027_v26 = vpop.f32.mrb[2].mxu1 }
 0x3dc   : > { %v4633_v29 = vadd.f32 %v898_v25, %v633_v12  ;;  %v4635_v30 = vadd.f32 %v1027_v26, %v657_v13  ;;  %v900_v31 = vpop.f32.mrb[11].mxu0  ;;  %v1029_v32 = vpop.f32.mrb[3].mxu1 }
 0x3dd   : > { %v3648_v33 = vpack.c.bf16 %v4618_v23, %v4613_v18  ;;  %v3651_v34 = vpack.c.bf16 %v4620_v24, %v4615_v19  ;;  %v4641_v35 = vadd.f32 %v900_v31, %v637_v14  ;;  %v4643_v36 = vadd.f32 %v1029_v32, %v661_v15 }
 0x3df   : > { %1294 = vst [vmem:[%s4631_s14] sm:$0xff] %v3648_v33  ;;  %1297 = vst [vmem:[%s4631_s14 + $0x18] sm:$0xff] %v3651_v34  ;;  %v3656_v39 = vpack.c.bf16 %v4641_v35, %v4633_v29  ;;  %v3659_v40 = vpack.c.bf16 %v4643_v36, %v4635_v30  ;;  %v665_v33 = vrot.slane %v4625_v27, %v632_v7 }
 0x3e1   : > { %1302 = vst [vmem:[%s4631_s14 + $0x3c] sm:$0xff] %v3656_v39  ;;  %1305 = vst [vmem:[%s4631_s14 + $0x54] sm:$0xff] %v3659_v40  ;;  %v937_v43 = vpop.f32.mrb[12].mxu0  ;;  %v1109_v44 = vpop.f32.mrb[4].mxu1 }
 0x3e2   : > { %v4657_v45 = vadd.f32 %v937_v43, %v641_v37  ;;  %v4659_v46 = vadd.f32 %v1109_v44, %v673_v38  ;;  %v939_v47 = vpop.f32.mrb[13].mxu0  ;;  %v1111_v48 = vpop.f32.mrb[5].mxu1 }
 0x3e3   : > { %v4662_v50 = vadd.f32 %v939_v47, %v645_v41  ;;  %v4664_v51 = vadd.f32 %v1111_v48, %v677_v42  ;;  %v941_v52 = vpop.f32.mrb[14].mxu0  ;;  %v1113_v53 = vpop.f32.mrb[6].mxu1 }
 0x3e4   : > { %v4667_v56 = vadd.f32 %v941_v52, %v641_v37  ;;  %v4669_v57 = vadd.f32 %v1113_v53, %v673_v38  ;;  %v943_v58 = vpop.f32.mrb[15].mxu0  ;;  %v1115_v59 = vpop.f32.mrb[7].mxu1  ;;  %v1310_v31 = vmax.f32 %v4613_v18, %v4657_v45  ;;  %v669_v38 = vrot.slane %v4625_v27, %v636_v10 }
 0x3e5   : > { %v3649_v60 = vpack.c.bf16 %v4662_v50, %v4657_v45  ;;  %v3653_v61 = vpack.c.bf16 %v4664_v51, %v4659_v46  ;;  %v4675_v62 = vadd.f32 %v943_v58, %v645_v41  ;;  %v4677_v63 = vadd.f32 %v1115_v59, %v677_v42 }
 0x3e6   : > { %v1311_v34 = vmax.f32 %v4618_v23, %v4662_v50  ;;  %v1326_v39 = vmax.f32 %v4633_v29, %v4667_v56 }
 0x3e7   : > { %1295 = vst [vmem:[%s4631_s14 + $0x8] sm:$0xff] %v3649_v60  ;;  %1299 = vst [vmem:[%s4631_s14 + $0x28] sm:$0xff] %v3653_v61  ;;  %v3657_v2 = vpack.c.bf16 %v4675_v62, %v4667_v56  ;;  %v3661_v4 = vpack.c.bf16 %v4677_v63, %v4669_v57  ;;  %v1327_v7 = vmax.f32 %v4641_v35, %v4675_v62 }
 0x3e9   : > { %1303 = vst [vmem:[%s4631_s14 + $0x44] sm:$0xff] %v3657_v2  ;;  %v980_v5 = vpop.f32.mrb[16].mxu0  ;;  %v1195_v11 = vpop.f32.mrb[8].mxu1  ;;  %1307 = vst [vmem:[%s4631_s14 + $0x64] sm:$0xff] %v3661_v4 }
 0x3ea   : > { %v4694_v12 = vadd.f32 %v980_v5, %v649_v0  ;;  %v4696_v8 = vadd.f32 %v1195_v11, %v689_v1  ;;  %v982_v13 = vpop.f32.mrb[17].mxu0  ;;  %v3699_v14 = vpop.f32.mrb[9].mxu1 }
 0x3eb   : > { %v4698_v15 = vadd.f32 %v982_v13, %v653_v3  ;;  %v984_v16 = vpop.f32.mrb[18].mxu0  ;;  %v1198_v17 = vpop.f32.mrb[10].mxu1  ;;  %v685_v13 = vrot.slane %v4625_v27, %v652_v55 }
 0x3ec   : > { %v3655_v9 = vpack.c.bf16 %v4696_v8, %v4696_v8  ;;  %v4702_v20 = vadd.f32 %v984_v16, %v649_v0  ;;  %v4704_v21 = vadd.f32 %v1198_v17, %v689_v1  ;;  %v986_v22 = vpop.f32.mrb[19].mxu0  ;;  %v3700_v25 = vpop.f32.mrb[11].mxu1  ;;  %v1312_v40 = vmax.f32 %v1310_v31, %v4694_v12 }
 0x3ed   : > { %v3650_v26 = vpack.c.bf16 %v4698_v15, %v4694_v12  ;;  %v4708_v28 = vadd.f32 %v986_v22, %v653_v3  ;;  %v1313_v41 = vmax.f32 %v1311_v34, %v4698_v15  ;;  %v681_v3 = vrot.slane %v4625_v27, %v648_v49 }
 0x3ee   : > { %1301 = vst [vmem:[%s4631_s14 + $0x38] sm:$0xf] %v3655_v9  ;;  %v3663_v32 = vpack.c.bf16 %v4704_v21, %v4704_v21  ;;  %v1328_v43 = vmax.f32 %v1326_v39, %v4702_v20  ;;  %v1314_v53 = vmax.f32 %v1312_v40, %v4615_v19 }
 0x3ef   : > { %1296 = vst [vmem:[%s4631_s14 + $0x10] sm:$0xff] %v3650_v26  ;;  %v3658_v37 = vpack.c.bf16 %v4708_v28, %v4702_v20  ;;  %v1329_v10 = vmax.f32 %v1327_v7, %v4708_v28  ;;  %v1315_v61 = vmax.f32 %v1313_v41, %v4620_v24 }
 0x3f0   : > { %1309 = vst [vmem:[%s4631_s14 + $0x74] sm:$0xf] %v3663_v32  ;;  %v1330_v2 = vmax.f32 %v1328_v43, %v4635_v30 }
 0x3f1   : > { %1304 = vst [vmem:[%s4631_s14 + $0x4c] sm:$0xff] %v3658_v37  ;;  %v1066_v42 = vpop.f32.mrb[20].mxu0  ;;  %v1331_v11 = vmax.f32 %v1329_v10, %v4643_v36  ;;  %v3861_v10 = vld [vmem:[%s5526_s9 + $0xc0] ss:$8 sps:$4 sm:$0xff]  }
 0x3f2   : > { %v4735_v44 = vadd.f32 %v1066_v42, %v665_v33  ;;  %v1068_v47 = vpop.f32.mrb[21].mxu0 }
 0x3f3   : > { %v4738_v48 = vadd.f32 %v1068_v47, %v669_v38  ;;  %v1070_v52 = vpop.f32.mrb[22].mxu0 }
 0x3f4   : > { %v4741_v58 = vadd.f32 %v1070_v52, %v665_v33  ;;  %v1072_v59 = vpop.f32.mrb[23].mxu0  ;;  %v1316_v1 = vmax.f32 %v1314_v53, %v4735_v44  ;;  %v3863_v52 = vld [vmem:[%s5526_s9 + $0xc4] ss:$8 sps:$4 sm:$0xff]   ;;  %v3864_v53 = vld [vmem:[%s5526_s9 + $0x4c0] ss:$8 sps:$4 sm:$0xff]  }
 0x3f5   : > { %v3652_v60 = vpack.c.bf16 %v4738_v48, %v4735_v44  ;;  %v4746_v0 = vadd.f32 %v1072_v59, %v669_v38  ;;  %v1317_v4 = vmax.f32 %v1315_v61, %v4738_v48  ;;  %v3866_v59 = vld [vmem:[%s5526_s9 + $0x4c4] ss:$8 sps:$4 sm:$0xff]   ;;  %2911 = vmatprep.subr.bf16.mxu1 %v3863_v52  ;;  %v3872_v61 = vld [vmem:[%s5526_s9 + $0x4d4] ss:$8 sps:$4 sm:$0xff]  }
 0x3f6   : > { %v1332_v14 = vmax.f32 %v1330_v2, %v4741_v58  ;;  %v1318_v49 = vmax.f32 %v1316_v1, %v4659_v46  ;;  %3083 = vmatprep.subr.bf16.mxu0 %v3866_v59  ;;  %2912 = vmatpush1.bf16.msra.mxu1 %v3861_v10  ;;  %v3867_v1 = vld [vmem:[%s5526_s9 + $0xd0] ss:$8 sps:$4 sm:$0xff]  }
 0x3f7   : > { %1298 = vst [vmem:[%s4631_s14 + $0x20] sm:$0xff] %v3652_v60  ;;  %v3660_v5 = vpack.c.bf16 %v4746_v0, %v4741_v58  ;;  %v1333_v16 = vmax.f32 %v1331_v11, %v4746_v0  ;;  %v1319_v31 = vmax.f32 %v1317_v4, %v4664_v51  ;;  %v3869_v60 = vld [vmem:[%s5526_s9 + $0xd4] ss:$8 sps:$4 sm:$0xff]   ;;  %3084 = vmatpush1.bf16.msra.mxu0 %v3864_v53  ;;  %v3870_v2 = vld [vmem:[%s5526_s9 + $0x4d0] ss:$8 sps:$4 sm:$0xff]  }
 0x3f8   : > { %v1334_v55 = vmax.f32 %v1332_v14, %v4669_v57  ;;  %2913 = vmatprep.subr.bf16.mxu1 %v3869_v60  ;;  %3085 = vmatprep.subr.bf16.mxu0 %v3872_v61  ;;  %v3878_v4 = vld [vmem:[%s5526_s9 + $0x4e4] ss:$8 sps:$4 sm:$0xff]   ;;  %v3876_v11 = vld [vmem:[%s5526_s9 + $0x4e0] ss:$8 sps:$4 sm:$0xff]   ;;  %v3884_v14 = vld [vmem:[%s5526_s9 + $0x4f4] ss:$8 sps:$4 sm:$0xff]  }
 0x3f9   : > { %1306 = vst [vmem:[%s4631_s14 + $0x5c] sm:$0xff] %v3660_v5  ;;  %v1152_v17 = vpop.f32.mrb[24].mxu0  ;;  %v1335_v38 = vmax.f32 %v1333_v16, %v4677_v63  ;;  %v3873_v5 = vld [vmem:[%s5526_s9 + $0xe0] ss:$8 sps:$4 sm:$0xff]   ;;  %v3879_v16 = vld [vmem:[%s5526_s9 + $0xf0] ss:$8 sps:$4 sm:$0xff]  }
 0x3fa   : > { %v4764_v9 = vadd.f32 %v1152_v17, %v681_v3  ;;  %v1154_v22 = vpop.f32.mrb[25].mxu0  ;;  %2914 = vmatpush1.bf16.msra.mxu1 %v3867_v1  ;;  %v3882_v17 = vld [vmem:[%s5526_s9 + $0x4f0] ss:$8 sps:$4 sm:$0xff]  }
 0x3fb   : > { %v4767_v25 = vadd.f32 %v1154_v22, %v685_v13  ;;  %v1156_v26 = vpop.f32.mrb[26].mxu0  ;;  %3086 = vmatpush1.bf16.msra.mxu0 %v3870_v2  ;;  %v3890_v22 = vld [vmem:[%s5526_s9 + $0x504] ss:$8 sps:$4 sm:$0xff]  }
 0x3fc   : > { %v1320_v6 = vmax.f32 %v1318_v49, %v4764_v9  ;;  %v4771_v27 = vadd.f32 %v1156_v26, %v681_v3  ;;  %v1158_v32 = vpop.f32.mrb[27].mxu0  ;;  %v3875_v3 = vld [vmem:[%s5526_s9 + $0xe4] ss:$8 sps:$4 sm:$0xff]   ;;  %3087 = vmatprep.subr.bf16.mxu0 %v3878_v4 }
 0x3fd   : > { %v3654_v33 = vpack.c.bf16 %v4767_v25, %v4764_v9  ;;  %v4776_v34 = vadd.f32 %v1158_v32, %v685_v13  ;;  %v1321_v37 = vmax.f32 %v1319_v31, %v4767_v25  ;;  %2915 = vmatprep.subr.bf16.mxu1 %v3875_v3  ;;  %v3881_v13 = vld [vmem:[%s5526_s9 + $0xf4] ss:$8 sps:$4 sm:$0xff]   ;;  %v3887_v49 = vld [vmem:[%s5526_s9 + $0x104] ss:$8 sps:$4 sm:$0xff]  }
 0x3fe   : > { %v1336_v39 = vmax.f32 %v1334_v55, %v4771_v27  ;;  %v1322_v40 = vmax.f32 %v1320_v6, %v4696_v8  ;;  %2916 = vmatpush1.bf16.msra.mxu1 %v3873_v5 }
 0x3ff   : > { %1300 = vst [vmem:[%s4631_s14 + $0x30] sm:$0xff] %v3654_v33  ;;  %v3662_v7 = vpack.c.bf16 %v4776_v34, %v4771_v27  ;;  %v1337_v41 = vmax.f32 %v1335_v38, %v4776_v34  ;;  %3088 = vmatpush1.bf16.msra.mxu0 %v3876_v11  ;;  %2917 = vmatprep.subr.bf16.mxu1 %v3881_v13 }
 0x400   : > { %v1323_v42 = vmax.f32 %v1322_v40, %v1321_v37  ;;  %v1338_v43 = vmax.f32 %v1336_v39, %v4704_v21  ;;  %3089 = vmatprep.subr.bf16.mxu0 %v3884_v14 }
 0x401   : > { %1308 = vst [vmem:[%s4631_s14 + $0x6c] sm:$0xff] %v3662_v7 }
 0x402   : > { %1324 = vmax.xlane.f32.xlu0 %v1323_v42  ;;  %v1339_v47 = vmax.f32 %v1338_v43, %v1337_v41  ;;  %2918 = vmatpush1.bf16.msra.mxu1 %v3879_v16 }
 0x403   : > { %3090 = vmatpush1.bf16.msra.mxu0 %v3882_v17  ;;  %2930 = vmatprep.subr.bf16.mxu1 %v3887_v49 }
 0x404   : > { %1340 = vmax.xlane.f32.xlu1 %v1339_v47  ;;  %3102 = vmatprep.subr.bf16.mxu0 %v3890_v22 }
 0x48f   : > { %v4842_v26 = vpop.xlane.xlu0 %1324 }
 0x490   : > { %v1343_v31 = vsub.f32 %v4618_v23, %v4842_v26  ;;  %v1351_v6 = vsub.f32 %v4738_v48, %v4842_v26  ;;  %v1342_v55 = vsub.f32 %v4613_v18, %v4842_v26  ;;  %v1350_v33 = vsub.f32 %v4735_v44, %v4842_v26 }
 0x491   : > { %v4850_v32 = vpop.xlane.xlu1 %1340  ;;  %v1345_v18 = vsub.f32 %v4662_v50, %v4842_v26  ;;  %v1344_v47 = vsub.f32 %v4657_v45, %v4842_v26  ;;  %v1347_v45 = vsub.f32 %v4698_v15, %v4842_v26  ;;  %v1346_v5 = vsub.f32 %v4694_v12, %v4842_v26  ;;  %v3885_v12 = vld [vmem:[%s5526_s9 + $0x100] ss:$8 sps:$4 sm:$0xff]  }
 0x492   : > { %v1358_v37 = vsub.f32 %v4641_v35, %v4850_v32  ;;  %v1374_v38 = vmul.f32 1.442695, %v1343_v31  ;;  %v1366_v39 = vsub.f32 %v4746_v0, %v4850_v32  ;;  %v1390_v40 = vmul.f32 1.442695, %v1351_v6 }
 0x493   : > { %v1357_v23 = vsub.f32 %v4633_v29, %v4850_v32  ;;  %v1365_v48 = vsub.f32 %v4741_v58, %v4850_v32  ;;  %v1372_v41 = vmul.f32 1.442695, %v1342_v55  ;;  %v1360_v42 = vsub.f32 %v4675_v62, %v4850_v32  ;;  %v3893_v55 = vld [vmem:[%s5526_s9 + $0x114] ss:$8 sps:$4 sm:$0xff]  }
 0x494   : > { %4153 = vpow2.f32 %v1374_v38  ;;  %v1404_v7 = vmul.f32 1.442695, %v1358_v37  ;;  %v1420_v44 = vmul.f32 1.442695, %v1366_v39  ;;  %v1388_v0 = vmul.f32 1.442695, %v1350_v33 }
 0x495   : > { %4155 = vpow2.f32 %v1390_v40  ;;  %v1402_v35 = vmul.f32 1.442695, %v1357_v23  ;;  %v1353_v29 = vsub.f32 %v4664_v51, %v4842_v26  ;;  %v1418_v43 = vmul.f32 1.442695, %v1365_v48  ;;  %v3888_v38 = vld [vmem:[%s5526_s9 + $0x500] ss:$8 sps:$4 sm:$0xff]  }
 0x496   : > { %4157 = vpow2.f32 %v1404_v7  ;;  %v1368_v58 = vsub.f32 %v4677_v63, %v4850_v32  ;;  %v1378_v50 = vmul.f32 1.442695, %v1345_v18  ;;  %v1408_v10 = vmul.f32 1.442695, %v1360_v42  ;;  %v3896_v48 = vld [vmem:[%s5526_s9 + $0x514] ss:$8 sps:$4 sm:$0xff]  }
 0x497   : > { %4159 = vpow2.f32 %v1420_v44  ;;  %v1359_v62 = vsub.f32 %v4667_v56, %v4850_v32  ;;  %v1394_v52 = vmul.f32 1.442695, %v1353_v29  ;;  %v1352_v51 = vsub.f32 %v4659_v46, %v4842_v26  ;;  %v3891_v44 = vld [vmem:[%s5526_s9 + $0x110] ss:$8 sps:$4 sm:$0xff]  }
 0x498   : > { %4161 = vpow2.f32 %v1372_v41  ;;  %v1424_v53 = vmul.f32 1.442695, %v1368_v58  ;;  %v1367_v63 = vsub.f32 %v4669_v57, %v4850_v32  ;;  %v1376_v59 = vmul.f32 1.442695, %v1344_v47  ;;  %v3894_v58 = vld [vmem:[%s5526_s9 + $0x510] ss:$8 sps:$4 sm:$0xff]  }
 0x499   : > { %4163 = vpow2.f32 %v1402_v35  ;;  %v1406_v60 = vmul.f32 1.442695, %v1359_v62  ;;  %v1362_v56 = vsub.f32 %v4708_v28, %v4850_v32  ;;  %v1392_v1 = vmul.f32 1.442695, %v1352_v51  ;;  %v3905_v51 = vld [vmem:[%s5526_s9 + $0x134] ss:$8 sps:$4 sm:$0xff]  }
 0x49a   : > { %4165 = vpow2.f32 %v1388_v0  ;;  %v1355_v46 = vsub.f32 %v4767_v25, %v4842_v26  ;;  %v1422_v3 = vmul.f32 1.442695, %v1367_v63  ;;  %v1370_v57 = vsub.f32 %v4776_v34, %v4850_v32  ;;  %v3899_v0 = vld [vmem:[%s5526_s9 + $0x124] ss:$8 sps:$4 sm:$0xff]  }
 0x49b   : > { %4167 = vpow2.f32 %v1418_v43  ;;  %v1382_v15 = vmul.f32 1.442695, %v1347_v45  ;;  %v1412_v13 = vmul.f32 1.442695, %v1362_v56  ;;  %v1361_v14 = vsub.f32 %v4702_v20, %v4850_v32  ;;  %v3900_v45 = vld [vmem:[%s5526_s9 + $0x520] ss:$8 sps:$4 sm:$0xff]  }
 0x49c   : > { %4169 = vpow2.f32 %v1378_v50  ;;  %v1398_v17 = vmul.f32 1.442695, %v1355_v46  ;;  %v1354_v34 = vsub.f32 %v4764_v9, %v4842_v26  ;;  %v1428_v22 = vmul.f32 1.442695, %v1370_v57  ;;  %v3911_v57 = vld [vmem:[%s5526_s9 + $0x144] ss:$8 sps:$4 sm:$0xff]  }
 0x49d   : > { %4171 = vpow2.f32 %v1408_v10  ;;  %v1369_v31 = vsub.f32 %v4771_v27, %v4850_v32  ;;  %v1380_v9 = vmul.f32 1.442695, %v1346_v5  ;;  %v1349_v33 = vsub.f32 %v4620_v24, %v4842_v26  ;;  %v3906_v5 = vld [vmem:[%s5526_s9 + $0x530] ss:$8 sps:$4 sm:$0xff]  }
 0x49e   : > { %v4154_v61 = vpop.eup %4153  ;;  %4173 = vpow2.f32 %v1394_v52  ;;  %v1410_v39 = vmul.f32 1.442695, %v1361_v14  ;;  %v1364_v27 = vsub.f32 %v4643_v36, %v4850_v32  ;;  %v1396_v18 = vmul.f32 1.442695, %v1354_v34  ;;  %v3897_v52 = vld [vmem:[%s5526_s9 + $0x120] ss:$8 sps:$4 sm:$0xff]  }
 0x49f   : > { %v4156_v2 = vpop.eup %4155  ;;  %4175 = vpow2.f32 %v1424_v53  ;;  %v1356_v24 = vsub.f32 %v4696_v8, %v4842_v26  ;;  %v1426_v36 = vmul.f32 1.442695, %v1369_v31  ;;  %v1371_v41 = vsub.f32 %v4704_v21, %v4850_v32  ;;  %v3920_v31 = vld [vmem:[%s5526_s9 + $0x554] ss:$8 sps:$4 sm:$0xff]  }
 0x4a0   : > { %v4158_v4 = vpop.eup %4157  ;;  %4177 = vpow2.f32 %v1376_v59  ;;  %v1386_v8 = vmul.f32 1.442695, %v1349_v33  ;;  %v1348_v29 = vsub.f32 %v4615_v19, %v4842_v26  ;;  %v1416_v21 = vmul.f32 1.442695, %v1364_v27  ;;  %v3902_v19 = vld [vmem:[%s5526_s9 + $0x524] ss:$8 sps:$4 sm:$0xff]  }
 0x4a1   : > { %v4160_v11 = vpop.eup %4159  ;;  %v1433_v28 = vpack.c.bf16 %v4158_v4, %v4154_v61  ;;  %4179 = vpow2.f32 %v1406_v60  ;;  %v1363_v50 = vsub.f32 %v4635_v30, %v4850_v32  ;;  %v1400_v26 = vmul.f32 1.442695, %v1356_v24  ;;  %v3908_v61 = vld [vmem:[%s5526_s9 + $0x534] ss:$8 sps:$4 sm:$0xff]   ;;  %v3923_v33 = vld [vmem:[%s5526_s9 + $0x164] ss:$8 sps:$4 sm:$0xff]  }
 0x4a2   : > { %v4162_v25 = vpop.eup %4161  ;;  %v1441_v16 = vpack.c.bf16 %v4160_v11, %v4156_v2  ;;  %4181 = vpow2.f32 %v1392_v1  ;;  %v1430_v30 = vmul.f32 1.442695, %v1371_v41  ;;  %v1384_v63 = vmul.f32 1.442695, %v1348_v29  ;;  %v3903_v2 = vld [vmem:[%s5526_s9 + $0x130] ss:$8 sps:$4 sm:$0xff]  }
 0x4a3   : > { %v4164_v49 = vpop.eup %4163  ;;  %2919 = vmatprep.mubr.bf16.mxu1 %v1433_v28  ;;  %4183 = vpow2.f32 %v1422_v3  ;;  %v1414_v60 = vmul.f32 1.442695, %v1363_v50  ;;  %v3914_v28 = vld [vmem:[%s5526_s9 + $0x544] ss:$8 sps:$4 sm:$0xff]   ;;  %v3929_v24 = vld [vmem:[%s5526_s9 + $0x174] ss:$8 sps:$4 sm:$0xff]  }
 0x4a4   : > { %v4166_v6 = vpop.eup %4165  ;;  %3091 = vmatprep.mubr.bf16.mxu0 %v1441_v16  ;;  %v1432_v20 = vpack.c.bf16 %v4164_v49, %v4162_v25  ;;  %4185 = vpow2.f32 %v1382_v15  ;;  %v3909_v25 = vld [vmem:[%s5526_s9 + $0x140] ss:$8 sps:$4 sm:$0xff]   ;;  %v3927_v41 = vld [vmem:[%s5526_s9 + $0x170] ss:$8 sps:$4 sm:$0xff]   ;;  %v3941_v29 = vld [vmem:[%s5526_s9 + $0x194] ss:$8 sps:$4 sm:$0xff]  }
 0x4a5   : > { %v4168_v37 = vpop.eup %4167  ;;  %4187 = vpow2.f32 %v1412_v13  ;;  %v3947_v50 = vld [vmem:[%s5526_s9 + $0x1a4] ss:$8 sps:$4 sm:$0xff]  }
 0x4a6   : > { %v4170_v40 = vpop.eup %4169  ;;  %2920 = vmatmul.mubr.bf16.vlgmr.msra.gmra.mrb[12].mxu1 %v1432_v20  ;;  %v1440_v23 = vpack.c.bf16 %v4168_v37, %v4166_v6  ;;  %4189 = vpow2.f32 %v1398_v17  ;;  %v3917_v17 = vld [vmem:[%s5526_s9 + $0x154] ss:$8 sps:$4 sm:$0xff]  }
 0x4a7   : > { %v4172_v7 = vpop.eup %4171  ;;  %2931 = vmatpush1.bf16.msra.mxu1 %v3885_v12  ;;  %4191 = vpow2.f32 %v1428_v22  ;;  %v3912_v12 = vld [vmem:[%s5526_s9 + $0x540] ss:$8 sps:$4 sm:$0xff]  }
 0x4a8   : > { %v4174_v35 = vpop.eup %4173  ;;  %3092 = vmatmul.mubr.bf16.vlgmr.msra.gmra.mrb[28].mxu0 %v1440_v23  ;;  %v1435_v42 = vpack.c.bf16 %v4172_v7, %v4170_v40  ;;  %2932 = vmatprep.subr.bf16.mxu1 %v3893_v55  ;;  %4193 = vpow2.f32 %v1380_v9  ;;  %v3915_v55 = vld [vmem:[%s5526_s9 + $0x150] ss:$8 sps:$4 sm:$0xff]   ;;  %v3926_v40 = vld [vmem:[%s5526_s9 + $0x564] ss:$8 sps:$4 sm:$0xff]  }
 0x4a9   : > { %v4176_v43 = vpop.eup %4175  ;;  %3103 = vmatpush1.bf16.msra.mxu0 %v3888_v38  ;;  %4195 = vpow2.f32 %v1410_v39  ;;  %v3918_v39 = vld [vmem:[%s5526_s9 + $0x550] ss:$8 sps:$4 sm:$0xff]  }
 0x4aa   : > { %v4927_v47 = vpop.eup %4177  ;;  %2962 = vmatprep.mubr.bf16.mxu1 %v1435_v42  ;;  %v1443_v10 = vpack.c.bf16 %v4176_v43, %v4174_v35  ;;  %3104 = vmatprep.subr.bf16.mxu0 %v3896_v48  ;;  %4197 = vpow2.f32 %v1396_v18  ;;  %v3921_v18 = vld [vmem:[%s5526_s9 + $0x160] ss:$8 sps:$4 sm:$0xff]   ;;  %v3935_v35 = vld [vmem:[%s5526_s9 + $0x184] ss:$8 sps:$4 sm:$0xff]   ;;  %v3930_v42 = vld [vmem:[%s5526_s9 + $0x570] ss:$8 sps:$4 sm:$0xff]  }
 0x4ab   : > { %v4932_v62 = vpop.eup %4179  ;;  %2933 = vmatpush1.bf16.msra.mxu1 %v3891_v44  ;;  %4199 = vpow2.f32 %v1426_v36  ;;  %v3924_v44 = vld [vmem:[%s5526_s9 + $0x560] ss:$8 sps:$4 sm:$0xff]   ;;  %v3932_v36 = vld [vmem:[%s5526_s9 + $0x574] ss:$8 sps:$4 sm:$0xff]  }
 0x4ac   : > { %v4937_v32 = vpop.eup %4181  ;;  %3134 = vmatprep.mubr.bf16.mxu0 %v1443_v10  ;;  %2934 = vmatprep.subr.bf16.mxu1 %v3899_v0  ;;  %v1434_v53 = vpack.c.bf16 %v4932_v62, %v4927_v47  ;;  %4201 = vpow2.f32 %v1386_v8  ;;  %v3938_v0 = vld [vmem:[%s5526_s9 + $0x584] ss:$8 sps:$4 sm:$0xff]   ;;  %v3933_v8 = vld [vmem:[%s5526_s9 + $0x180] ss:$8 sps:$4 sm:$0xff]   ;;  %v3942_v10 = vld [vmem:[%s5526_s9 + $0x590] ss:$8 sps:$4 sm:$0xff]  }
 0x4ad   : > { %v4944_v59 = vpop.eup %4183  ;;  %3105 = vmatpush1.bf16.msra.mxu0 %v3894_v58  ;;  %4203 = vpow2.f32 %v1416_v21  ;;  %v3936_v43 = vld [vmem:[%s5526_s9 + $0x580] ss:$8 sps:$4 sm:$0xff]   ;;  %v3944_v58 = vld [vmem:[%s5526_s9 + $0x594] ss:$8 sps:$4 sm:$0xff]   ;;  %v3939_v21 = vld [vmem:[%s5526_s9 + $0x190] ss:$8 sps:$4 sm:$0xff]  }
 0x4ae   : > { %v4949_v56 = vpop.eup %4185  ;;  %3106 = vmatprep.subr.bf16.mxu0 %v3902_v19  ;;  %v1442_v1 = vpack.c.bf16 %v4944_v59, %v4937_v32  ;;  %4205 = vpow2.f32 %v1400_v26  ;;  %v3950_v19 = vld [vmem:[%s5526_s9 + $0x5a4] ss:$8 sps:$4 sm:$0xff]   ;;  %v3945_v26 = vld [vmem:[%s5526_s9 + $0x1a0] ss:$8 sps:$4 sm:$0xff]   ;;  %v3990_v62 = vld [vmem:[%s5526_s9 + $0x610] ss:$8 sps:$4 sm:$0xff]  }
 0x4af   : > { %v4956_v46 = vpop.eup %4187  ;;  %2935 = vmatpush1.bf16.msra.mxu1 %v3897_v52  ;;  %4207 = vpow2.f32 %v1430_v30  ;;  %v3953_v52 = vld [vmem:[%s5526_s9 + $0x1b4] ss:$8 sps:$4 sm:$0xff]   ;;  %v3948_v30 = vld [vmem:[%s5526_s9 + $0x5a0] ss:$8 sps:$4 sm:$0xff]   ;;  %v3995_v47 = vld [vmem:[%s5526_s9 + $0x224] ss:$8 sps:$4 sm:$0xff]  }
 0x4b0   : > { %v4961_v3 = vpop.eup %4189  ;;  %2936 = vmatprep.subr.bf16.mxu1 %v3905_v51  ;;  %v1437_v4 = vpack.c.bf16 %v4956_v46, %v4949_v56  ;;  %4209 = vpow2.f32 %v1384_v63  ;;  %v3956_v51 = vld [vmem:[%s5526_s9 + $0x5b4] ss:$8 sps:$4 sm:$0xff]   ;;  %v3951_v63 = vld [vmem:[%s5526_s9 + $0x1b0] ss:$8 sps:$4 sm:$0xff]   ;;  %v3998_v32 = vld [vmem:[%s5526_s9 + $0x624] ss:$8 sps:$4 sm:$0xff]  }
 0x4b1   : > { %v4968_v15 = vpop.eup %4191  ;;  %3107 = vmatpush1.bf16.msra.mxu0 %v3900_v45  ;;  %4211 = vpow2.f32 %v1414_v60  ;;  %v3959_v45 = vld [vmem:[%s5526_s9 + $0x1c4] ss:$8 sps:$4 sm:$0xff]   ;;  %v3954_v60 = vld [vmem:[%s5526_s9 + $0x5b0] ss:$8 sps:$4 sm:$0xff]   ;;  %v4001_v59 = vld [vmem:[%s5526_s9 + $0x234] ss:$8 sps:$4 sm:$0xff]  }
 0x4b2   : > { %v4973_v11 = vpop.eup %4193  ;;  %3108 = vmatprep.subr.bf16.mxu0 %v3908_v61  ;;  %v1445_v13 = vpack.c.bf16 %v4968_v15, %v4961_v3  ;;  %v3962_v61 = vld [vmem:[%s5526_s9 + $0x5c4] ss:$8 sps:$4 sm:$0xff]   ;;  %v3996_v56 = vld [vmem:[%s5526_s9 + $0x620] ss:$8 sps:$4 sm:$0xff]   ;;  %v3999_v46 = vld [vmem:[%s5526_s9 + $0x230] ss:$8 sps:$4 sm:$0xff]  }
 0x4b3   : > { %v4980_v14 = vpop.eup %4195  ;;  %2937 = vmatpush1.bf16.msra.mxu1 %v3903_v2  ;;  %v3957_v2 = vld [vmem:[%s5526_s9 + $0x1c0] ss:$8 sps:$4 sm:$0xff]   ;;  %v4007_v3 = vld [vmem:[%s5526_s9 + $0x244] ss:$8 sps:$4 sm:$0xff]  }
 0x4b4   : > { %v4985_v16 = vpop.eup %4197  ;;  %2938 = vmatprep.subr.bf16.mxu1 %v3911_v57  ;;  %v1436_v34 = vpack.c.bf16 %v4980_v14, %v4973_v11  ;;  %v3965_v57 = vld [vmem:[%s5526_s9 + $0x1d4] ss:$8 sps:$4 sm:$0xff]   ;;  %v4010_v15 = vld [vmem:[%s5526_s9 + $0x644] ss:$8 sps:$4 sm:$0xff]   ;;  %v4086_v14 = vld [vmem:[%s5526_s9 + $0x710] ss:$8 sps:$4 sm:$0xff]  }
 0x4b5   : > { %v4992_v49 = vpop.eup %4199  ;;  %3109 = vmatpush1.bf16.msra.mxu0 %v3906_v5  ;;  %v3960_v5 = vld [vmem:[%s5526_s9 + $0x5c0] ss:$8 sps:$4 sm:$0xff]   ;;  %v4091_v11 = vld [vmem:[%s5526_s9 + $0x324] ss:$8 sps:$4 sm:$0xff]  }
 0x4b6   : > { %v4997_v22 = vpop.eup %4201  ;;  %3110 = vmatprep.subr.bf16.mxu0 %v3914_v28  ;;  %v1444_v6 = vpack.c.bf16 %v4992_v49, %v4985_v16  ;;  %v3968_v28 = vld [vmem:[%s5526_s9 + $0x5d4] ss:$8 sps:$4 sm:$0xff]   ;;  %v4089_v16 = vld [vmem:[%s5526_s9 + $0x320] ss:$8 sps:$4 sm:$0xff]  }
 0x4b7   : > { %v5004_v20 = vpop.eup %4203  ;;  %2939 = vmatpush1.bf16.msra.mxu1 %v3909_v25  ;;  %v3963_v25 = vld [vmem:[%s5526_s9 + $0x1d0] ss:$8 sps:$4 sm:$0xff]   ;;  %v4097_v49 = vld [vmem:[%s5526_s9 + $0x334] ss:$8 sps:$4 sm:$0xff]  }
 0x4b8   : > { %v5009_v9 = vpop.eup %4205  ;;  %2940 = vmatprep.subr.bf16.mxu1 %v3917_v17  ;;  %v1439_v37 = vpack.c.bf16 %v5004_v20, %v4997_v22  ;;  %v3971_v17 = vld [vmem:[%s5526_s9 + $0x1e4] ss:$8 sps:$4 sm:$0xff]   ;;  %v4100_v22 = vld [vmem:[%s5526_s9 + $0x734] ss:$8 sps:$4 sm:$0xff]  }
 0x4b9   : > { %v5016_v38 = vpop.eup %4207  ;;  %3111 = vmatpush1.bf16.msra.mxu0 %v3912_v12  ;;  %v3966_v12 = vld [vmem:[%s5526_s9 + $0x5d0] ss:$8 sps:$4 sm:$0xff]   ;;  %v4103_v20 = vld [vmem:[%s5526_s9 + $0x344] ss:$8 sps:$4 sm:$0xff]  }
 0x4ba   : > { %v5021_v27 = vpop.eup %4209  ;;  %3112 = vmatprep.subr.bf16.mxu0 %v3920_v31  ;;  %v1446_v23 = vpack.c.bf16 %v5016_v38, %v5009_v9  ;;  %v3974_v31 = vld [vmem:[%s5526_s9 + $0x5e4] ss:$8 sps:$4 sm:$0xff]   ;;  %v4134_v9 = vld [vmem:[%s5526_s9 + $0x3b0] ss:$8 sps:$4 sm:$0xff]  }
 0x4bb   : > { %v5028_v48 = vpop.eup %4211  ;;  %2941 = vmatpush1.bf16.msra.mxu1 %v3915_v55  ;;  %v3969_v55 = vld [vmem:[%s5526_s9 + $0x1e0] ss:$8 sps:$4 sm:$0xff]   ;;  %v4139_v38 = vld [vmem:[%s5526_s9 + $0x3c4] ss:$8 sps:$4 sm:$0xff]  }
 0x4bc   : > { %2942 = vmatprep.subr.bf16.mxu1 %v3923_v33  ;;  %v1438_v7 = vpack.c.bf16 %v5028_v48, %v5021_v27  ;;  %v3977_v33 = vld [vmem:[%s5526_s9 + $0x1f4] ss:$8 sps:$4 sm:$0xff]  }
 0x4bd   : > { %3113 = vmatpush1.bf16.msra.mxu0 %v3918_v39  ;;  %v3972_v39 = vld [vmem:[%s5526_s9 + $0x5e0] ss:$8 sps:$4 sm:$0xff]  }
 0x4be   : > { %3114 = vmatprep.subr.bf16.mxu0 %v3926_v40  ;;  %v3980_v40 = vld [vmem:[%s5526_s9 + $0x5f4] ss:$8 sps:$4 sm:$0xff]  }
 0x4bf   : > { %2943 = vmatpush1.bf16.msra.mxu1 %v3921_v18  ;;  %v3975_v18 = vld [vmem:[%s5526_s9 + $0x1f0] ss:$8 sps:$4 sm:$0xff]  }
 0x4c0   : > { %2944 = vmatprep.subr.bf16.mxu1 %v3929_v24  ;;  %v3983_v24 = vld [vmem:[%s5526_s9 + $0x204] ss:$8 sps:$4 sm:$0xff]  }
 0x4c1   : > { %3115 = vmatpush1.bf16.msra.mxu0 %v3924_v44  ;;  %v3978_v44 = vld [vmem:[%s5526_s9 + $0x5f0] ss:$8 sps:$4 sm:$0xff]  }
 0x4c2   : > { %3116 = vmatprep.subr.bf16.mxu0 %v3932_v36  ;;  %v3986_v36 = vld [vmem:[%s5526_s9 + $0x604] ss:$8 sps:$4 sm:$0xff]  }
 0x4c3   : > { %2945 = vmatpush1.bf16.msra.mxu1 %v3927_v41  ;;  %v3981_v41 = vld [vmem:[%s5526_s9 + $0x200] ss:$8 sps:$4 sm:$0xff]  }
 0x4c4   : > { %2946 = vmatprep.subr.bf16.mxu1 %v3935_v35  ;;  %v3989_v35 = vld [vmem:[%s5526_s9 + $0x214] ss:$8 sps:$4 sm:$0xff]  }
 0x4c5   : > { %3117 = vmatpush1.bf16.msra.mxu0 %v3930_v42  ;;  %v3984_v42 = vld [vmem:[%s5526_s9 + $0x600] ss:$8 sps:$4 sm:$0xff]  }
 0x4c6   : > { %3118 = vmatprep.subr.bf16.mxu0 %v3938_v0  ;;  %v3992_v0 = vld [vmem:[%s5526_s9 + $0x614] ss:$8 sps:$4 sm:$0xff]  }
 0x4c7   : > { %2947 = vmatpush1.bf16.msra.mxu1 %v3933_v8  ;;  %v3987_v8 = vld [vmem:[%s5526_s9 + $0x210] ss:$8 sps:$4 sm:$0xff]  }
 0x4c8   : > { %2948 = vmatprep.subr.bf16.mxu1 %v3941_v29  ;;  %v4013_v29 = vld [vmem:[%s5526_s9 + $0x254] ss:$8 sps:$4 sm:$0xff]  }
 0x4c9   : > { %3119 = vmatpush1.bf16.msra.mxu0 %v3936_v43  ;;  %v4008_v43 = vld [vmem:[%s5526_s9 + $0x640] ss:$8 sps:$4 sm:$0xff]  }
 0x4ca   : > { %3120 = vmatprep.subr.bf16.mxu0 %v3944_v58  ;;  %v4016_v58 = vld [vmem:[%s5526_s9 + $0x654] ss:$8 sps:$4 sm:$0xff]  }
 0x4cb   : > { %2949 = vmatpush1.bf16.msra.mxu1 %v3939_v21  ;;  %v4011_v21 = vld [vmem:[%s5526_s9 + $0x250] ss:$8 sps:$4 sm:$0xff]  }
 0x4cc   : > { %2950 = vmatprep.subr.bf16.mxu1 %v3947_v50  ;;  %v4019_v50 = vld [vmem:[%s5526_s9 + $0x264] ss:$8 sps:$4 sm:$0xff]  }
 0x4cd   : > { %3121 = vmatpush1.bf16.msra.mxu0 %v3942_v10  ;;  %v4014_v10 = vld [vmem:[%s5526_s9 + $0x650] ss:$8 sps:$4 sm:$0xff]  }
 0x4ce   : > { %3122 = vmatprep.subr.bf16.mxu0 %v3950_v19  ;;  %v4022_v19 = vld [vmem:[%s5526_s9 + $0x664] ss:$8 sps:$4 sm:$0xff]  }
 0x4cf   : > { %2951 = vmatpush1.bf16.msra.mxu1 %v3945_v26  ;;  %v4017_v26 = vld [vmem:[%s5526_s9 + $0x260] ss:$8 sps:$4 sm:$0xff]  }
 0x4d0   : > { %2952 = vmatprep.subr.bf16.mxu1 %v3953_v52  ;;  %v4025_v52 = vld [vmem:[%s5526_s9 + $0x274] ss:$8 sps:$4 sm:$0xff]  }
 0x4d1   : > { %3123 = vmatpush1.bf16.msra.mxu0 %v3948_v30  ;;  %v4020_v30 = vld [vmem:[%s5526_s9 + $0x660] ss:$8 sps:$4 sm:$0xff]  }
 0x4d2   : > { %3124 = vmatprep.subr.bf16.mxu0 %v3956_v51  ;;  %v4028_v51 = vld [vmem:[%s5526_s9 + $0x674] ss:$8 sps:$4 sm:$0xff]  }
 0x4d3   : > { %2953 = vmatpush1.bf16.msra.mxu1 %v3951_v63  ;;  %v4023_v63 = vld [vmem:[%s5526_s9 + $0x270] ss:$8 sps:$4 sm:$0xff]  }
 0x4d4   : > { %2954 = vmatprep.subr.bf16.mxu1 %v3959_v45  ;;  %v4031_v45 = vld [vmem:[%s5526_s9 + $0x284] ss:$8 sps:$4 sm:$0xff]  }
 0x4d5   : > { %3125 = vmatpush1.bf16.msra.mxu0 %v3954_v60  ;;  %v4026_v60 = vld [vmem:[%s5526_s9 + $0x670] ss:$8 sps:$4 sm:$0xff]  }
 0x4d6   : > { %3126 = vmatprep.subr.bf16.mxu0 %v3962_v61  ;;  %v4034_v61 = vld [vmem:[%s5526_s9 + $0x684] ss:$8 sps:$4 sm:$0xff]  }
 0x4d7   : > { %2955 = vmatpush1.bf16.msra.mxu1 %v3957_v2  ;;  %v4029_v2 = vld [vmem:[%s5526_s9 + $0x280] ss:$8 sps:$4 sm:$0xff]  }
 0x4d8   : > { %2956 = vmatprep.subr.bf16.mxu1 %v3965_v57  ;;  %v4037_v57 = vld [vmem:[%s5526_s9 + $0x294] ss:$8 sps:$4 sm:$0xff]  }
 0x4d9   : > { %3127 = vmatpush1.bf16.msra.mxu0 %v3960_v5  ;;  %v4032_v5 = vld [vmem:[%s5526_s9 + $0x680] ss:$8 sps:$4 sm:$0xff]  }
 0x4da   : > { %3128 = vmatprep.subr.bf16.mxu0 %v3968_v28  ;;  %v4040_v28 = vld [vmem:[%s5526_s9 + $0x694] ss:$8 sps:$4 sm:$0xff]  }
 0x4db   : > { %2957 = vmatpush1.bf16.msra.mxu1 %v3963_v25  ;;  %v4035_v25 = vld [vmem:[%s5526_s9 + $0x290] ss:$8 sps:$4 sm:$0xff]  }
 0x4dc   : > { %2958 = vmatprep.subr.bf16.mxu1 %v3971_v17  ;;  %v4043_v17 = vld [vmem:[%s5526_s9 + $0x2a4] ss:$8 sps:$4 sm:$0xff]  }
 0x4dd   : > { %3129 = vmatpush1.bf16.msra.mxu0 %v3966_v12  ;;  %v4038_v12 = vld [vmem:[%s5526_s9 + $0x690] ss:$8 sps:$4 sm:$0xff]  }
 0x4de   : > { %3130 = vmatprep.subr.bf16.mxu0 %v3974_v31  ;;  %v4046_v31 = vld [vmem:[%s5526_s9 + $0x6a4] ss:$8 sps:$4 sm:$0xff]  }
 0x4df   : > { %2959 = vmatpush1.bf16.msra.mxu1 %v3969_v55  ;;  %v4041_v55 = vld [vmem:[%s5526_s9 + $0x2a0] ss:$8 sps:$4 sm:$0xff]  }
 0x4e0   : > { %2960 = vmatprep.subr.bf16.mxu1 %v3977_v33  ;;  %v4049_v33 = vld [vmem:[%s5526_s9 + $0x2b4] ss:$8 sps:$4 sm:$0xff]  }
 0x4e1   : > { %3131 = vmatpush1.bf16.msra.mxu0 %v3972_v39  ;;  %v4044_v39 = vld [vmem:[%s5526_s9 + $0x6a0] ss:$8 sps:$4 sm:$0xff]  }
 0x4e2   : > { %3132 = vmatprep.subr.bf16.mxu0 %v3980_v40  ;;  %v4052_v40 = vld [vmem:[%s5526_s9 + $0x6b4] ss:$8 sps:$4 sm:$0xff]  }
 0x4e3   : > { %2961 = vmatpush1.bf16.msra.mxu1 %v3975_v18  ;;  %v4047_v18 = vld [vmem:[%s5526_s9 + $0x2b0] ss:$8 sps:$4 sm:$0xff]  }
 0x4e4   : > { %2973 = vmatprep.subr.bf16.mxu1 %v3983_v24  ;;  %v4055_v24 = vld [vmem:[%s5526_s9 + $0x2c4] ss:$8 sps:$4 sm:$0xff]  }
 0x4e5   : > { %3133 = vmatpush1.bf16.msra.mxu0 %v3978_v44  ;;  %v4050_v44 = vld [vmem:[%s5526_s9 + $0x6b0] ss:$8 sps:$4 sm:$0xff]  }
 0x4e6   : > { %2963 = vmatmul.mubr.bf16.vlgmr.msra.gmra.mrb[12].mxu1 %v1434_v53  ;;  %3145 = vmatprep.subr.bf16.mxu0 %v3986_v36  ;;  %v3993_v53 = vld [vmem:[%s5526_s9 + $0x220] ss:$8 sps:$4 sm:$0xff]   ;;  %v4058_v36 = vld [vmem:[%s5526_s9 + $0x6c4] ss:$8 sps:$4 sm:$0xff]  }
 0x4e7   : > { %2974 = vmatpush1.bf16.msra.mxu1 %v3981_v41  ;;  %3005 = vmatprep.mubr.bf16.mxu1 %v1437_v4  ;;  %v4002_v4 = vld [vmem:[%s5526_s9 + $0x630] ss:$8 sps:$4 sm:$0xff]   ;;  %v4053_v41 = vld [vmem:[%s5526_s9 + $0x2c0] ss:$8 sps:$4 sm:$0xff]  }
 0x4e8   : > { %3135 = vmatmul.mubr.bf16.vlgmr.msra.gmra.mrb[28].mxu0 %v1442_v1  ;;  %2975 = vmatprep.subr.bf16.mxu1 %v3989_v35  ;;  %v4004_v1 = vld [vmem:[%s5526_s9 + $0x634] ss:$8 sps:$4 sm:$0xff]  }
 0x4e9   : > { %3146 = vmatpush1.bf16.msra.mxu0 %v3984_v42  ;;  %3177 = vmatprep.mubr.bf16.mxu0 %v1445_v13  ;;  %v4005_v13 = vld [vmem:[%s5526_s9 + $0x240] ss:$8 sps:$4 sm:$0xff]   ;;  %v4061_v35 = vld [vmem:[%s5526_s9 + $0x2d4] ss:$8 sps:$4 sm:$0xff]  }
 0x4ea   : > { %3147 = vmatprep.subr.bf16.mxu0 %v3992_v0  ;;  %v4056_v42 = vld [vmem:[%s5526_s9 + $0x6c0] ss:$8 sps:$4 sm:$0xff]   ;;  %v4064_v0 = vld [vmem:[%s5526_s9 + $0x6d4] ss:$8 sps:$4 sm:$0xff]  }
 0x4eb   : > { %2976 = vmatpush1.bf16.msra.mxu1 %v3987_v8  ;;  %v4059_v8 = vld [vmem:[%s5526_s9 + $0x2d0] ss:$8 sps:$4 sm:$0xff]  }
 0x4ec   : > { %2977 = vmatprep.subr.bf16.mxu1 %v3995_v47  ;;  %v4067_v47 = vld [vmem:[%s5526_s9 + $0x2e4] ss:$8 sps:$4 sm:$0xff]  }
 0x4ed   : > { %3148 = vmatpush1.bf16.msra.mxu0 %v3990_v62  ;;  %v4062_v62 = vld [vmem:[%s5526_s9 + $0x6d0] ss:$8 sps:$4 sm:$0xff]  }
 0x4ee   : > { %3149 = vmatprep.subr.bf16.mxu0 %v3998_v32  ;;  %v4070_v32 = vld [vmem:[%s5526_s9 + $0x6e4] ss:$8 sps:$4 sm:$0xff]  }
 0x4ef   : > { %2978 = vmatpush1.bf16.msra.mxu1 %v3993_v53  ;;  %v4065_v53 = vld [vmem:[%s5526_s9 + $0x2e0] ss:$8 sps:$4 sm:$0xff]  }
 0x4f0   : > { %2979 = vmatprep.subr.bf16.mxu1 %v4001_v59  ;;  %v4073_v59 = vld [vmem:[%s5526_s9 + $0x2f4] ss:$8 sps:$4 sm:$0xff]  }
 0x4f1   : > { %3150 = vmatpush1.bf16.msra.mxu0 %v3996_v56  ;;  %v4068_v56 = vld [vmem:[%s5526_s9 + $0x6e0] ss:$8 sps:$4 sm:$0xff]  }
 0x4f2   : > { %3151 = vmatprep.subr.bf16.mxu0 %v4004_v1  ;;  %v4076_v1 = vld [vmem:[%s5526_s9 + $0x6f4] ss:$8 sps:$4 sm:$0xff]  }
 0x4f3   : > { %2980 = vmatpush1.bf16.msra.mxu1 %v3999_v46  ;;  %v4071_v46 = vld [vmem:[%s5526_s9 + $0x2f0] ss:$8 sps:$4 sm:$0xff]  }
 0x4f4   : > { %2981 = vmatprep.subr.bf16.mxu1 %v4007_v3  ;;  %v4079_v3 = vld [vmem:[%s5526_s9 + $0x304] ss:$8 sps:$4 sm:$0xff]  }
 0x4f5   : > { %3152 = vmatpush1.bf16.msra.mxu0 %v4002_v4  ;;  %v4074_v4 = vld [vmem:[%s5526_s9 + $0x6f0] ss:$8 sps:$4 sm:$0xff]  }
 0x4f6   : > { %3153 = vmatprep.subr.bf16.mxu0 %v4010_v15  ;;  %v4082_v15 = vld [vmem:[%s5526_s9 + $0x704] ss:$8 sps:$4 sm:$0xff]  }
 0x4f7   : > { %2982 = vmatpush1.bf16.msra.mxu1 %v4005_v13  ;;  %v4077_v13 = vld [vmem:[%s5526_s9 + $0x300] ss:$8 sps:$4 sm:$0xff]  }
 0x4f8   : > { %2983 = vmatprep.subr.bf16.mxu1 %v4013_v29  ;;  %v4085_v29 = vld [vmem:[%s5526_s9 + $0x314] ss:$8 sps:$4 sm:$0xff]  }
 0x4f9   : > { %3154 = vmatpush1.bf16.msra.mxu0 %v4008_v43  ;;  %v4080_v43 = vld [vmem:[%s5526_s9 + $0x700] ss:$8 sps:$4 sm:$0xff]  }
 0x4fa   : > { %3155 = vmatprep.subr.bf16.mxu0 %v4016_v58  ;;  %v4088_v58 = vld [vmem:[%s5526_s9 + $0x714] ss:$8 sps:$4 sm:$0xff]  }
 0x4fb   : > { %2984 = vmatpush1.bf16.msra.mxu1 %v4011_v21  ;;  %v4083_v21 = vld [vmem:[%s5526_s9 + $0x310] ss:$8 sps:$4 sm:$0xff]  }
 0x4fc   : > { %2985 = vmatprep.subr.bf16.mxu1 %v4019_v50  ;;  %v4106_v50 = vld [vmem:[%s5526_s9 + $0x744] ss:$8 sps:$4 sm:$0xff]  }
 0x4fd   : > { %3156 = vmatpush1.bf16.msra.mxu0 %v4014_v10  ;;  %v4101_v10 = vld [vmem:[%s5526_s9 + $0x340] ss:$8 sps:$4 sm:$0xff]  }
 0x4fe   : > { %3157 = vmatprep.subr.bf16.mxu0 %v4022_v19  ;;  %v4109_v19 = vld [vmem:[%s5526_s9 + $0x354] ss:$8 sps:$4 sm:$0xff]  }
 0x4ff   : > { %2986 = vmatpush1.bf16.msra.mxu1 %v4017_v26  ;;  %v4104_v26 = vld [vmem:[%s5526_s9 + $0x740] ss:$8 sps:$4 sm:$0xff]  }
 0x500   : > { %2987 = vmatprep.subr.bf16.mxu1 %v4025_v52  ;;  %v4112_v52 = vld [vmem:[%s5526_s9 + $0x754] ss:$8 sps:$4 sm:$0xff]  }
 0x501   : > { %3158 = vmatpush1.bf16.msra.mxu0 %v4020_v30  ;;  %v4107_v30 = vld [vmem:[%s5526_s9 + $0x350] ss:$8 sps:$4 sm:$0xff]  }
 0x502   : > { %3159 = vmatprep.subr.bf16.mxu0 %v4028_v51  ;;  %v4115_v51 = vld [vmem:[%s5526_s9 + $0x364] ss:$8 sps:$4 sm:$0xff]  }
 0x503   : > { %2988 = vmatpush1.bf16.msra.mxu1 %v4023_v63  ;;  %v4110_v63 = vld [vmem:[%s5526_s9 + $0x750] ss:$8 sps:$4 sm:$0xff]  }
 0x504   : > { %2989 = vmatprep.subr.bf16.mxu1 %v4031_v45  ;;  %v4118_v45 = vld [vmem:[%s5526_s9 + $0x764] ss:$8 sps:$4 sm:$0xff]  }
 0x505   : > { %3160 = vmatpush1.bf16.msra.mxu0 %v4026_v60  ;;  %v4113_v60 = vld [vmem:[%s5526_s9 + $0x360] ss:$8 sps:$4 sm:$0xff]  }
 0x506   : > { %3161 = vmatprep.subr.bf16.mxu0 %v4034_v61  ;;  %v4121_v61 = vld [vmem:[%s5526_s9 + $0x374] ss:$8 sps:$4 sm:$0xff]  }
 0x507   : > { %2990 = vmatpush1.bf16.msra.mxu1 %v4029_v2  ;;  %v4116_v2 = vld [vmem:[%s5526_s9 + $0x760] ss:$8 sps:$4 sm:$0xff]  }
 0x508   : > { %2991 = vmatprep.subr.bf16.mxu1 %v4037_v57  ;;  %v4124_v57 = vld [vmem:[%s5526_s9 + $0x774] ss:$8 sps:$4 sm:$0xff]  }
 0x509   : > { %3162 = vmatpush1.bf16.msra.mxu0 %v4032_v5  ;;  %v4119_v5 = vld [vmem:[%s5526_s9 + $0x370] ss:$8 sps:$4 sm:$0xff]  }
 0x50a   : > { %3163 = vmatprep.subr.bf16.mxu0 %v4040_v28  ;;  %v4127_v28 = vld [vmem:[%s5526_s9 + $0x384] ss:$8 sps:$4 sm:$0xff]  }
 0x50b   : > { %2992 = vmatpush1.bf16.msra.mxu1 %v4035_v25  ;;  %v4122_v25 = vld [vmem:[%s5526_s9 + $0x770] ss:$8 sps:$4 sm:$0xff]  }
 0x50c   : > { %2993 = vmatprep.subr.bf16.mxu1 %v4043_v17  ;;  %v4125_v17 = vld [vmem:[%s5526_s9 + $0x380] ss:$8 sps:$4 sm:$0xff]  }
 0x50d   : > { %3164 = vmatpush1.bf16.msra.mxu0 %v4038_v12  ;;  %v4130_v12 = vld [vmem:[%s5526_s9 + $0x394] ss:$8 sps:$4 sm:$0xff]  }
 0x50e   : > { %3165 = vmatprep.subr.bf16.mxu0 %v4046_v31  ;;  %v4128_v31 = vld [vmem:[%s5526_s9 + $0x390] ss:$8 sps:$4 sm:$0xff]  }
 0x50f   : > { %2994 = vmatpush1.bf16.msra.mxu1 %v4041_v55  ;;  %v4133_v55 = vld [vmem:[%s5526_s9 + $0x3a4] ss:$8 sps:$4 sm:$0xff]  }
 0x510   : > { %2995 = vmatprep.subr.bf16.mxu1 %v4049_v33  ;;  %v4131_v33 = vld [vmem:[%s5526_s9 + $0x3a0] ss:$8 sps:$4 sm:$0xff]  }
 0x511   : > { %3166 = vmatpush1.bf16.msra.mxu0 %v4044_v39  ;;  %v4136_v39 = vld [vmem:[%s5526_s9 + $0x3b4] ss:$8 sps:$4 sm:$0xff]  }
 0x512   : > { %3167 = vmatprep.subr.bf16.mxu0 %v4052_v40  ;;  %v4142_v40 = vld [vmem:[%s5526_s9 + $0x3d4] ss:$8 sps:$4 sm:$0xff]  }
 0x513   : > { %2996 = vmatpush1.bf16.msra.mxu1 %v4047_v18  ;;  %v4140_v18 = vld [vmem:[%s5526_s9 + $0x3d0] ss:$8 sps:$4 sm:$0xff]  }
 0x514   : > { %2997 = vmatprep.subr.bf16.mxu1 %v4055_v24  ;;  %v4145_v24 = vld [vmem:[%s5526_s9 + $0x3e4] ss:$8 sps:$4 sm:$0xff]  }
 0x515   : > { %3168 = vmatpush1.bf16.msra.mxu0 %v4050_v44  ;;  %v4143_v44 = vld [vmem:[%s5526_s9 + $0x3e0] ss:$8 sps:$4 sm:$0xff]  }
 0x516   : > { %3169 = vmatprep.subr.bf16.mxu0 %v4058_v36  ;;  %v4148_v36 = vld [vmem:[%s5526_s9 + $0x3f4] ss:$8 sps:$4 sm:$0xff]  }
 0x517   : > { %2998 = vmatpush1.bf16.msra.mxu1 %v4053_v41  ;;  %v4146_v41 = vld [vmem:[%s5526_s9 + $0x3f0] ss:$8 sps:$4 sm:$0xff]  }
 0x518   : > { %2999 = vmatprep.subr.bf16.mxu1 %v4061_v35 }
 0x519   : > { %3170 = vmatpush1.bf16.msra.mxu0 %v4056_v42 }
 0x51a   : > { %3171 = vmatprep.subr.bf16.mxu0 %v4064_v0 }
 0x51b   : > { %3000 = vmatpush1.bf16.msra.mxu1 %v4059_v8 }
 0x51c   : > { %3001 = vmatprep.subr.bf16.mxu1 %v4067_v47 }
 0x51d   : > { %3172 = vmatpush1.bf16.msra.mxu0 %v4062_v62 }
 0x51e   : > { %3173 = vmatprep.subr.bf16.mxu0 %v4070_v32 }
 0x51f   : > { %3002 = vmatpush1.bf16.msra.mxu1 %v4065_v53 }
 0x520   : > { %3003 = vmatprep.subr.bf16.mxu1 %v4073_v59 }
 0x521   : > { %3174 = vmatpush1.bf16.msra.mxu0 %v4068_v56 }
 0x522   : > { %3175 = vmatprep.subr.bf16.mxu0 %v4076_v1 }
 0x523   : > { %3004 = vmatpush1.bf16.msra.mxu1 %v4071_v46 }
 0x524   : > { %3016 = vmatprep.subr.bf16.mxu1 %v4079_v3 }
 0x525   : > { %3176 = vmatpush1.bf16.msra.mxu0 %v4074_v4 }
 0x526   : > { %3006 = vmatmul.mubr.bf16.vlgmr.msra.gmra.mrb[12].mxu1 %v1436_v34  ;;  %3188 = vmatprep.subr.bf16.mxu0 %v4082_v15  ;;  %v4094_v34 = vld [vmem:[%s5526_s9 + $0x724] ss:$8 sps:$4 sm:$0xff]  }
 0x527   : > { %3017 = vmatpush1.bf16.msra.mxu1 %v4077_v13  ;;  %3048 = vmatprep.mubr.bf16.mxu1 %v1439_v37  ;;  %v4098_v37 = vld [vmem:[%s5526_s9 + $0x730] ss:$8 sps:$4 sm:$0xff]  }
 0x528   : > { %3178 = vmatmul.mubr.bf16.vlgmr.msra.gmra.mrb[28].mxu0 %v1444_v6  ;;  %3018 = vmatprep.subr.bf16.mxu1 %v4085_v29  ;;  %v4095_v6 = vld [vmem:[%s5526_s9 + $0x330] ss:$8 sps:$4 sm:$0xff]  }
 0x529   : > { %3189 = vmatpush1.bf16.msra.mxu0 %v4080_v43  ;;  %3220 = vmatprep.mubr.bf16.mxu0 %v4227_v54  ;;  %v4092_v54 = vld [vmem:[%s5526_s9 + $0x720] ss:$8 sps:$4 sm:$0xff]  }
 0x52a   : > { %3190 = vmatprep.subr.bf16.mxu0 %v4088_v58 }
 0x52b   : > { %3019 = vmatpush1.bf16.msra.mxu1 %v4083_v21 }
 0x52c   : > { %3020 = vmatprep.subr.bf16.mxu1 %v4091_v11 }
 0x52d   : > { %3191 = vmatpush1.bf16.msra.mxu0 %v4086_v14 }
 0x52e   : > { %3192 = vmatprep.subr.bf16.mxu0 %v4094_v34 }
 0x52f   : > { %3021 = vmatpush1.bf16.msra.mxu1 %v4089_v16 }
 0x530   : > { %3022 = vmatprep.subr.bf16.mxu1 %v4097_v49 }
 0x531   : > { %3193 = vmatpush1.bf16.msra.mxu0 %v4092_v54 }
 0x532   : > { %3194 = vmatprep.subr.bf16.mxu0 %v4100_v22 }
 0x533   : > { %3023 = vmatpush1.bf16.msra.mxu1 %v4095_v6 }
 0x534   : > { %3024 = vmatprep.subr.bf16.mxu1 %v4103_v20 }
 0x535   : > { %3195 = vmatpush1.bf16.msra.mxu0 %v4098_v37 }
 0x536   : > { %3196 = vmatprep.subr.bf16.mxu0 %v4106_v50 }
 0x537   : > { %3025 = vmatpush1.bf16.msra.mxu1 %v4101_v10 }
 0x538   : > { %3026 = vmatprep.subr.bf16.mxu1 %v4109_v19 }
 0x539   : > { %3197 = vmatpush1.bf16.msra.mxu0 %v4104_v26 }
 0x53a   : > { %3198 = vmatprep.subr.bf16.mxu0 %v4112_v52 }
 0x53b   : > { %3027 = vmatpush1.bf16.msra.mxu1 %v4107_v30 }
 0x53c   : > { %3028 = vmatprep.subr.bf16.mxu1 %v4115_v51 }
 0x53d   : > { %3199 = vmatpush1.bf16.msra.mxu0 %v4110_v63 }
 0x53e   : > { %3200 = vmatprep.subr.bf16.mxu0 %v4118_v45 }
 0x53f   : > { %3029 = vmatpush1.bf16.msra.mxu1 %v4113_v60 }
 0x540   : > { %3030 = vmatprep.subr.bf16.mxu1 %v4121_v61 }
 0x541   : > { %3201 = vmatpush1.bf16.msra.mxu0 %v4116_v2 }
 0x542   : > { %3202 = vmatprep.subr.bf16.mxu0 %v4124_v57 }
 0x543   : > { %3031 = vmatpush1.bf16.msra.mxu1 %v4119_v5 }
 0x544   : > { %3032 = vmatprep.subr.bf16.mxu1 %v4127_v28 }
 0x545   : > { %3203 = vmatpush1.bf16.msra.mxu0 %v4122_v25 }
 0x547   : > { %3033 = vmatpush1.bf16.msra.mxu1 %v4125_v17 }
 0x548   : > { %3221 = vmatmul.mubr.bf16.vlgmr.msra.gmra.mrb[28].mxu0 %v1446_v23  ;;  %3034 = vmatprep.subr.bf16.mxu1 %v4130_v12  ;;  %v4137_v23 = vld [vmem:[%s5526_s9 + $0x3c0] ss:$8 sps:$4 sm:$0xff]  }
 0x54b   : > { %3035 = vmatpush1.bf16.msra.mxu1 %v4128_v31 }
 0x54c   : > { %3036 = vmatprep.subr.bf16.mxu1 %v4133_v55 }
 0x54f   : > { %3037 = vmatpush1.bf16.msra.mxu1 %v4131_v33 }
 0x550   : > { %3038 = vmatprep.subr.bf16.mxu1 %v4136_v39 }
 0x553   : > { %3039 = vmatpush1.bf16.msra.mxu1 %v4134_v9 }
 0x554   : > { %3040 = vmatprep.subr.bf16.mxu1 %v4139_v38 }
 0x557   : > { %3041 = vmatpush1.bf16.msra.mxu1 %v4137_v23 }
 0x558   : > { %3042 = vmatprep.subr.bf16.mxu1 %v4142_v40 }
 0x55b   : > { %3043 = vmatpush1.bf16.msra.mxu1 %v4140_v18 }
 0x55c   : > { %3044 = vmatprep.subr.bf16.mxu1 %v4145_v24 }
 0x55f   : > { %3045 = vmatpush1.bf16.msra.mxu1 %v4143_v44 }
 0x560   : > { %3046 = vmatprep.subr.bf16.mxu1 %v4148_v36 }
 0x563   : > { %3047 = vmatpush1.bf16.msra.mxu1 %v4146_v41 }
 0x566   : > { %3049 = vmatmul.mubr.bf16.vlgmr.msra.gmra.mrb[12].mxu1 %v1438_v7 }
 0x61b   : > { %v3222_v35 = vpop.f32.mrb[28].mxu0 }
 0x61c   : > { %v3224_v42 = vpop.f32.mrb[29].mxu0 }
 0x61d   : > { %v3226_v0 = vpop.f32.mrb[30].mxu0 }
 0x61e   : > { %v3228_v8 = vpop.f32.mrb[31].mxu0 }
 0x639   : > { %v3050_v47 = vpop.f32.mrb[12].mxu1 }
 0x63a   : > { %v3701_v62 = vadd.f32 %v3222_v35, %v3050_v47  ;;  %v3052_v32 = vpop.f32.mrb[13].mxu1 }
 0x63b   : > { %v3702_v53 = vadd.f32 %v3224_v42, %v3052_v32  ;;  %v3054_v59 = vpop.f32.mrb[14].mxu1 }
 0x63c   : > { %v3231_v56 = vadd.f32 1e-08, %v3701_v62  ;;  %v3703_v1 = vadd.f32 %v3226_v0, %v3054_v59  ;;  %v3056_v46 = vpop.f32.mrb[15].mxu1 }
 0x63d   : > { %v3704_v3 = vadd.f32 %v3228_v8, %v3056_v46 }
 0x63e   : > { %4213 = vrcp.f32 %v3231_v56  ;;  %v3232_v4 = vadd.f32 1e-08, %v3703_v1 }
 0x640   : > { %4215 = vrcp.f32 %v3232_v4 }
 0x648   : > { %v4214_v27 = vpop.eup %4213 }
 0x649   : > { %v3234_v48 = vmul.f32 %v4214_v27, %v3702_v53 }
 0x64a   : > { %v4216_v7 = vpop.eup %4215 }
 0x64b   : > { %3237 = vst [vmem:[%s404_s30] sm:$0xff] %v3234_v48  ;;  %v3236_v15 = vmul.f32 %v4216_v7, %v3704_v3 }
 0x64d   : > { %3238 = vst [vmem:[%s404_s30 + $0x8] sm:$0xff] %v3236_v15 }
 0x64e PF: > { %s22_s17 = sadd.s32 1, %s4223_s17  }
 0x64f   : > { %p19_p4 = scmp.ge.s32.totalorder %s22_s17, 4  }
 0x651   :  { %21 = sbr.rel (!%p19_p4) target bundleno = 1 (0x1), region = 102 }

// kernel: esmfold_forward.12
= control target key start
LH: loop header
LB: loop body
LE: loop exit
PB: predicated region body
PF: predicated region fallthrough
CT: control target
= control target key end

     0   :  { %s355_s12 = smov 0   ;;  %s381_s0 = inlined_call_operand.vmem [shape: bf16[16,32], index: 0, kind: input, shape index: {}]   ;;  %s382_s1 = inlined_call_operand.vmem [shape: bf16[32,128], index: 1, kind: input, shape index: {}]   ;;  %s383_s2 = inlined_call_operand.vmem [shape: f32[1,128], index: 2, kind: input, shape index: {}]   ;;  %s384_s3 = inlined_call_operand.vmem [shape: f32[16,128], index: 3, kind: output, shape index: {}]  }
   0x1 LB: > { %s289_s13 = sadd.s32 4294967295, %s331_s12   ;;  %p293_p0 = scmp.ge.s32.totalorder %s331_s12, 1  ;;  %s331_s12 = sphi %s355_s12, %s13_s12  }
   0x2   : > { %p136_p1 = scmp.lt.s32.totalorder %s331_s12, 3 }
   0x4   : > { %p137_p2 = pnand %p293_p0, %p136_p1 }
   0x5   : > { %v323_v0 = vld [vmem:[%s382_s1] sm:$0xff] (!%p137_p2)   ;;  %v333_v1 = vmov (!%p137_p2), 0.0   ;;  %v324_v2 = vld [vmem:[%s382_s1 + $0x8] sm:$0xff] (!%p137_p2)   ;;  %vm334_vm0 = vmmov (!%p137_p2), 0   ;;  %p158_p3 = scmp.lt.s32.totalorder (!%p137_p2), %s289_s13, 1  ;;  %vm191_vm1 = vcmask (!%p137_p2), 261120  }
   0x6   : > { %140 = sbr.rel (%p137_p2) target bundleno = 232 (0xe8), region = 32  ;;  %305 = vmatprep.subr.bf16.mxu0 (!%p137_p2), %v333_v1  ;;  %309 = vmatprep.mubr.msk.bf16.mxu0 (!%p137_p2), %vm334_vm0, %v333_v1  ;;  %v296_v4 = vld [vmem:[%s383_s2] ss:$0 sm:$0xff] (!%p137_p2) }
   0x7   : > { %306 = vmatpush3.bf16.msra.mxu0 (!%p137_p2), %v323_v0 }
   0x8   : > { %307 = vmatprep.subr.bf16.mxu0 (!%p137_p2), %v333_v1 }
   0xb   : > { %308 = vmatpush3.bf16.msra.mxu0 (!%p137_p2), %v324_v2 }
   0xd   : > { %s386_s13 = smov (!%p158_p3, %s289_s13), 1 }
   0xe   : > { %s294_s18 = sshll.u32 %s386_s13, 2  ;;  %s295_s22 = sshll.u32 %s386_s13, 3 }
   0xf   : > { %s161_s21 = scalar_lea.vmem %s381_s0, %s294_s18  ;;  %s165_s27 = scalar_lea.vmem %s384_s3, %s295_s22 }
  0x10   : > { %v167_v3 = vld [vmem:[%s161_s21] sm:$0xf] }
  0x11   : > { %310 = vmatmul.mubr.msk.bf16.vlgmr.msra.gmra.mrb[0].mxu0 %vm191_vm1, %v167_v3 }
  0xe4   : > { %v229_v5 = vpop.f32.mrb[0].mxu0 }
  0xe5   : > { %v230_v6 = vadd.f32 %v296_v4, %v229_v5  ;;  %v311_v7 = vpop.f32.mrb[1].mxu0 }
  0xe6   : > { %v232_v8 = vpop.f32.mrb[2].mxu0 }
  0xe7   : > { %235 = vst [vmem:[%s165_s27] sm:$0xff] %v230_v6  ;;  %v312_v9 = vpop.f32.mrb[3].mxu0 }
  0xe8 PF: > { %s13_s12 = sadd.s32 1, %s331_s12  }
  0xe9   : > { %p10_p4 = scmp.ge.s32.totalorder %s13_s12, 4  }
  0xeb   :  { %12 = sbr.rel (!%p10_p4) target bundleno = 1 (0x1), region = 62 }

</bundles_post_ra>
